<compile_context>
chip_gen: v6e
topology: v6e:2x2x1
jax: 0.10.0
libtpu: 0.0.40
codegen_flags: <defaults>
</compile_context>

<pallas_src>
import functools
import math

import numpy as np
import jax
import jax.numpy as jnp
from jax import lax
from jax.experimental import pallas as pl
from jax.experimental.pallas import tpu as pltpu

NEG_INF = -1e9
LN_EPS = 1e-5
BN_EPS = 1e-5


# ------------------------------ small helpers --------------------------------

def _bf16_dot(a, b, trans_b=False):
    """2-D matmul on the MXU: bf16 operands, f32 accumulation."""
    cdim_b = 1 if trans_b else 0
    return lax.dot_general(
        a.astype(jnp.bfloat16), b.astype(jnp.bfloat16),
        (((1,), (cdim_b,)), ((), ())),
        preferred_element_type=jnp.float32)


def _layer_norm(x, g, b, eps=LN_EPS):
    mu = jnp.mean(x, axis=-1, keepdims=True)
    var = jnp.mean(jnp.square(x - mu), axis=-1, keepdims=True)
    return (x - mu) * lax.rsqrt(var + eps) * g + b


def _pick_tile(dim, target, align):
    """Largest multiple of `align` that divides `dim` and is <= target, else full dim."""
    if dim <= target:
        return dim
    t = (target // align) * align
    while t >= align:
        if dim % t == 0:
            return t
        t -= align
    return dim


# -------------------------- generic tiled linear -----------------------------

def _matmul_kernel(x_ref, w_ref, b_ref, o_ref, acc_ref, *, act, n_k):
    @pl.when(pl.program_id(2) == 0)
    def _():
        acc_ref[...] = jnp.zeros_like(acc_ref)

    acc_ref[...] += _bf16_dot(x_ref[...], w_ref[...])

    @pl.when(pl.program_id(2) == n_k - 1)
    def _():
        y = acc_ref[...] + b_ref[...]
        if act == "relu":
            y = jnp.maximum(y, 0.0)
        elif act == "silu":
            y = y * jax.nn.sigmoid(y)
        o_ref[...] = y


def linear(x, w, b, act="none", tm=256, tn=256, tk=512):
    """y = act(x @ w + b), tiled over (M, N, K) with a VMEM f32 accumulator."""
    lead = x.shape[:-1]
    K = x.shape[-1]
    M = int(np.prod(lead))
    N = w.shape[1]
    x2 = x.reshape(M, K)
    tm = _pick_tile(M, tm, 8)
    tn = _pick_tile(N, tn, 128)
    tk = _pick_tile(K, tk, 128)
    gm, gn, gk = M // tm, N // tn, K // tk
    out = pl.pallas_call(
        functools.partial(_matmul_kernel, act=act, n_k=gk),
        grid=(gm, gn, gk),
        in_specs=[pl.BlockSpec((tm, tk), lambda i, j, k: (i, k)),
                  pl.BlockSpec((tk, tn), lambda i, j, k: (k, j)),
                  pl.BlockSpec((1, tn), lambda i, j, k: (0, j))],
        out_specs=pl.BlockSpec((tm, tn), lambda i, j, k: (i, j)),
        out_shape=jax.ShapeDtypeStruct((M, N), jnp.float32),
        scratch_shapes=[pltpu.VMEM((tm, tn), jnp.float32)],
        compiler_params=pltpu.CompilerParams(
            dimension_semantics=("parallel", "parallel", "arbitrary")),
    )(x2, w, b)
    return out.reshape(*lead, N)


# ------------------ fused per-layer Conformer kernel ---------------------------
# One grid step = one batch element.  Computes, entirely in VMEM:
#   x += 0.5*FFN1(LN(x)); x += W_o.SelfAttn(LN(x)); x += ConvModule(LN(x));
#   x += 0.5*FFN2(LN(x)); out = LN_final(x)

def _conformer_layer_kernel(len_ref, x_ref,
                            f1g_ref, f1b_ref, f1w1_ref, f1b1_ref, f1w2_ref, f1b2_ref,
                            mhg_ref, mhb_ref, wqkv_ref, bqkv_ref, wo_ref, bo_ref,
                            cvg_ref, cvb_ref, pw1w_ref, pw1b_ref, dww_ref, dwb_ref,
                            bns_ref, bnb_ref, pw2w_ref, pw2b_ref,
                            f2g_ref, f2b_ref, f2w1_ref, f2b1_ref, f2w2_ref, f2b2_ref,
                            flg_ref, flb_ref,
                            o_ref, pbuf_ref, *, num_heads, ksize):
    b = pl.program_id(0)
    x = x_ref[0]                                           # (T, D)
    T, D = x.shape

    def ffn(v, g, bb, w1, b1, w2, b2):
        y = _layer_norm(v, g, bb)
        h = _bf16_dot(y, w1) + b1
        h = h * jax.nn.sigmoid(h)                          # SiLU
        return v + 0.5 * (_bf16_dot(h, w2) + b2)           # fused half-residual

    # ---- FFN1 (half-step) ------------------------------------------------------
    x = ffn(x, f1g_ref[...], f1b_ref[...], f1w1_ref[...], f1b1_ref[...],
            f1w2_ref[...], f1b2_ref[...])

    # ---- MHSA: LN + fused QKV proj + per-head attention + out proj + residual ---
    y = _layer_norm(x, mhg_ref[...], mhb_ref[...])
    qkv = _bf16_dot(y, wqkv_ref[...]) + bqkv_ref[...]      # (T, 3D), one MXU pass
    q, k, v = qkv[:, :D], qkv[:, D:2 * D], qkv[:, 2 * D:]

    Dh = D // num_heads
    scale = 1.0 / math.sqrt(Dh)
    length = len_ref[b]                                    # prefetched scalar
    kmask = lax.broadcasted_iota(jnp.int32, (1, T), 1) >= length  # True = pad key

    heads = []
    for h in range(num_heads):                             # heads stay VMEM-resident
        sl = slice(h * Dh, (h + 1) * Dh)
        s = _bf16_dot(q[:, sl], k[:, sl], trans_b=True) * scale    # (T, T)
        s = jnp.where(kmask, NEG_INF, s)
        m = jnp.max(s, axis=-1, keepdims=True)
        p = jnp.exp(s - m)
        p = p * pl.reciprocal(jnp.sum(p, axis=-1, keepdims=True), approx=True)
        heads.append(_bf16_dot(p, v[:, sl]))               # (T, Dh)
    attn = jnp.concatenate(heads, axis=-1)                 # (T, D)
    x = x + _bf16_dot(attn, wo_ref[...]) + bo_ref[...]

    # ---- Convolution module ------------------------------------------------------
    y = _layer_norm(x, cvg_ref[...], cvb_ref[...])
    y = _bf16_dot(y, pw1w_ref[...]) + pw1b_ref[...]        # pointwise conv D -> 2D
    glu = y[:, :D] * jax.nn.sigmoid(y[:, D:])              # GLU over channels

    # Depthwise 'same' conv: zero-padded VMEM scratch + ksize shifted taps (VPU mul-adds).
    pad = (ksize - 1) // 2
    off = 8                                                # sublane-aligned start
    pbuf_ref[...] = jnp.zeros_like(pbuf_ref)
    pbuf_ref[off:off + T, :] = glu
    dww = dww_ref[...]                                     # (K, D)
    acc = jnp.zeros((T, D), jnp.float32)
    for j in range(ksize):
        s0 = off - pad + j
        acc = acc + pbuf_ref[s0:s0 + T, :] * dww[j][None, :]
    acc = acc + dwb_ref[...]

    y = acc * bns_ref[...] + bnb_ref[...]                  # eval-mode BatchNorm as affine
    y = y * jax.nn.sigmoid(y)                              # SiLU
    x = x + _bf16_dot(y, pw2w_ref[...]) + pw2b_ref[...]    # pointwise conv D -> D + residual

    # ---- FFN2 (half-step) + final LayerNorm --------------------------------------
    x = ffn(x, f2g_ref[...], f2b_ref[...], f2w1_ref[...], f2b1_ref[...],
            f2w2_ref[...], f2b2_ref[...])
    o_ref[0] = _layer_norm(x, flg_ref[...], flb_ref[...])


def conformer_layer(x, p, num_heads, ksize, lengths):
    B, T, D = x.shape
    Fh = p["ffn1"]["w1"].shape[1]

    # Fold eval-mode BatchNorm stats into a single affine (scale, bias).
    bn_scale = p["conv"]["bn_g"] * lax.rsqrt(p["conv"]["bn_var"] + BN_EPS)
    bn_bias = p["conv"]["bn_b"] - p["conv"]["bn_mean"] * bn_scale

    vec = lambda d: pl.BlockSpec((1, d), lambda b, lens: (0, 0))
    mat = lambda r, c: pl.BlockSpec((r, c), lambda b, lens: (0, 0))

    in_specs = [
        pl.BlockSpec((1, T, D), lambda b, lens: (b, 0, 0)),            # x
        vec(D), vec(D), mat(D, Fh), vec(Fh), mat(Fh, D), vec(D),       # ffn1
        vec(D), vec(D), mat(D, 3 * D), vec(3 * D), mat(D, D), vec(D),  # mha
        vec(D), vec(D), mat(D, 2 * D), vec(2 * D),                     # conv: LN + pw1
        mat(ksize, D), vec(D), vec(D), vec(D), mat(D, D), vec(D),      # conv: dw/bn/pw2
        vec(D), vec(D), mat(D, Fh), vec(Fh), mat(Fh, D), vec(D),       # ffn2
        vec(D), vec(D),                                                # final LN
    ]
    args = [
        x,
        p["ffn1"]["ln_g"], p["ffn1"]["ln_b"], p["ffn1"]["w1"], p["ffn1"]["b1"],
        p["ffn1"]["w2"], p["ffn1"]["b2"],
        p["mha"]["ln_g"], p["mha"]["ln_b"], p["mha"]["w_qkv"], p["mha"]["b_qkv"],
        p["mha"]["wo"], p["mha"]["bo"],
        p["conv"]["ln_g"], p["conv"]["ln_b"], p["conv"]["pw1_w"], p["conv"]["pw1_b"],
        p["conv"]["dw_w"], p["conv"]["dw_b"], bn_scale, bn_bias,
        p["conv"]["pw2_w"], p["conv"]["pw2_b"],
        p["ffn2"]["ln_g"], p["ffn2"]["ln_b"], p["ffn2"]["w1"], p["ffn2"]["b1"],
        p["ffn2"]["w2"], p["ffn2"]["b2"],
        p["final_ln_g"], p["final_ln_b"],
    ]

    grid_spec = pltpu.PrefetchScalarGridSpec(
        num_scalar_prefetch=1,                 # lengths -> SMEM, read in-kernel for mask
        grid=(B,),
        in_specs=in_specs,
        out_specs=pl.BlockSpec((1, T, D), lambda b, lens: (b, 0, 0)),
        scratch_shapes=[pltpu.VMEM((T + 16, D), jnp.float32)],   # padded depthwise buffer
    )
    return pl.pallas_call(
        functools.partial(_conformer_layer_kernel, num_heads=num_heads, ksize=ksize),
        grid_spec=grid_spec,
        out_shape=jax.ShapeDtypeStruct((B, T, D), jnp.float32),
        compiler_params=pltpu.CompilerParams(dimension_semantics=("parallel",)),
    )(lengths, *args)


# ------------------- fused output linear + final LayerNorm --------------------

def _linear_ln_kernel(x_ref, w_ref, b_ref, g_ref, bb_ref, o_ref):
    y = _bf16_dot(x_ref[...], w_ref[...]) + b_ref[...]
    o_ref[...] = _layer_norm(y, g_ref[...], bb_ref[...])


def linear_layernorm(x, w, b, g, bb):
    B, T, K = x.shape
    M = B * T
    N = w.shape[1]
    tm = _pick_tile(M, 256, 8)
    out = pl.pallas_call(
        _linear_ln_kernel,
        grid=(M // tm,),
        in_specs=[pl.BlockSpec((tm, K), lambda i: (i, 0)),
                  pl.BlockSpec((K, N), lambda i: (0, 0)),
                  pl.BlockSpec((1, N), lambda i: (0, 0)),
                  pl.BlockSpec((1, N), lambda i: (0, 0)),
                  pl.BlockSpec((1, N), lambda i: (0, 0))],
        out_specs=pl.BlockSpec((tm, N), lambda i: (i, 0)),
        out_shape=jax.ShapeDtypeStruct((M, N), jnp.float32),
        compiler_params=pltpu.CompilerParams(dimension_semantics=("parallel",)),
    )(x.reshape(M, K), w, b, g, bb)
    return out.reshape(B, T, N)


# ------------------------------ model forward ---------------------------------

def conformer_encoder_forward(params, cfg, src, lengths):
    B, T, F = src.shape
    stride = cfg["time_reduction_stride"]
    num_frames = T - (T % stride)
    x = src[:, :num_frames, :].reshape(B, num_frames // stride, F * stride)
    red_lengths = (lengths // stride).astype(jnp.int32)

    x = linear(x, params["input_w"], params["input_b"])        # input projection

    T_enc = x.shape[1]
    key_padding_mask = jnp.arange(T_enc)[None, :] >= red_lengths[:, None]   # True = pad

    for lp in params["layers"]:
        x = conformer_layer(x, lp, cfg["conformer_num_heads"], cfg["kernel_size"],
                            red_lengths)

    out = linear_layernorm(x, params["out_w"], params["out_b"],
                           params["ln_g"], params["ln_b"])
    return out, key_padding_mask


# ------------------------------ parameter init --------------------------------

def _dense(key, fan_in, fan_out):
    kw, kb = jax.random.split(key)
    bound = 1.0 / math.sqrt(fan_in)
    w = jax.random.uniform(kw, (fan_in, fan_out), jnp.float32, -bound, bound)
    b = jax.random.uniform(kb, (1, fan_out), jnp.float32, -bound, bound)
    return w, b


def _ln_params(dim):
    return jnp.ones((1, dim), jnp.float32), jnp.zeros((1, dim), jnp.float32)


def init_params(key, cfg):
    keys = iter(jax.random.split(key, 256))
    nk = lambda: next(keys)
    D = cfg["conformer_input_dim"]
    F = cfg["input_dim"]
    stride = cfg["time_reduction_stride"]
    ffn = cfg["conformer_ffn_dim"]
    ksize = cfg["kernel_size"]
    O = cfg["output_dim"]

    def ffn_params():
        g, b = _ln_params(D)
        w1, b1 = _dense(nk(), D, ffn)
        w2, b2 = _dense(nk(), ffn, D)
        return dict(ln_g=g, ln_b=b, w1=w1, b1=b1, w2=w2, b2=b2)

    def mha_params():
        g, b = _ln_params(D)
        wq, bq = _dense(nk(), D, D)
        wk, bk = _dense(nk(), D, D)
        wv, bv = _dense(nk(), D, D)
        wo, bo = _dense(nk(), D, D)
        return dict(ln_g=g, ln_b=b,
                    w_qkv=jnp.concatenate([wq, wk, wv], axis=1),
                    b_qkv=jnp.concatenate([bq, bk, bv], axis=1),
                    wo=wo, bo=bo)

    def conv_params():
        g, b = _ln_params(D)
        pw1_w, pw1_b = _dense(nk(), D, 2 * D)
        bound = 1.0 / math.sqrt(ksize)
        dw_w = jax.random.uniform(nk(), (ksize, D), jnp.float32, -bound, bound)
        dw_b = jax.random.uniform(nk(), (1, D), jnp.float32, -bound, bound)
        pw2_w, pw2_b = _dense(nk(), D, D)
        return dict(ln_g=g, ln_b=b, pw1_w=pw1_w, pw1_b=pw1_b, dw_w=dw_w, dw_b=dw_b,
                    bn_mean=jnp.zeros((1, D), jnp.float32),
                    bn_var=jnp.ones((1, D), jnp.float32),
                    bn_g=jnp.ones((1, D), jnp.float32),
                    bn_b=jnp.zeros((1, D), jnp.float32),
                    pw2_w=pw2_w, pw2_b=pw2_b)

    def layer_params():
        fg, fb = _ln_params(D)
        return dict(ffn1=ffn_params(), mha=mha_params(), conv=conv_params(),
                    ffn2=ffn_params(), final_ln_g=fg, final_ln_b=fb)

    in_w, in_b = _dense(nk(), F * stride, D)
    out_w, out_b = _dense(nk(), D, O)
    eg, eb = _ln_params(O)
    return dict(input_w=in_w, input_b=in_b,
                layers=[layer_params() for _ in range(cfg["conformer_num_layers"])],
                out_w=out_w, out_b=out_b, ln_g=eg, ln_b=eb)


# ----------------------------------- main --------------------------------------

if __name__ == "__main__":
    cfg = dict(
        input_dim=8,
        output_dim=48,
        time_reduction_stride=2,
        conformer_input_dim=32,
        conformer_ffn_dim=64,
        conformer_num_layers=2,
        conformer_num_heads=4,
        kernel_size=7,
    )

    key = jax.random.PRNGKey(0)
    pkey, skey = jax.random.split(key)
    params = init_params(pkey, cfg)

    B, Ts = 2, 16
    src = jax.random.normal(skey, (B, Ts, cfg["input_dim"]), jnp.float32)
    lengths = jnp.array([16, 12], jnp.int32)

    fwd = jax.jit(lambda s, l: conformer_encoder_forward(params, cfg, s, l))
    out, key_padding_mask = fwd(src, lengths)
    jax.block_until_ready(out)

    T_enc = Ts // cfg["time_reduction_stride"]
    assert out.shape == (B, T_enc, cfg["output_dim"]), out.shape
    assert key_padding_mask.shape == (B, T_enc), key_padding_mask.shape
    assert bool(jnp.all(jnp.isfinite(out)))
    print("KERNEL_OK")
</pallas_src>

<mosaic_0001>
module attributes {stable_mosaic.version = 11 : i64} {
  func.func @_matmul_kernel(%arg0: i32, %arg1: i32, %arg2: i32, %arg3: memref<16x16xf32, #tpu.memory_space<vmem>>, %arg4: memref<16x32xf32, #tpu.memory_space<vmem>>, %arg5: memref<1x32xf32, #tpu.memory_space<vmem>>, %arg6: memref<16x32xf32, #tpu.memory_space<vmem>>, %arg7: memref<16x32xf32, #tpu.memory_space<vmem>>) attributes {dimension_semantics = [#tpu.dimension_semantics<parallel>, #tpu.dimension_semantics<parallel>, #tpu.dimension_semantics<arbitrary>], iteration_bounds = array<i64: 1, 1, 1>, scalar_prefetch = 0 : i64, scratch_operands = 1 : i64, tpu.core_type = #tpu.core_type<tc>, window_params = [{transform_indices = @transform_0, window_bounds = array<i64: 16, 16>}, {transform_indices = @transform_1, window_bounds = array<i64: 16, 32>}, {transform_indices = @transform_2, window_bounds = array<i64: 1, 32>}, {transform_indices = @transform_3, window_bounds = array<i64: 16, 32>}]} {
    %c0_i32 = arith.constant 0 : i32
    %0 = arith.cmpi eq, %arg2, %c0_i32 : i32
    %1 = arith.extui %0 : i1 to i32
    %c0_i32_0 = arith.constant 0 : i32
    %2 = arith.cmpi ne, %1, %c0_i32_0 : i32
    scf.if %2 {
      %cst_10 = arith.constant 0.000000e+00 : f32
      %14 = vector.broadcast %cst_10 : f32 to vector<16x32xf32>
      %c0_11 = arith.constant 0 : index
      %c0_12 = arith.constant 0 : index
      %15 = vector.load %arg7[%c0_11, %c0_12] : memref<16x32xf32, #tpu.memory_space<vmem>>, vector<16x32xf32>
      tpu.vector_store %arg7[%c0_11, %c0_12], %14 {strides = array<i32>} : memref<16x32xf32, #tpu.memory_space<vmem>>, vector<16x32xf32>,
    } else {
    }
    %c0 = arith.constant 0 : index
    %c0_1 = arith.constant 0 : index
    %3 = vector.load %arg7[%c0, %c0_1] : memref<16x32xf32, #tpu.memory_space<vmem>>, vector<16x32xf32>
    %c0_2 = arith.constant 0 : index
    %c0_3 = arith.constant 0 : index
    %4 = vector.load %arg3[%c0_2, %c0_3] : memref<16x16xf32, #tpu.memory_space<vmem>>, vector<16x16xf32>
    %c0_4 = arith.constant 0 : index
    %c0_5 = arith.constant 0 : index
    %5 = vector.load %arg4[%c0_4, %c0_5] : memref<16x32xf32, #tpu.memory_space<vmem>>, vector<16x32xf32>
    %6 = arith.truncf %4 : vector<16x16xf32> to vector<16x16xbf16>
    %7 = arith.truncf %5 : vector<16x32xf32> to vector<16x32xbf16>
    %cst = arith.constant dense<0.000000e+00> : vector<16x32xf32>
    %8 = tpu.matmul %6, %7, %cst {dimension_numbers = #tpu.dot_dimension_numbers<[1], [0], [0], [1], [0, 0, 1, 1], [], []>} : vector<16x16xbf16>, vector<16x32xbf16>, vector<16x32xf32> -> vector<16x32xf32>
    %9 = arith.addf %3, %8 : vector<16x32xf32>
    %c0_6 = arith.constant 0 : index
    %c0_7 = arith.constant 0 : index
    %10 = vector.load %arg7[%c0_6, %c0_7] : memref<16x32xf32, #tpu.memory_space<vmem>>, vector<16x32xf32>
    tpu.vector_store %arg7[%c0_6, %c0_7], %9 {strides = array<i32>} : memref<16x32xf32, #tpu.memory_space<vmem>>, vector<16x32xf32>,
    %c0_i32_8 = arith.constant 0 : i32
    %11 = arith.cmpi eq, %arg2, %c0_i32_8 : i32
    %12 = arith.extui %11 : i1 to i32
    %c0_i32_9 = arith.constant 0 : i32
    %13 = arith.cmpi ne, %12, %c0_i32_9 : i32
    scf.if %13 {
      %c0_10 = arith.constant 0 : index
      %c0_11 = arith.constant 0 : index
      %14 = vector.load %arg7[%c0_10, %c0_11] : memref<16x32xf32, #tpu.memory_space<vmem>>, vector<16x32xf32>
      %c0_12 = arith.constant 0 : index
      %c0_13 = arith.constant 0 : index
      %15 = vector.load %arg5[%c0_12, %c0_13] : memref<1x32xf32, #tpu.memory_space<vmem>>, vector<1x32xf32>
      %16 = vector.broadcast %15 : vector<1x32xf32> to vector<16x32xf32>
      %17 = arith.addf %14, %16 : vector<16x32xf32>
      %c0_14 = arith.constant 0 : index
      %c0_15 = arith.constant 0 : index
      %18 = vector.load %arg6[%c0_14, %c0_15] : memref<16x32xf32, #tpu.memory_space<vmem>>, vector<16x32xf32>
      tpu.vector_store %arg6[%c0_14, %c0_15], %17 {strides = array<i32>} : memref<16x32xf32, #tpu.memory_space<vmem>>, vector<16x32xf32>,
    } else {
    }
    return
  }
  func.func @transform_0(%arg0: i32, %arg1: i32, %arg2: i32) -> (i32, i32) {
    %c0_i32 = arith.constant 0 : i32
    return %arg0, %arg2 : i32, i32
  }
  func.func @transform_1(%arg0: i32, %arg1: i32, %arg2: i32) -> (i32, i32) {
    %c0_i32 = arith.constant 0 : i32
    return %arg2, %arg1 : i32, i32
  }
  func.func @transform_2(%arg0: i32, %arg1: i32, %arg2: i32) -> (i32, i32) {
    %c0_i32 = arith.constant 0 : i32
    %c0_i32_0 = arith.constant 0 : i32
    return %c0_i32, %arg1 : i32, i32
  }
  func.func @transform_3(%arg0: i32, %arg1: i32, %arg2: i32) -> (i32, i32) {
    %c0_i32 = arith.constant 0 : i32
    return %arg0, %arg1 : i32, i32
  }
}

module attributes {stable_mosaic.version = 11 : i64} {
  func.func @_linear_ln_kernel(%arg0: i32, %arg1: memref<16x32xf32, #tpu.memory_space<vmem>>, %arg2: memref<32x48xf32, #tpu.memory_space<vmem>>, %arg3: memref<1x48xf32, #tpu.memory_space<vmem>>, %arg4: memref<1x48xf32, #tpu.memory_space<vmem>>, %arg5: memref<1x48xf32, #tpu.memory_space<vmem>>, %arg6: memref<16x48xf32, #tpu.memory_space<vmem>>) attributes {dimension_semantics = [#tpu.dimension_semantics<parallel>], iteration_bounds = array<i64: 1>, scalar_prefetch = 0 : i64, scratch_operands = 0 : i64, tpu.core_type = #tpu.core_type<tc>, window_params = [{transform_indices = @transform_0, window_bounds = array<i64: 16, 32>}, {pipeline_mode = #tpu.pipeline_mode<synchronous>, transform_indices = @transform_1, window_bounds = array<i64: 32, 48>}, {pipeline_mode = #tpu.pipeline_mode<synchronous>, transform_indices = @transform_2, window_bounds = array<i64: 1, 48>}, {pipeline_mode = #tpu.pipeline_mode<synchronous>, transform_indices = @transform_3, window_bounds = array<i64: 1, 48>}, {pipeline_mode = #tpu.pipeline_mode<synchronous>, transform_indices = @transform_4, window_bounds = array<i64: 1, 48>}, {transform_indices = @transform_5, window_bounds = array<i64: 16, 48>}]} {
    %c0 = arith.constant 0 : index
    %c0_0 = arith.constant 0 : index
    %0 = vector.load %arg1[%c0, %c0_0] : memref<16x32xf32, #tpu.memory_space<vmem>>, vector<16x32xf32>
    %c0_1 = arith.constant 0 : index
    %c0_2 = arith.constant 0 : index
    %1 = vector.load %arg2[%c0_1, %c0_2] : memref<32x48xf32, #tpu.memory_space<vmem>>, vector<32x48xf32>
    %2 = arith.truncf %0 : vector<16x32xf32> to vector<16x32xbf16>
    %3 = arith.truncf %1 : vector<32x48xf32> to vector<32x48xbf16>
    %cst = arith.constant dense<0.000000e+00> : vector<16x48xf32>
    %4 = tpu.matmul %2, %3, %cst {dimension_numbers = #tpu.dot_dimension_numbers<[1], [0], [0], [1], [0, 0, 1, 1], [], []>} : vector<16x32xbf16>, vector<32x48xbf16>, vector<16x48xf32> -> vector<16x48xf32>
    %c0_3 = arith.constant 0 : index
    %c0_4 = arith.constant 0 : index
    %5 = vector.load %arg3[%c0_3, %c0_4] : memref<1x48xf32, #tpu.memory_space<vmem>>, vector<1x48xf32>
    %6 = vector.broadcast %5 : vector<1x48xf32> to vector<16x48xf32>
    %7 = arith.addf %4, %6 : vector<16x48xf32>
    %c0_5 = arith.constant 0 : index
    %c0_6 = arith.constant 0 : index
    %8 = vector.load %arg4[%c0_5, %c0_6] : memref<1x48xf32, #tpu.memory_space<vmem>>, vector<1x48xf32>
    %c0_7 = arith.constant 0 : index
    %c0_8 = arith.constant 0 : index
    %9 = vector.load %arg5[%c0_7, %c0_8] : memref<1x48xf32, #tpu.memory_space<vmem>>, vector<1x48xf32>
    %cst_9 = arith.constant dense<0.000000e+00> : vector<16xf32>
    %10 = vector.multi_reduction <add>, %7, %cst_9 [1] : vector<16x48xf32> to vector<16xf32>
    %11 = vector.shape_cast %10 : vector<16xf32> to vector<16x1xf32>
    %cst_10 = arith.constant 4.800000e+01 : f32
    %12 = vector.broadcast %cst_10 : f32 to vector<16x1xf32>
    %13 = arith.divf %11, %12 : vector<16x1xf32>
    %14 = vector.broadcast %13 : vector<16x1xf32> to vector<16x48xf32>
    %15 = arith.subf %7, %14 : vector<16x48xf32>
    %16 = arith.mulf %15, %15 : vector<16x48xf32>
    %cst_11 = arith.constant dense<0.000000e+00> : vector<16xf32>
    %17 = vector.multi_reduction <add>, %16, %cst_11 [1] : vector<16x48xf32> to vector<16xf32>
    %18 = vector.shape_cast %17 : vector<16xf32> to vector<16x1xf32>
    %cst_12 = arith.constant 4.800000e+01 : f32
    %19 = vector.broadcast %cst_12 : f32 to vector<16x1xf32>
    %20 = arith.divf %18, %19 : vector<16x1xf32>
    %21 = vector.broadcast %13 : vector<16x1xf32> to vector<16x48xf32>
    %22 = arith.subf %7, %21 : vector<16x48xf32>
    %cst_13 = arith.constant 9.99999974E-6 : f32
    %23 = vector.broadcast %cst_13 : f32 to vector<16x1xf32>
    %24 = arith.addf %20, %23 : vector<16x1xf32>
    %25 = math.rsqrt %24 : vector<16x1xf32>
    %26 = vector.broadcast %25 : vector<16x1xf32> to vector<16x48xf32>
    %27 = arith.mulf %22, %26 : vector<16x48xf32>
    %28 = vector.broadcast %8 : vector<1x48xf32> to vector<16x48xf32>
    %29 = arith.mulf %27, %28 : vector<16x48xf32>
    %30 = vector.broadcast %9 : vector<1x48xf32> to vector<16x48xf32>
    %31 = arith.addf %29, %30 : vector<16x48xf32>
    %c0_14 = arith.constant 0 : index
    %c0_15 = arith.constant 0 : index
    %32 = vector.load %arg6[%c0_14, %c0_15] : memref<16x48xf32, #tpu.memory_space<vmem>>, vector<16x48xf32>
    tpu.vector_store %arg6[%c0_14, %c0_15], %31 {strides = array<i32>} : memref<16x48xf32, #tpu.memory_space<vmem>>, vector<16x48xf32>,
    return
  }
  func.func @transform_0(%arg0: i32) -> (i32, i32) {
    %c0_i32 = arith.constant 0 : i32
    %c0_i32_0 = arith.constant 0 : i32
    return %arg0, %c0_i32 : i32, i32
  }
  func.func @transform_1(%arg0: i32) -> (i32, i32) {
    %c0_i32 = arith.constant 0 : i32
    %c0_i32_0 = arith.constant 0 : i32
    %c0_i32_1 = arith.constant 0 : i32
    return %c0_i32, %c0_i32_0 : i32, i32
  }
  func.func @transform_2(%arg0: i32) -> (i32, i32) {
    %c0_i32 = arith.constant 0 : i32
    %c0_i32_0 = arith.constant 0 : i32
    %c0_i32_1 = arith.constant 0 : i32
    return %c0_i32, %c0_i32_0 : i32, i32
  }
  func.func @transform_3(%arg0: i32) -> (i32, i32) {
    %c0_i32 = arith.constant 0 : i32
    %c0_i32_0 = arith.constant 0 : i32
    %c0_i32_1 = arith.constant 0 : i32
    return %c0_i32, %c0_i32_0 : i32, i32
  }
  func.func @transform_4(%arg0: i32) -> (i32, i32) {
    %c0_i32 = arith.constant 0 : i32
    %c0_i32_0 = arith.constant 0 : i32
    %c0_i32_1 = arith.constant 0 : i32
    return %c0_i32, %c0_i32_0 : i32, i32
  }
  func.func @transform_5(%arg0: i32) -> (i32, i32) {
    %c0_i32 = arith.constant 0 : i32
    %c0_i32_0 = arith.constant 0 : i32
    return %arg0, %c0_i32 : i32, i32
  }
}

module attributes {stable_mosaic.version = 11 : i64} {
  func.func @_conformer_layer_kernel(%arg0: i32, %arg1: memref<2xi32, #tpu.memory_space<smem>>, %arg2: memref<1x8x32xf32, #tpu.memory_space<vmem>>, %arg3: memref<1x32xf32, #tpu.memory_space<vmem>>, %arg4: memref<1x32xf32, #tpu.memory_space<vmem>>, %arg5: memref<32x64xf32, #tpu.memory_space<vmem>>, %arg6: memref<1x64xf32, #tpu.memory_space<vmem>>, %arg7: memref<64x32xf32, #tpu.memory_space<vmem>>, %arg8: memref<1x32xf32, #tpu.memory_space<vmem>>, %arg9: memref<1x32xf32, #tpu.memory_space<vmem>>, %arg10: memref<1x32xf32, #tpu.memory_space<vmem>>, %arg11: memref<32x96xf32, #tpu.memory_space<vmem>>, %arg12: memref<1x96xf32, #tpu.memory_space<vmem>>, %arg13: memref<32x32xf32, #tpu.memory_space<vmem>>, %arg14: memref<1x32xf32, #tpu.memory_space<vmem>>, %arg15: memref<1x32xf32, #tpu.memory_space<vmem>>, %arg16: memref<1x32xf32, #tpu.memory_space<vmem>>, %arg17: memref<32x64xf32, #tpu.memory_space<vmem>>, %arg18: memref<1x64xf32, #tpu.memory_space<vmem>>, %arg19: memref<7x32xf32, #tpu.memory_space<vmem>>, %arg20: memref<1x32xf32, #tpu.memory_space<vmem>>, %arg21: memref<1x32xf32, #tpu.memory_space<vmem>>, %arg22: memref<1x32xf32, #tpu.memory_space<vmem>>, %arg23: memref<32x32xf32, #tpu.memory_space<vmem>>, %arg24: memref<1x32xf32, #tpu.memory_space<vmem>>, %arg25: memref<1x32xf32, #tpu.memory_space<vmem>>, %arg26: memref<1x32xf32, #tpu.memory_space<vmem>>, %arg27: memref<32x64xf32, #tpu.memory_space<vmem>>, %arg28: memref<1x64xf32, #tpu.memory_space<vmem>>, %arg29: memref<64x32xf32, #tpu.memory_space<vmem>>, %arg30: memref<1x32xf32, #tpu.memory_space<vmem>>, %arg31: memref<1x32xf32, #tpu.memory_space<vmem>>, %arg32: memref<1x32xf32, #tpu.memory_space<vmem>>, %arg33: memref<1x8x32xf32, #tpu.memory_space<vmem>>, %arg34: memref<24x32xf32, #tpu.memory_space<vmem>>) attributes {dimension_semantics = [#tpu.dimension_semantics<parallel>], iteration_bounds = array<i64: 2>, scalar_prefetch = 1 : i64, scratch_operands = 1 : i64, tpu.core_type = #tpu.core_type<tc>, window_params = [{transform_indices = @transform_0, window_bounds = array<i64: 1, 8, 32>}, {pipeline_mode = #tpu.pipeline_mode<synchronous>, transform_indices = @transform_1, window_bounds = array<i64: 1, 32>}, {pipeline_mode = #tpu.pipeline_mode<synchronous>, transform_indices = @transform_2, window_bounds = array<i64: 1, 32>}, {pipeline_mode = #tpu.pipeline_mode<synchronous>, transform_indices = @transform_3, window_bounds = array<i64: 32, 64>}, {pipeline_mode = #tpu.pipeline_mode<synchronous>, transform_indices = @transform_4, window_bounds = array<i64: 1, 64>}, {pipeline_mode = #tpu.pipeline_mode<synchronous>, transform_indices = @transform_5, window_bounds = array<i64: 64, 32>}, {pipeline_mode = #tpu.pipeline_mode<synchronous>, transform_indices = @transform_6, window_bounds = array<i64: 1, 32>}, {pipeline_mode = #tpu.pipeline_mode<synchronous>, transform_indices = @transform_7, window_bounds = array<i64: 1, 32>}, {pipeline_mode = #tpu.pipeline_mode<synchronous>, transform_indices = @transform_8, window_bounds = array<i64: 1, 32>}, {pipeline_mode = #tpu.pipeline_mode<synchronous>, transform_indices = @transform_9, window_bounds = array<i64: 32, 96>}, {pipeline_mode = #tpu.pipeline_mode<synchronous>, transform_indices = @transform_10, window_bounds = array<i64: 1, 96>}, {pipeline_mode = #tpu.pipeline_mode<synchronous>, transform_indices = @transform_11, window_bounds = array<i64: 32, 32>}, {pipeline_mode = #tpu.pipeline_mode<synchronous>, transform_indices = @transform_12, window_bounds = array<i64: 1, 32>}, {pipeline_mode = #tpu.pipeline_mode<synchronous>, transform_indices = @transform_13, window_bounds = array<i64: 1, 32>}, {pipeline_mode = #tpu.pipeline_mode<synchronous>, transform_indices = @transform_14, window_bounds = array<i64: 1, 32>}, {pipeline_mode = #tpu.pipeline_mode<synchronous>, transform_indices = @transform_15, window_bounds = array<i64: 32, 64>}, {pipeline_mode = #tpu.pipeline_mode<synchronous>, transform_indices = @transform_16, window_bounds = array<i64: 1, 64>}, {pipeline_mode = #tpu.pipeline_mode<synchronous>, transform_indices = @transform_17, window_bounds = array<i64: 7, 32>}, {pipeline_mode = #tpu.pipeline_mode<synchronous>, transform_indices = @transform_18, window_bounds = array<i64: 1, 32>}, {pipeline_mode = #tpu.pipeline_mode<synchronous>, transform_indices = @transform_19, window_bounds = array<i64: 1, 32>}, {pipeline_mode = #tpu.pipeline_mode<synchronous>, transform_indices = @transform_20, window_bounds = array<i64: 1, 32>}, {pipeline_mode = #tpu.pipeline_mode<synchronous>, transform_indices = @transform_21, window_bounds = array<i64: 32, 32>}, {pipeline_mode = #tpu.pipeline_mode<synchronous>, transform_indices = @transform_22, window_bounds = array<i64: 1, 32>}, {pipeline_mode = #tpu.pipeline_mode<synchronous>, transform_indices = @transform_23, window_bounds = array<i64: 1, 32>}, {pipeline_mode = #tpu.pipeline_mode<synchronous>, transform_indices = @transform_24, window_bounds = array<i64: 1, 32>}, {pipeline_mode = #tpu.pipeline_mode<synchronous>, transform_indices = @transform_25, window_bounds = array<i64: 32, 64>}, {pipeline_mode = #tpu.pipeline_mode<synchronous>, transform_indices = @transform_26, window_bounds = array<i64: 1, 64>}, {pipeline_mode = #tpu.pipeline_mode<synchronous>, transform_indices = @transform_27, window_bounds = array<i64: 64, 32>}, {pipeline_mode = #tpu.pipeline_mode<synchronous>, transform_indices = @transform_28, window_bounds = array<i64: 1, 32>}, {pipeline_mode = #tpu.pipeline_mode<synchronous>, transform_indices = @transform_29, window_bounds = array<i64: 1, 32>}, {pipeline_mode = #tpu.pipeline_mode<synchronous>, transform_indices = @transform_30, window_bounds = array<i64: 1, 32>}, {transform_indices = @transform_31, window_bounds = array<i64: 1, 8, 32>}]} {
    %c0 = arith.constant 0 : index
    %c0_0 = arith.constant 0 : index
    %c0_1 = arith.constant 0 : index
    %0 = vector.load %arg2[%c0, %c0_0, %c0_1] : memref<1x8x32xf32, #tpu.memory_space<vmem>>, vector<1x8x32xf32>
    %1 = vector.shape_cast %0 : vector<1x8x32xf32> to vector<8x32xf32>
    %c0_2 = arith.constant 0 : index
    %c0_3 = arith.constant 0 : index
    %2 = vector.load %arg3[%c0_2, %c0_3] : memref<1x32xf32, #tpu.memory_space<vmem>>, vector<1x32xf32>
    %c0_4 = arith.constant 0 : index
    %c0_5 = arith.constant 0 : index
    %3 = vector.load %arg4[%c0_4, %c0_5] : memref<1x32xf32, #tpu.memory_space<vmem>>, vector<1x32xf32>
    %c0_6 = arith.constant 0 : index
    %c0_7 = arith.constant 0 : index
    %4 = vector.load %arg5[%c0_6, %c0_7] : memref<32x64xf32, #tpu.memory_space<vmem>>, vector<32x64xf32>
    %c0_8 = arith.constant 0 : index
    %c0_9 = arith.constant 0 : index
    %5 = vector.load %arg6[%c0_8, %c0_9] : memref<1x64xf32, #tpu.memory_space<vmem>>, vector<1x64xf32>
    %c0_10 = arith.constant 0 : index
    %c0_11 = arith.constant 0 : index
    %6 = vector.load %arg7[%c0_10, %c0_11] : memref<64x32xf32, #tpu.memory_space<vmem>>, vector<64x32xf32>
    %c0_12 = arith.constant 0 : index
    %c0_13 = arith.constant 0 : index
    %7 = vector.load %arg8[%c0_12, %c0_13] : memref<1x32xf32, #tpu.memory_space<vmem>>, vector<1x32xf32>
    %cst = arith.constant dense<0.000000e+00> : vector<8xf32>
    %8 = vector.multi_reduction <add>, %1, %cst [1] : vector<8x32xf32> to vector<8xf32>
    %9 = vector.shape_cast %8 : vector<8xf32> to vector<8x1xf32>
    %cst_14 = arith.constant 3.200000e+01 : f32
    %10 = vector.broadcast %cst_14 : f32 to vector<8x1xf32>
    %11 = arith.divf %9, %10 : vector<8x1xf32>
    %12 = vector.broadcast %11 : vector<8x1xf32> to vector<8x32xf32>
    %13 = arith.subf %1, %12 : vector<8x32xf32>
    %14 = arith.mulf %13, %13 : vector<8x32xf32>
    %cst_15 = arith.constant dense<0.000000e+00> : vector<8xf32>
    %15 = vector.multi_reduction <add>, %14, %cst_15 [1] : vector<8x32xf32> to vector<8xf32>
    %16 = vector.shape_cast %15 : vector<8xf32> to vector<8x1xf32>
    %cst_16 = arith.constant 3.200000e+01 : f32
    %17 = vector.broadcast %cst_16 : f32 to vector<8x1xf32>
    %18 = arith.divf %16, %17 : vector<8x1xf32>
    %19 = vector.broadcast %11 : vector<8x1xf32> to vector<8x32xf32>
    %20 = arith.subf %1, %19 : vector<8x32xf32>
    %cst_17 = arith.constant 9.99999974E-6 : f32
    %21 = vector.broadcast %cst_17 : f32 to vector<8x1xf32>
    %22 = arith.addf %18, %21 : vector<8x1xf32>
    %23 = math.rsqrt %22 : vector<8x1xf32>
    %24 = vector.broadcast %23 : vector<8x1xf32> to vector<8x32xf32>
    %25 = arith.mulf %20, %24 : vector<8x32xf32>
    %26 = vector.broadcast %2 : vector<1x32xf32> to vector<8x32xf32>
    %27 = arith.mulf %25, %26 : vector<8x32xf32>
    %28 = vector.broadcast %3 : vector<1x32xf32> to vector<8x32xf32>
    %29 = arith.addf %27, %28 : vector<8x32xf32>
    %30 = arith.truncf %29 : vector<8x32xf32> to vector<8x32xbf16>
    %31 = arith.truncf %4 : vector<32x64xf32> to vector<32x64xbf16>
    %cst_18 = arith.constant dense<0.000000e+00> : vector<8x64xf32>
    %32 = tpu.matmul %30, %31, %cst_18 {dimension_numbers = #tpu.dot_dimension_numbers<[1], [0], [0], [1], [0, 0, 1, 1], [], []>} : vector<8x32xbf16>, vector<32x64xbf16>, vector<8x64xf32> -> vector<8x64xf32>
    %33 = vector.broadcast %5 : vector<1x64xf32> to vector<8x64xf32>
    %34 = arith.addf %32, %33 : vector<8x64xf32>
    %35 = arith.negf %34 : vector<8x64xf32>
    %36 = math.exp %35 : vector<8x64xf32>
    %cst_19 = arith.constant 1.000000e+00 : f32
    %37 = vector.broadcast %cst_19 : f32 to vector<8x64xf32>
    %38 = arith.addf %37, %36 : vector<8x64xf32>
    %39 = arith.divf %37, %38 : vector<8x64xf32>
    %40 = arith.mulf %34, %39 : vector<8x64xf32>
    %41 = arith.truncf %40 : vector<8x64xf32> to vector<8x64xbf16>
    %42 = arith.truncf %6 : vector<64x32xf32> to vector<64x32xbf16>
    %cst_20 = arith.constant dense<0.000000e+00> : vector<8x32xf32>
    %43 = tpu.matmul %41, %42, %cst_20 {dimension_numbers = #tpu.dot_dimension_numbers<[1], [0], [0], [1], [0, 0, 1, 1], [], []>} : vector<8x64xbf16>, vector<64x32xbf16>, vector<8x32xf32> -> vector<8x32xf32>
    %44 = vector.broadcast %7 : vector<1x32xf32> to vector<8x32xf32>
    %45 = arith.addf %43, %44 : vector<8x32xf32>
    %cst_21 = arith.constant 5.000000e-01 : f32
    %46 = vector.broadcast %cst_21 : f32 to vector<8x32xf32>
    %47 = arith.mulf %46, %45 : vector<8x32xf32>
    %48 = arith.addf %1, %47 : vector<8x32xf32>
    %c0_22 = arith.constant 0 : index
    %c0_23 = arith.constant 0 : index
    %49 = vector.load %arg9[%c0_22, %c0_23] : memref<1x32xf32, #tpu.memory_space<vmem>>, vector<1x32xf32>
    %c0_24 = arith.constant 0 : index
    %c0_25 = arith.constant 0 : index
    %50 = vector.load %arg10[%c0_24, %c0_25] : memref<1x32xf32, #tpu.memory_space<vmem>>, vector<1x32xf32>
    %cst_26 = arith.constant dense<0.000000e+00> : vector<8xf32>
    %51 = vector.multi_reduction <add>, %48, %cst_26 [1] : vector<8x32xf32> to vector<8xf32>
    %52 = vector.shape_cast %51 : vector<8xf32> to vector<8x1xf32>
    %cst_27 = arith.constant 3.200000e+01 : f32
    %53 = vector.broadcast %cst_27 : f32 to vector<8x1xf32>
    %54 = arith.divf %52, %53 : vector<8x1xf32>
    %55 = vector.broadcast %54 : vector<8x1xf32> to vector<8x32xf32>
    %56 = arith.subf %48, %55 : vector<8x32xf32>
    %57 = arith.mulf %56, %56 : vector<8x32xf32>
    %cst_28 = arith.constant dense<0.000000e+00> : vector<8xf32>
    %58 = vector.multi_reduction <add>, %57, %cst_28 [1] : vector<8x32xf32> to vector<8xf32>
    %59 = vector.shape_cast %58 : vector<8xf32> to vector<8x1xf32>
    %cst_29 = arith.constant 3.200000e+01 : f32
    %60 = vector.broadcast %cst_29 : f32 to vector<8x1xf32>
    %61 = arith.divf %59, %60 : vector<8x1xf32>
    %62 = vector.broadcast %54 : vector<8x1xf32> to vector<8x32xf32>
    %63 = arith.subf %48, %62 : vector<8x32xf32>
    %cst_30 = arith.constant 9.99999974E-6 : f32
    %64 = vector.broadcast %cst_30 : f32 to vector<8x1xf32>
    %65 = arith.addf %61, %64 : vector<8x1xf32>
    %66 = math.rsqrt %65 : vector<8x1xf32>
    %67 = vector.broadcast %66 : vector<8x1xf32> to vector<8x32xf32>
    %68 = arith.mulf %63, %67 : vector<8x32xf32>
    %69 = vector.broadcast %49 : vector<1x32xf32> to vector<8x32xf32>
    %70 = arith.mulf %68, %69 : vector<8x32xf32>
    %71 = vector.broadcast %50 : vector<1x32xf32> to vector<8x32xf32>
    %72 = arith.addf %70, %71 : vector<8x32xf32>
    %c0_31 = arith.constant 0 : index
    %c0_32 = arith.constant 0 : index
    %73 = vector.load %arg11[%c0_31, %c0_32] : memref<32x96xf32, #tpu.memory_space<vmem>>, vector<32x96xf32>
    %74 = arith.truncf %72 : vector<8x32xf32> to vector<8x32xbf16>
    %75 = arith.truncf %73 : vector<32x96xf32> to vector<32x96xbf16>
    %cst_33 = arith.constant dense<0.000000e+00> : vector<8x96xf32>
    %76 = tpu.matmul %74, %75, %cst_33 {dimension_numbers = #tpu.dot_dimension_numbers<[1], [0], [0], [1], [0, 0, 1, 1], [], []>} : vector<8x32xbf16>, vector<32x96xbf16>, vector<8x96xf32> -> vector<8x96xf32>
    %c0_34 = arith.constant 0 : index
    %c0_35 = arith.constant 0 : index
    %77 = vector.load %arg12[%c0_34, %c0_35] : memref<1x96xf32, #tpu.memory_space<vmem>>, vector<1x96xf32>
    %78 = vector.broadcast %77 : vector<1x96xf32> to vector<8x96xf32>
    %79 = arith.addf %76, %78 : vector<8x96xf32>
    %80 = vector.extract_strided_slice %79 {offsets = [0, 0], sizes = [8, 32], strides = [1, 1]} : vector<8x96xf32> to vector<8x32xf32>
    %81 = vector.extract_strided_slice %79 {offsets = [0, 32], sizes = [8, 32], strides = [1, 1]} : vector<8x96xf32> to vector<8x32xf32>
    %82 = vector.extract_strided_slice %79 {offsets = [0, 64], sizes = [8, 32], strides = [1, 1]} : vector<8x96xf32> to vector<8x32xf32>
    %83 = arith.index_cast %arg0 : i32 to index
    %84 = memref.load %arg1[%83] : memref<2xi32, #tpu.memory_space<smem>>
    %85 = tpu.iota {dimensions = array<i32: 1>} : vector<1x8xi32>
    %86 = vector.broadcast %84 : i32 to vector<1x8xi32>
    %87 = arith.cmpi sge, %85, %86 : vector<1x8xi32>
    %88 = vector.extract_strided_slice %80 {offsets = [0, 0], sizes = [8, 8], strides = [1, 1]} : vector<8x32xf32> to vector<8x8xf32>
    %89 = vector.extract_strided_slice %81 {offsets = [0, 0], sizes = [8, 8], strides = [1, 1]} : vector<8x32xf32> to vector<8x8xf32>
    %90 = arith.truncf %88 : vector<8x8xf32> to vector<8x8xbf16>
    %91 = arith.truncf %89 : vector<8x8xf32> to vector<8x8xbf16>
    %cst_36 = arith.constant dense<0.000000e+00> : vector<8x8xf32>
    %92 = tpu.matmul %90, %91, %cst_36 {dimension_numbers = #tpu.dot_dimension_numbers<[1], [1], [0], [0], [0, 0, 1, 0], [], []>} : vector<8x8xbf16>, vector<8x8xbf16>, vector<8x8xf32> -> vector<8x8xf32>
    %cst_37 = arith.constant 0.353553385 : f32
    %93 = vector.broadcast %cst_37 : f32 to vector<8x8xf32>
    %94 = arith.mulf %92, %93 : vector<8x8xf32>
    %cst_38 = arith.constant -1.000000e+09 : f32
    %95 = vector.shape_cast %87 : vector<1x8xi1> to vector<1x8xi1>
    %96 = vector.broadcast %95 : vector<1x8xi1> to vector<8x8xi1>
    %97 = vector.broadcast %cst_38 : f32 to vector<8x8xf32>
    %98 = arith.select %96, %97, %94 : vector<8x8xi1>, vector<8x8xf32>
    %cst_39 = arith.constant dense<0xFF800000> : vector<8xf32>
    %99 = vector.multi_reduction <maximumf>, %98, %cst_39 [1] : vector<8x8xf32> to vector<8xf32>
    %100 = vector.shape_cast %99 : vector<8xf32> to vector<8x1xf32>
    %101 = vector.broadcast %100 : vector<8x1xf32> to vector<8x8xf32>
    %102 = arith.subf %98, %101 : vector<8x8xf32>
    %103 = math.exp %102 : vector<8x8xf32>
    %cst_40 = arith.constant dense<0.000000e+00> : vector<8xf32>
    %104 = vector.multi_reduction <add>, %103, %cst_40 [1] : vector<8x8xf32> to vector<8xf32>
    %105 = vector.shape_cast %104 : vector<8xf32> to vector<8x1xf32>
    %106 = tpu.reciprocal %105 {approx = true} : vector<8x1xf32> -> vector<8x1xf32>
    %107 = vector.broadcast %106 : vector<8x1xf32> to vector<8x8xf32>
    %108 = arith.mulf %103, %107 : vector<8x8xf32>
    %109 = vector.extract_strided_slice %82 {offsets = [0, 0], sizes = [8, 8], strides = [1, 1]} : vector<8x32xf32> to vector<8x8xf32>
    %110 = arith.truncf %108 : vector<8x8xf32> to vector<8x8xbf16>
    %111 = arith.truncf %109 : vector<8x8xf32> to vector<8x8xbf16>
    %cst_41 = arith.constant dense<0.000000e+00> : vector<8x8xf32>
    %112 = tpu.matmul %110, %111, %cst_41 {dimension_numbers = #tpu.dot_dimension_numbers<[1], [0], [0], [1], [0, 0, 1, 1], [], []>} : vector<8x8xbf16>, vector<8x8xbf16>, vector<8x8xf32> -> vector<8x8xf32>
    %113 = vector.extract_strided_slice %80 {offsets = [0, 8], sizes = [8, 8], strides = [1, 1]} : vector<8x32xf32> to vector<8x8xf32>
    %114 = vector.extract_strided_slice %81 {offsets = [0, 8], sizes = [8, 8], strides = [1, 1]} : vector<8x32xf32> to vector<8x8xf32>
    %115 = arith.truncf %113 : vector<8x8xf32> to vector<8x8xbf16>
    %116 = arith.truncf %114 : vector<8x8xf32> to vector<8x8xbf16>
    %cst_42 = arith.constant dense<0.000000e+00> : vector<8x8xf32>
    %117 = tpu.matmul %115, %116, %cst_42 {dimension_numbers = #tpu.dot_dimension_numbers<[1], [1], [0], [0], [0, 0, 1, 0], [], []>} : vector<8x8xbf16>, vector<8x8xbf16>, vector<8x8xf32> -> vector<8x8xf32>
    %cst_43 = arith.constant 0.353553385 : f32
    %118 = vector.broadcast %cst_43 : f32 to vector<8x8xf32>
    %119 = arith.mulf %117, %118 : vector<8x8xf32>
    %cst_44 = arith.constant -1.000000e+09 : f32
    %120 = vector.shape_cast %87 : vector<1x8xi1> to vector<1x8xi1>
    %121 = vector.broadcast %120 : vector<1x8xi1> to vector<8x8xi1>
    %122 = vector.broadcast %cst_44 : f32 to vector<8x8xf32>
    %123 = arith.select %121, %122, %119 : vector<8x8xi1>, vector<8x8xf32>
    %cst_45 = arith.constant dense<0xFF800000> : vector<8xf32>
    %124 = vector.multi_reduction <maximumf>, %123, %cst_45 [1] : vector<8x8xf32> to vector<8xf32>
    %125 = vector.shape_cast %124 : vector<8xf32> to vector<8x1xf32>
    %126 = vector.broadcast %125 : vector<8x1xf32> to vector<8x8xf32>
    %127 = arith.subf %123, %126 : vector<8x8xf32>
    %128 = math.exp %127 : vector<8x8xf32>
    %cst_46 = arith.constant dense<0.000000e+00> : vector<8xf32>
    %129 = vector.multi_reduction <add>, %128, %cst_46 [1] : vector<8x8xf32> to vector<8xf32>
    %130 = vector.shape_cast %129 : vector<8xf32> to vector<8x1xf32>
    %131 = tpu.reciprocal %130 {approx = true} : vector<8x1xf32> -> vector<8x1xf32>
    %132 = vector.broadcast %131 : vector<8x1xf32> to vector<8x8xf32>
    %133 = arith.mulf %128, %132 : vector<8x8xf32>
    %134 = vector.extract_strided_slice %82 {offsets = [0, 8], sizes = [8, 8], strides = [1, 1]} : vector<8x32xf32> to vector<8x8xf32>
    %135 = arith.truncf %133 : vector<8x8xf32> to vector<8x8xbf16>
    %136 = arith.truncf %134 : vector<8x8xf32> to vector<8x8xbf16>
    %cst_47 = arith.constant dense<0.000000e+00> : vector<8x8xf32>
    %137 = tpu.matmul %135, %136, %cst_47 {dimension_numbers = #tpu.dot_dimension_numbers<[1], [0], [0], [1], [0, 0, 1, 1], [], []>} : vector<8x8xbf16>, vector<8x8xbf16>, vector<8x8xf32> -> vector<8x8xf32>
    %138 = vector.extract_strided_slice %80 {offsets = [0, 16], sizes = [8, 8], strides = [1, 1]} : vector<8x32xf32> to vector<8x8xf32>
    %139 = vector.extract_strided_slice %81 {offsets = [0, 16], sizes = [8, 8], strides = [1, 1]} : vector<8x32xf32> to vector<8x8xf32>
    %140 = arith.truncf %138 : vector<8x8xf32> to vector<8x8xbf16>
    %141 = arith.truncf %139 : vector<8x8xf32> to vector<8x8xbf16>
    %cst_48 = arith.constant dense<0.000000e+00> : vector<8x8xf32>
    %142 = tpu.matmul %140, %141, %cst_48 {dimension_numbers = #tpu.dot_dimension_numbers<[1], [1], [0], [0], [0, 0, 1, 0], [], []>} : vector<8x8xbf16>, vector<8x8xbf16>, vector<8x8xf32> -> vector<8x8xf32>
    %cst_49 = arith.constant 0.353553385 : f32
    %143 = vector.broadcast %cst_49 : f32 to vector<8x8xf32>
    %144 = arith.mulf %142, %143 : vector<8x8xf32>
    %cst_50 = arith.constant -1.000000e+09 : f32
    %145 = vector.shape_cast %87 : vector<1x8xi1> to vector<1x8xi1>
    %146 = vector.broadcast %145 : vector<1x8xi1> to vector<8x8xi1>
    %147 = vector.broadcast %cst_50 : f32 to vector<8x8xf32>
    %148 = arith.select %146, %147, %144 : vector<8x8xi1>, vector<8x8xf32>
    %cst_51 = arith.constant dense<0xFF800000> : vector<8xf32>
    %149 = vector.multi_reduction <maximumf>, %148, %cst_51 [1] : vector<8x8xf32> to vector<8xf32>
    %150 = vector.shape_cast %149 : vector<8xf32> to vector<8x1xf32>
    %151 = vector.broadcast %150 : vector<8x1xf32> to vector<8x8xf32>
    %152 = arith.subf %148, %151 : vector<8x8xf32>
    %153 = math.exp %152 : vector<8x8xf32>
    %cst_52 = arith.constant dense<0.000000e+00> : vector<8xf32>
    %154 = vector.multi_reduction <add>, %153, %cst_52 [1] : vector<8x8xf32> to vector<8xf32>
    %155 = vector.shape_cast %154 : vector<8xf32> to vector<8x1xf32>
    %156 = tpu.reciprocal %155 {approx = true} : vector<8x1xf32> -> vector<8x1xf32>
    %157 = vector.broadcast %156 : vector<8x1xf32> to vector<8x8xf32>
    %158 = arith.mulf %153, %157 : vector<8x8xf32>
    %159 = vector.extract_strided_slice %82 {offsets = [0, 16], sizes = [8, 8], strides = [1, 1]} : vector<8x32xf32> to vector<8x8xf32>
    %160 = arith.truncf %158 : vector<8x8xf32> to vector<8x8xbf16>
    %161 = arith.truncf %159 : vector<8x8xf32> to vector<8x8xbf16>
    %cst_53 = arith.constant dense<0.000000e+00> : vector<8x8xf32>
    %162 = tpu.matmul %160, %161, %cst_53 {dimension_numbers = #tpu.dot_dimension_numbers<[1], [0], [0], [1], [0, 0, 1, 1], [], []>} : vector<8x8xbf16>, vector<8x8xbf16>, vector<8x8xf32> -> vector<8x8xf32>
    %163 = vector.extract_strided_slice %80 {offsets = [0, 24], sizes = [8, 8], strides = [1, 1]} : vector<8x32xf32> to vector<8x8xf32>
    %164 = vector.extract_strided_slice %81 {offsets = [0, 24], sizes = [8, 8], strides = [1, 1]} : vector<8x32xf32> to vector<8x8xf32>
    %165 = arith.truncf %163 : vector<8x8xf32> to vector<8x8xbf16>
    %166 = arith.truncf %164 : vector<8x8xf32> to vector<8x8xbf16>
    %cst_54 = arith.constant dense<0.000000e+00> : vector<8x8xf32>
    %167 = tpu.matmul %165, %166, %cst_54 {dimension_numbers = #tpu.dot_dimension_numbers<[1], [1], [0], [0], [0, 0, 1, 0], [], []>} : vector<8x8xbf16>, vector<8x8xbf16>, vector<8x8xf32> -> vector<8x8xf32>
    %cst_55 = arith.constant 0.353553385 : f32
    %168 = vector.broadcast %cst_55 : f32 to vector<8x8xf32>
    %169 = arith.mulf %167, %168 : vector<8x8xf32>
    %cst_56 = arith.constant -1.000000e+09 : f32
    %170 = vector.shape_cast %87 : vector<1x8xi1> to vector<1x8xi1>
    %171 = vector.broadcast %170 : vector<1x8xi1> to vector<8x8xi1>
    %172 = vector.broadcast %cst_56 : f32 to vector<8x8xf32>
    %173 = arith.select %171, %172, %169 : vector<8x8xi1>, vector<8x8xf32>
    %cst_57 = arith.constant dense<0xFF800000> : vector<8xf32>
    %174 = vector.multi_reduction <maximumf>, %173, %cst_57 [1] : vector<8x8xf32> to vector<8xf32>
    %175 = vector.shape_cast %174 : vector<8xf32> to vector<8x1xf32>
    %176 = vector.broadcast %175 : vector<8x1xf32> to vector<8x8xf32>
    %177 = arith.subf %173, %176 : vector<8x8xf32>
    %178 = math.exp %177 : vector<8x8xf32>
    %cst_58 = arith.constant dense<0.000000e+00> : vector<8xf32>
    %179 = vector.multi_reduction <add>, %178, %cst_58 [1] : vector<8x8xf32> to vector<8xf32>
    %180 = vector.shape_cast %179 : vector<8xf32> to vector<8x1xf32>
    %181 = tpu.reciprocal %180 {approx = true} : vector<8x1xf32> -> vector<8x1xf32>
    %182 = vector.broadcast %181 : vector<8x1xf32> to vector<8x8xf32>
    %183 = arith.mulf %178, %182 : vector<8x8xf32>
    %184 = vector.extract_strided_slice %82 {offsets = [0, 24], sizes = [8, 8], strides = [1, 1]} : vector<8x32xf32> to vector<8x8xf32>
    %185 = arith.truncf %183 : vector<8x8xf32> to vector<8x8xbf16>
    %186 = arith.truncf %184 : vector<8x8xf32> to vector<8x8xbf16>
    %cst_59 = arith.constant dense<0.000000e+00> : vector<8x8xf32>
    %187 = tpu.matmul %185, %186, %cst_59 {dimension_numbers = #tpu.dot_dimension_numbers<[1], [0], [0], [1], [0, 0, 1, 1], [], []>} : vector<8x8xbf16>, vector<8x8xbf16>, vector<8x8xf32> -> vector<8x8xf32>
    %188 = tpu.concatenate %112, %137, %162, %187 in 1 : vector<8x8xf32>, vector<8x8xf32>, vector<8x8xf32>, vector<8x8xf32> -> vector<8x32xf32>
    %c0_60 = arith.constant 0 : index
    %c0_61 = arith.constant 0 : index
    %189 = vector.load %arg13[%c0_60, %c0_61] : memref<32x32xf32, #tpu.memory_space<vmem>>, vector<32x32xf32>
    %190 = arith.truncf %188 : vector<8x32xf32> to vector<8x32xbf16>
    %191 = arith.truncf %189 : vector<32x32xf32> to vector<32x32xbf16>
    %cst_62 = arith.constant dense<0.000000e+00> : vector<8x32xf32>
    %192 = tpu.matmul %190, %191, %cst_62 {dimension_numbers = #tpu.dot_dimension_numbers<[1], [0], [0], [1], [0, 0, 1, 1], [], []>} : vector<8x32xbf16>, vector<32x32xbf16>, vector<8x32xf32> -> vector<8x32xf32>
    %193 = arith.addf %48, %192 : vector<8x32xf32>
    %c0_63 = arith.constant 0 : index
    %c0_64 = arith.constant 0 : index
    %194 = vector.load %arg14[%c0_63, %c0_64] : memref<1x32xf32, #tpu.memory_space<vmem>>, vector<1x32xf32>
    %195 = vector.broadcast %194 : vector<1x32xf32> to vector<8x32xf32>
    %196 = arith.addf %193, %195 : vector<8x32xf32>
    %c0_65 = arith.constant 0 : index
    %c0_66 = arith.constant 0 : index
    %197 = vector.load %arg15[%c0_65, %c0_66] : memref<1x32xf32, #tpu.memory_space<vmem>>, vector<1x32xf32>
    %c0_67 = arith.constant 0 : index
    %c0_68 = arith.constant 0 : index
    %198 = vector.load %arg16[%c0_67, %c0_68] : memref<1x32xf32, #tpu.memory_space<vmem>>, vector<1x32xf32>
    %cst_69 = arith.constant dense<0.000000e+00> : vector<8xf32>
    %199 = vector.multi_reduction <add>, %196, %cst_69 [1] : vector<8x32xf32> to vector<8xf32>
    %200 = vector.shape_cast %199 : vector<8xf32> to vector<8x1xf32>
    %cst_70 = arith.constant 3.200000e+01 : f32
    %201 = vector.broadcast %cst_70 : f32 to vector<8x1xf32>
    %202 = arith.divf %200, %201 : vector<8x1xf32>
    %203 = vector.broadcast %202 : vector<8x1xf32> to vector<8x32xf32>
    %204 = arith.subf %196, %203 : vector<8x32xf32>
    %205 = arith.mulf %204, %204 : vector<8x32xf32>
    %cst_71 = arith.constant dense<0.000000e+00> : vector<8xf32>
    %206 = vector.multi_reduction <add>, %205, %cst_71 [1] : vector<8x32xf32> to vector<8xf32>
    %207 = vector.shape_cast %206 : vector<8xf32> to vector<8x1xf32>
    %cst_72 = arith.constant 3.200000e+01 : f32
    %208 = vector.broadcast %cst_72 : f32 to vector<8x1xf32>
    %209 = arith.divf %207, %208 : vector<8x1xf32>
    %210 = vector.broadcast %202 : vector<8x1xf32> to vector<8x32xf32>
    %211 = arith.subf %196, %210 : vector<8x32xf32>
    %cst_73 = arith.constant 9.99999974E-6 : f32
    %212 = vector.broadcast %cst_73 : f32 to vector<8x1xf32>
    %213 = arith.addf %209, %212 : vector<8x1xf32>
    %214 = math.rsqrt %213 : vector<8x1xf32>
    %215 = vector.broadcast %214 : vector<8x1xf32> to vector<8x32xf32>
    %216 = arith.mulf %211, %215 : vector<8x32xf32>
    %217 = vector.broadcast %197 : vector<1x32xf32> to vector<8x32xf32>
    %218 = arith.mulf %216, %217 : vector<8x32xf32>
    %219 = vector.broadcast %198 : vector<1x32xf32> to vector<8x32xf32>
    %220 = arith.addf %218, %219 : vector<8x32xf32>
    %c0_74 = arith.constant 0 : index
    %c0_75 = arith.constant 0 : index
    %221 = vector.load %arg17[%c0_74, %c0_75] : memref<32x64xf32, #tpu.memory_space<vmem>>, vector<32x64xf32>
    %222 = arith.truncf %220 : vector<8x32xf32> to vector<8x32xbf16>
    %223 = arith.truncf %221 : vector<32x64xf32> to vector<32x64xbf16>
    %cst_76 = arith.constant dense<0.000000e+00> : vector<8x64xf32>
    %224 = tpu.matmul %222, %223, %cst_76 {dimension_numbers = #tpu.dot_dimension_numbers<[1], [0], [0], [1], [0, 0, 1, 1], [], []>} : vector<8x32xbf16>, vector<32x64xbf16>, vector<8x64xf32> -> vector<8x64xf32>
    %c0_77 = arith.constant 0 : index
    %c0_78 = arith.constant 0 : index
    %225 = vector.load %arg18[%c0_77, %c0_78] : memref<1x64xf32, #tpu.memory_space<vmem>>, vector<1x64xf32>
    %226 = vector.broadcast %225 : vector<1x64xf32> to vector<8x64xf32>
    %227 = arith.addf %224, %226 : vector<8x64xf32>
    %228 = vector.extract_strided_slice %227 {offsets = [0, 0], sizes = [8, 32], strides = [1, 1]} : vector<8x64xf32> to vector<8x32xf32>
    %229 = vector.extract_strided_slice %227 {offsets = [0, 32], sizes = [8, 32], strides = [1, 1]} : vector<8x64xf32> to vector<8x32xf32>
    %230 = arith.negf %229 : vector<8x32xf32>
    %231 = math.exp %230 : vector<8x32xf32>
    %cst_79 = arith.constant 1.000000e+00 : f32
    %232 = vector.broadcast %cst_79 : f32 to vector<8x32xf32>
    %233 = arith.addf %232, %231 : vector<8x32xf32>
    %234 = arith.divf %232, %233 : vector<8x32xf32>
    %235 = arith.mulf %228, %234 : vector<8x32xf32>
    %cst_80 = arith.constant 0.000000e+00 : f32
    %236 = vector.broadcast %cst_80 : f32 to vector<24x32xf32>
    %c0_81 = arith.constant 0 : index
    %c0_82 = arith.constant 0 : index
    %237 = vector.load %arg34[%c0_81, %c0_82] : memref<24x32xf32, #tpu.memory_space<vmem>>, vector<24x32xf32>
    tpu.vector_store %arg34[%c0_81, %c0_82], %236 {strides = array<i32>} : memref<24x32xf32, #tpu.memory_space<vmem>>, vector<24x32xf32>,
    %c8 = arith.constant 8 : index
    %c0_83 = arith.constant 0 : index
    %238 = vector.load %arg34[%c8, %c0_83] : memref<24x32xf32, #tpu.memory_space<vmem>>, vector<8x32xf32>
    tpu.vector_store %arg34[%c8, %c0_83], %235 {strides = array<i32>} : memref<24x32xf32, #tpu.memory_space<vmem>>, vector<8x32xf32>,
    %c0_84 = arith.constant 0 : index
    %c0_85 = arith.constant 0 : index
    %239 = vector.load %arg19[%c0_84, %c0_85] : memref<7x32xf32, #tpu.memory_space<vmem>>, vector<7x32xf32>
    %cst_86 = arith.constant 0.000000e+00 : f32
    %240 = vector.broadcast %cst_86 : f32 to vector<8x32xf32>
    %c5 = arith.constant 5 : index
    %c0_87 = arith.constant 0 : index
    %241 = vector.load %arg34[%c5, %c0_87] : memref<24x32xf32, #tpu.memory_space<vmem>>, vector<8x32xf32>
    %242 = vector.extract_strided_slice %239 {offsets = [0, 0], sizes = [1, 32], strides = [1, 1]} : vector<7x32xf32> to vector<1x32xf32>
    %243 = vector.shape_cast %242 : vector<1x32xf32> to vector<32xf32>
    %244 = vector.shape_cast %243 : vector<32xf32> to vector<1x32xf32>
    %245 = vector.broadcast %244 : vector<1x32xf32> to vector<8x32xf32>
    %246 = arith.mulf %241, %245 : vector<8x32xf32>
    %247 = arith.addf %240, %246 : vector<8x32xf32>
    %c6 = arith.constant 6 : index
    %c0_88 = arith.constant 0 : index
    %248 = vector.load %arg34[%c6, %c0_88] : memref<24x32xf32, #tpu.memory_space<vmem>>, vector<8x32xf32>
    %249 = vector.extract_strided_slice %239 {offsets = [1, 0], sizes = [1, 32], strides = [1, 1]} : vector<7x32xf32> to vector<1x32xf32>
    %250 = vector.shape_cast %249 : vector<1x32xf32> to vector<32xf32>
    %251 = vector.shape_cast %250 : vector<32xf32> to vector<1x32xf32>
    %252 = vector.broadcast %251 : vector<1x32xf32> to vector<8x32xf32>
    %253 = arith.mulf %248, %252 : vector<8x32xf32>
    %254 = arith.addf %247, %253 : vector<8x32xf32>
    %c7 = arith.constant 7 : index
    %c0_89 = arith.constant 0 : index
    %255 = vector.load %arg34[%c7, %c0_89] : memref<24x32xf32, #tpu.memory_space<vmem>>, vector<8x32xf32>
    %256 = vector.extract_strided_slice %239 {offsets = [2, 0], sizes = [1, 32], strides = [1, 1]} : vector<7x32xf32> to vector<1x32xf32>
    %257 = vector.shape_cast %256 : vector<1x32xf32> to vector<32xf32>
    %258 = vector.shape_cast %257 : vector<32xf32> to vector<1x32xf32>
    %259 = vector.broadcast %258 : vector<1x32xf32> to vector<8x32xf32>
    %260 = arith.mulf %255, %259 : vector<8x32xf32>
    %261 = arith.addf %254, %260 : vector<8x32xf32>
    %c8_90 = arith.constant 8 : index
    %c0_91 = arith.constant 0 : index
    %262 = vector.load %arg34[%c8_90, %c0_91] : memref<24x32xf32, #tpu.memory_space<vmem>>, vector<8x32xf32>
    %263 = vector.extract_strided_slice %239 {offsets = [3, 0], sizes = [1, 32], strides = [1, 1]} : vector<7x32xf32> to vector<1x32xf32>
    %264 = vector.shape_cast %263 : vector<1x32xf32> to vector<32xf32>
    %265 = vector.shape_cast %264 : vector<32xf32> to vector<1x32xf32>
    %266 = vector.broadcast %265 : vector<1x32xf32> to vector<8x32xf32>
    %267 = arith.mulf %262, %266 : vector<8x32xf32>
    %268 = arith.addf %261, %267 : vector<8x32xf32>
    %c9 = arith.constant 9 : index
    %c0_92 = arith.constant 0 : index
    %269 = vector.load %arg34[%c9, %c0_92] : memref<24x32xf32, #tpu.memory_space<vmem>>, vector<8x32xf32>
    %270 = vector.extract_strided_slice %239 {offsets = [4, 0], sizes = [1, 32], strides = [1, 1]} : vector<7x32xf32> to vector<1x32xf32>
    %271 = vector.shape_cast %270 : vector<1x32xf32> to vector<32xf32>
    %272 = vector.shape_cast %271 : vector<32xf32> to vector<1x32xf32>
    %273 = vector.broadcast %272 : vector<1x32xf32> to vector<8x32xf32>
    %274 = arith.mulf %269, %273 : vector<8x32xf32>
    %275 = arith.addf %268, %274 : vector<8x32xf32>
    %c10 = arith.constant 10 : index
    %c0_93 = arith.constant 0 : index
    %276 = vector.load %arg34[%c10, %c0_93] : memref<24x32xf32, #tpu.memory_space<vmem>>, vector<8x32xf32>
    %277 = vector.extract_strided_slice %239 {offsets = [5, 0], sizes = [1, 32], strides = [1, 1]} : vector<7x32xf32> to vector<1x32xf32>
    %278 = vector.shape_cast %277 : vector<1x32xf32> to vector<32xf32>
    %279 = vector.shape_cast %278 : vector<32xf32> to vector<1x32xf32>
    %280 = vector.broadcast %279 : vector<1x32xf32> to vector<8x32xf32>
    %281 = arith.mulf %276, %280 : vector<8x32xf32>
    %282 = arith.addf %275, %281 : vector<8x32xf32>
    %c11 = arith.constant 11 : index
    %c0_94 = arith.constant 0 : index
    %283 = vector.load %arg34[%c11, %c0_94] : memref<24x32xf32, #tpu.memory_space<vmem>>, vector<8x32xf32>
    %284 = vector.extract_strided_slice %239 {offsets = [6, 0], sizes = [1, 32], strides = [1, 1]} : vector<7x32xf32> to vector<1x32xf32>
    %285 = vector.shape_cast %284 : vector<1x32xf32> to vector<32xf32>
    %286 = vector.shape_cast %285 : vector<32xf32> to vector<1x32xf32>
    %287 = vector.broadcast %286 : vector<1x32xf32> to vector<8x32xf32>
    %288 = arith.mulf %283, %287 : vector<8x32xf32>
    %289 = arith.addf %282, %288 : vector<8x32xf32>
    %c0_95 = arith.constant 0 : index
    %c0_96 = arith.constant 0 : index
    %290 = vector.load %arg20[%c0_95, %c0_96] : memref<1x32xf32, #tpu.memory_space<vmem>>, vector<1x32xf32>
    %291 = vector.broadcast %290 : vector<1x32xf32> to vector<8x32xf32>
    %292 = arith.addf %289, %291 : vector<8x32xf32>
    %c0_97 = arith.constant 0 : index
    %c0_98 = arith.constant 0 : index
    %293 = vector.load %arg21[%c0_97, %c0_98] : memref<1x32xf32, #tpu.memory_space<vmem>>, vector<1x32xf32>
    %294 = vector.broadcast %293 : vector<1x32xf32> to vector<8x32xf32>
    %295 = arith.mulf %292, %294 : vector<8x32xf32>
    %c0_99 = arith.constant 0 : index
    %c0_100 = arith.constant 0 : index
    %296 = vector.load %arg22[%c0_99, %c0_100] : memref<1x32xf32, #tpu.memory_space<vmem>>, vector<1x32xf32>
    %297 = vector.broadcast %296 : vector<1x32xf32> to vector<8x32xf32>
    %298 = arith.addf %295, %297 : vector<8x32xf32>
    %299 = arith.negf %298 : vector<8x32xf32>
    %300 = math.exp %299 : vector<8x32xf32>
    %cst_101 = arith.constant 1.000000e+00 : f32
    %301 = vector.broadcast %cst_101 : f32 to vector<8x32xf32>
    %302 = arith.addf %301, %300 : vector<8x32xf32>
    %303 = arith.divf %301, %302 : vector<8x32xf32>
    %304 = arith.mulf %298, %303 : vector<8x32xf32>
    %c0_102 = arith.constant 0 : index
    %c0_103 = arith.constant 0 : index
    %305 = vector.load %arg23[%c0_102, %c0_103] : memref<32x32xf32, #tpu.memory_space<vmem>>, vector<32x32xf32>
    %306 = arith.truncf %304 : vector<8x32xf32> to vector<8x32xbf16>
    %307 = arith.truncf %305 : vector<32x32xf32> to vector<32x32xbf16>
    %cst_104 = arith.constant dense<0.000000e+00> : vector<8x32xf32>
    %308 = tpu.matmul %306, %307, %cst_104 {dimension_numbers = #tpu.dot_dimension_numbers<[1], [0], [0], [1], [0, 0, 1, 1], [], []>} : vector<8x32xbf16>, vector<32x32xbf16>, vector<8x32xf32> -> vector<8x32xf32>
    %309 = arith.addf %196, %308 : vector<8x32xf32>
    %c0_105 = arith.constant 0 : index
    %c0_106 = arith.constant 0 : index
    %310 = vector.load %arg24[%c0_105, %c0_106] : memref<1x32xf32, #tpu.memory_space<vmem>>, vector<1x32xf32>
    %311 = vector.broadcast %310 : vector<1x32xf32> to vector<8x32xf32>
    %312 = arith.addf %309, %311 : vector<8x32xf32>
    %c0_107 = arith.constant 0 : index
    %c0_108 = arith.constant 0 : index
    %313 = vector.load %arg25[%c0_107, %c0_108] : memref<1x32xf32, #tpu.memory_space<vmem>>, vector<1x32xf32>
    %c0_109 = arith.constant 0 : index
    %c0_110 = arith.constant 0 : index
    %314 = vector.load %arg26[%c0_109, %c0_110] : memref<1x32xf32, #tpu.memory_space<vmem>>, vector<1x32xf32>
    %c0_111 = arith.constant 0 : index
    %c0_112 = arith.constant 0 : index
    %315 = vector.load %arg27[%c0_111, %c0_112] : memref<32x64xf32, #tpu.memory_space<vmem>>, vector<32x64xf32>
    %c0_113 = arith.constant 0 : index
    %c0_114 = arith.constant 0 : index
    %316 = vector.load %arg28[%c0_113, %c0_114] : memref<1x64xf32, #tpu.memory_space<vmem>>, vector<1x64xf32>
    %c0_115 = arith.constant 0 : index
    %c0_116 = arith.constant 0 : index
    %317 = vector.load %arg29[%c0_115, %c0_116] : memref<64x32xf32, #tpu.memory_space<vmem>>, vector<64x32xf32>
    %c0_117 = arith.constant 0 : index
    %c0_118 = arith.constant 0 : index
    %318 = vector.load %arg30[%c0_117, %c0_118] : memref<1x32xf32, #tpu.memory_space<vmem>>, vector<1x32xf32>
    %cst_119 = arith.constant dense<0.000000e+00> : vector<8xf32>
    %319 = vector.multi_reduction <add>, %312, %cst_119 [1] : vector<8x32xf32> to vector<8xf32>
    %320 = vector.shape_cast %319 : vector<8xf32> to vector<8x1xf32>
    %cst_120 = arith.constant 3.200000e+01 : f32
    %321 = vector.broadcast %cst_120 : f32 to vector<8x1xf32>
    %322 = arith.divf %320, %321 : vector<8x1xf32>
    %323 = vector.broadcast %322 : vector<8x1xf32> to vector<8x32xf32>
    %324 = arith.subf %312, %323 : vector<8x32xf32>
    %325 = arith.mulf %324, %324 : vector<8x32xf32>
    %cst_121 = arith.constant dense<0.000000e+00> : vector<8xf32>
    %326 = vector.multi_reduction <add>, %325, %cst_121 [1] : vector<8x32xf32> to vector<8xf32>
    %327 = vector.shape_cast %326 : vector<8xf32> to vector<8x1xf32>
    %cst_122 = arith.constant 3.200000e+01 : f32
    %328 = vector.broadcast %cst_122 : f32 to vector<8x1xf32>
    %329 = arith.divf %327, %328 : vector<8x1xf32>
    %330 = vector.broadcast %322 : vector<8x1xf32> to vector<8x32xf32>
    %331 = arith.subf %312, %330 : vector<8x32xf32>
    %cst_123 = arith.constant 9.99999974E-6 : f32
    %332 = vector.broadcast %cst_123 : f32 to vector<8x1xf32>
    %333 = arith.addf %329, %332 : vector<8x1xf32>
    %334 = math.rsqrt %333 : vector<8x1xf32>
    %335 = vector.broadcast %334 : vector<8x1xf32> to vector<8x32xf32>
    %336 = arith.mulf %331, %335 : vector<8x32xf32>
    %337 = vector.broadcast %313 : vector<1x32xf32> to vector<8x32xf32>
    %338 = arith.mulf %336, %337 : vector<8x32xf32>
    %339 = vector.broadcast %314 : vector<1x32xf32> to vector<8x32xf32>
    %340 = arith.addf %338, %339 : vector<8x32xf32>
    %341 = arith.truncf %340 : vector<8x32xf32> to vector<8x32xbf16>
    %342 = arith.truncf %315 : vector<32x64xf32> to vector<32x64xbf16>
    %cst_124 = arith.constant dense<0.000000e+00> : vector<8x64xf32>
    %343 = tpu.matmul %341, %342, %cst_124 {dimension_numbers = #tpu.dot_dimension_numbers<[1], [0], [0], [1], [0, 0, 1, 1], [], []>} : vector<8x32xbf16>, vector<32x64xbf16>, vector<8x64xf32> -> vector<8x64xf32>
    %344 = vector.broadcast %316 : vector<1x64xf32> to vector<8x64xf32>
    %345 = arith.addf %343, %344 : vector<8x64xf32>
    %346 = arith.negf %345 : vector<8x64xf32>
    %347 = math.exp %346 : vector<8x64xf32>
    %cst_125 = arith.constant 1.000000e+00 : f32
    %348 = vector.broadcast %cst_125 : f32 to vector<8x64xf32>
    %349 = arith.addf %348, %347 : vector<8x64xf32>
    %350 = arith.divf %348, %349 : vector<8x64xf32>
    %351 = arith.mulf %345, %350 : vector<8x64xf32>
    %352 = arith.truncf %351 : vector<8x64xf32> to vector<8x64xbf16>
    %353 = arith.truncf %317 : vector<64x32xf32> to vector<64x32xbf16>
    %cst_126 = arith.constant dense<0.000000e+00> : vector<8x32xf32>
    %354 = tpu.matmul %352, %353, %cst_126 {dimension_numbers = #tpu.dot_dimension_numbers<[1], [0], [0], [1], [0, 0, 1, 1], [], []>} : vector<8x64xbf16>, vector<64x32xbf16>, vector<8x32xf32> -> vector<8x32xf32>
    %355 = vector.broadcast %318 : vector<1x32xf32> to vector<8x32xf32>
    %356 = arith.addf %354, %355 : vector<8x32xf32>
    %cst_127 = arith.constant 5.000000e-01 : f32
    %357 = vector.broadcast %cst_127 : f32 to vector<8x32xf32>
    %358 = arith.mulf %357, %356 : vector<8x32xf32>
    %359 = arith.addf %312, %358 : vector<8x32xf32>
    %c0_128 = arith.constant 0 : index
    %c0_129 = arith.constant 0 : index
    %360 = vector.load %arg31[%c0_128, %c0_129] : memref<1x32xf32, #tpu.memory_space<vmem>>, vector<1x32xf32>
    %c0_130 = arith.constant 0 : index
    %c0_131 = arith.constant 0 : index
    %361 = vector.load %arg32[%c0_130, %c0_131] : memref<1x32xf32, #tpu.memory_space<vmem>>, vector<1x32xf32>
    %cst_132 = arith.constant dense<0.000000e+00> : vector<8xf32>
    %362 = vector.multi_reduction <add>, %359, %cst_132 [1] : vector<8x32xf32> to vector<8xf32>
    %363 = vector.shape_cast %362 : vector<8xf32> to vector<8x1xf32>
    %cst_133 = arith.constant 3.200000e+01 : f32
    %364 = vector.broadcast %cst_133 : f32 to vector<8x1xf32>
    %365 = arith.divf %363, %364 : vector<8x1xf32>
    %366 = vector.broadcast %365 : vector<8x1xf32> to vector<8x32xf32>
    %367 = arith.subf %359, %366 : vector<8x32xf32>
    %368 = arith.mulf %367, %367 : vector<8x32xf32>
    %cst_134 = arith.constant dense<0.000000e+00> : vector<8xf32>
    %369 = vector.multi_reduction <add>, %368, %cst_134 [1] : vector<8x32xf32> to vector<8xf32>
    %370 = vector.shape_cast %369 : vector<8xf32> to vector<8x1xf32>
    %cst_135 = arith.constant 3.200000e+01 : f32
    %371 = vector.broadcast %cst_135 : f32 to vector<8x1xf32>
    %372 = arith.divf %370, %371 : vector<8x1xf32>
    %373 = vector.broadcast %365 : vector<8x1xf32> to vector<8x32xf32>
    %374 = arith.subf %359, %373 : vector<8x32xf32>
    %cst_136 = arith.constant 9.99999974E-6 : f32
    %375 = vector.broadcast %cst_136 : f32 to vector<8x1xf32>
    %376 = arith.addf %372, %375 : vector<8x1xf32>
    %377 = math.rsqrt %376 : vector<8x1xf32>
    %378 = vector.broadcast %377 : vector<8x1xf32> to vector<8x32xf32>
    %379 = arith.mulf %374, %378 : vector<8x32xf32>
    %380 = vector.broadcast %360 : vector<1x32xf32> to vector<8x32xf32>
    %381 = arith.mulf %379, %380 : vector<8x32xf32>
    %382 = vector.broadcast %361 : vector<1x32xf32> to vector<8x32xf32>
    %383 = arith.addf %381, %382 : vector<8x32xf32>
    %c0_137 = arith.constant 0 : index
    %c0_138 = arith.constant 0 : index
    %c0_139 = arith.constant 0 : index
    %384 = vector.load %arg33[%c0_137, %c0_138, %c0_139] : memref<1x8x32xf32, #tpu.memory_space<vmem>>, vector<1x8x32xf32>
    %385 = vector.shape_cast %384 : vector<1x8x32xf32> to vector<8x32xf32>
    %386 = vector.shape_cast %383 : vector<8x32xf32> to vector<1x8x32xf32>
    tpu.vector_store %arg33[%c0_137, %c0_138, %c0_139], %386 {strides = array<i32>} : memref<1x8x32xf32, #tpu.memory_space<vmem>>, vector<1x8x32xf32>,
    return
  }
  func.func @transform_0(%arg0: i32, %arg1: memref<2xi32, #tpu.memory_space<smem>>) -> (i32, i32, i32) {
    %c0_i32 = arith.constant 0 : i32
    %c0_i32_0 = arith.constant 0 : i32
    %c0_i32_1 = arith.constant 0 : i32
    return %arg0, %c0_i32, %c0_i32_0 : i32, i32, i32
  }
  func.func @transform_1(%arg0: i32, %arg1: memref<2xi32, #tpu.memory_space<smem>>) -> (i32, i32) {
    %c0_i32 = arith.constant 0 : i32
    %c0_i32_0 = arith.constant 0 : i32
    %c0_i32_1 = arith.constant 0 : i32
    return %c0_i32, %c0_i32_0 : i32, i32
  }
  func.func @transform_2(%arg0: i32, %arg1: memref<2xi32, #tpu.memory_space<smem>>) -> (i32, i32) {
    %c0_i32 = arith.constant 0 : i32
    %c0_i32_0 = arith.constant 0 : i32
    %c0_i32_1 = arith.constant 0 : i32
    return %c0_i32, %c0_i32_0 : i32, i32
  }
  func.func @transform_3(%arg0: i32, %arg1: memref<2xi32, #tpu.memory_space<smem>>) -> (i32, i32) {
    %c0_i32 = arith.constant 0 : i32
    %c0_i32_0 = arith.constant 0 : i32
    %c0_i32_1 = arith.constant 0 : i32
    return %c0_i32, %c0_i32_0 : i32, i32
  }
  func.func @transform_4(%arg0: i32, %arg1: memref<2xi32, #tpu.memory_space<smem>>) -> (i32, i32) {
    %c0_i32 = arith.constant 0 : i32
    %c0_i32_0 = arith.constant 0 : i32
    %c0_i32_1 = arith.constant 0 : i32
    return %c0_i32, %c0_i32_0 : i32, i32
  }
  func.func @transform_5(%arg0: i32, %arg1: memref<2xi32, #tpu.memory_space<smem>>) -> (i32, i32) {
    %c0_i32 = arith.constant 0 : i32
    %c0_i32_0 = arith.constant 0 : i32
    %c0_i32_1 = arith.constant 0 : i32
    return %c0_i32, %c0_i32_0 : i32, i32
  }
  func.func @transform_6(%arg0: i32, %arg1: memref<2xi32, #tpu.memory_space<smem>>) -> (i32, i32) {
    %c0_i32 = arith.constant 0 : i32
    %c0_i32_0 = arith.constant 0 : i32
    %c0_i32_1 = arith.constant 0 : i32
    return %c0_i32, %c0_i32_0 : i32, i32
  }
  func.func @transform_7(%arg0: i32, %arg1: memref<2xi32, #tpu.memory_space<smem>>) -> (i32, i32) {
    %c0_i32 = arith.constant 0 : i32
    %c0_i32_0 = arith.constant 0 : i32
    %c0_i32_1 = arith.constant 0 : i32
    return %c0_i32, %c0_i32_0 : i32, i32
  }
  func.func @transform_8(%arg0: i32, %arg1: memref<2xi32, #tpu.memory_space<smem>>) -> (i32, i32) {
    %c0_i32 = arith.constant 0 : i32
    %c0_i32_0 = arith.constant 0 : i32
    %c0_i32_1 = arith.constant 0 : i32
    return %c0_i32, %c0_i32_0 : i32, i32
  }
  func.func @transform_9(%arg0: i32, %arg1: memref<2xi32, #tpu.memory_space<smem>>) -> (i32, i32) {
    %c0_i32 = arith.constant 0 : i32
    %c0_i32_0 = arith.constant 0 : i32
    %c0_i32_1 = arith.constant 0 : i32
    return %c0_i32, %c0_i32_0 : i32, i32
  }
  func.func @transform_10(%arg0: i32, %arg1: memref<2xi32, #tpu.memory_space<smem>>) -> (i32, i32) {
    %c0_i32 = arith.constant 0 : i32
    %c0_i32_0 = arith.constant 0 : i32
    %c0_i32_1 = arith.constant 0 : i32
    return %c0_i32, %c0_i32_0 : i32, i32
  }
  func.func @transform_11(%arg0: i32, %arg1: memref<2xi32, #tpu.memory_space<smem>>) -> (i32, i32) {
    %c0_i32 = arith.constant 0 : i32
    %c0_i32_0 = arith.constant 0 : i32
    %c0_i32_1 = arith.constant 0 : i32
    return %c0_i32, %c0_i32_0 : i32, i32
  }
  func.func @transform_12(%arg0: i32, %arg1: memref<2xi32, #tpu.memory_space<smem>>) -> (i32, i32) {
    %c0_i32 = arith.constant 0 : i32
    %c0_i32_0 = arith.constant 0 : i32
    %c0_i32_1 = arith.constant 0 : i32
    return %c0_i32, %c0_i32_0 : i32, i32
  }
  func.func @transform_13(%arg0: i32, %arg1: memref<2xi32, #tpu.memory_space<smem>>) -> (i32, i32) {
    %c0_i32 = arith.constant 0 : i32
    %c0_i32_0 = arith.constant 0 : i32
    %c0_i32_1 = arith.constant 0 : i32
    return %c0_i32, %c0_i32_0 : i32, i32
  }
  func.func @transform_14(%arg0: i32, %arg1: memref<2xi32, #tpu.memory_space<smem>>) -> (i32, i32) {
    %c0_i32 = arith.constant 0 : i32
    %c0_i32_0 = arith.constant 0 : i32
    %c0_i32_1 = arith.constant 0 : i32
    return %c0_i32, %c0_i32_0 : i32, i32
  }
  func.func @transform_15(%arg0: i32, %arg1: memref<2xi32, #tpu.memory_space<smem>>) -> (i32, i32) {
    %c0_i32 = arith.constant 0 : i32
    %c0_i32_0 = arith.constant 0 : i32
    %c0_i32_1 = arith.constant 0 : i32
    return %c0_i32, %c0_i32_0 : i32, i32
  }
  func.func @transform_16(%arg0: i32, %arg1: memref<2xi32, #tpu.memory_space<smem>>) -> (i32, i32) {
    %c0_i32 = arith.constant 0 : i32
    %c0_i32_0 = arith.constant 0 : i32
    %c0_i32_1 = arith.constant 0 : i32
    return %c0_i32, %c0_i32_0 : i32, i32
  }
  func.func @transform_17(%arg0: i32, %arg1: memref<2xi32, #tpu.memory_space<smem>>) -> (i32, i32) {
    %c0_i32 = arith.constant 0 : i32
    %c0_i32_0 = arith.constant 0 : i32
    %c0_i32_1 = arith.constant 0 : i32
    return %c0_i32, %c0_i32_0 : i32, i32
  }
  func.func @transform_18(%arg0: i32, %arg1: memref<2xi32, #tpu.memory_space<smem>>) -> (i32, i32) {
    %c0_i32 = arith.constant 0 : i32
    %c0_i32_0 = arith.constant 0 : i32
    %c0_i32_1 = arith.constant 0 : i32
    return %c0_i32, %c0_i32_0 : i32, i32
  }
  func.func @transform_19(%arg0: i32, %arg1: memref<2xi32, #tpu.memory_space<smem>>) -> (i32, i32) {
    %c0_i32 = arith.constant 0 : i32
    %c0_i32_0 = arith.constant 0 : i32
    %c0_i32_1 = arith.constant 0 : i32
    return %c0_i32, %c0_i32_0 : i32, i32
  }
  func.func @transform_20(%arg0: i32, %arg1: memref<2xi32, #tpu.memory_space<smem>>) -> (i32, i32) {
    %c0_i32 = arith.constant 0 : i32
    %c0_i32_0 = arith.constant 0 : i32
    %c0_i32_1 = arith.constant 0 : i32
    return %c0_i32, %c0_i32_0 : i32, i32
  }
  func.func @transform_21(%arg0: i32, %arg1: memref<2xi32, #tpu.memory_space<smem>>) -> (i32, i32) {
    %c0_i32 = arith.constant 0 : i32
    %c0_i32_0 = arith.constant 0 : i32
    %c0_i32_1 = arith.constant 0 : i32
    return %c0_i32, %c0_i32_0 : i32, i32
  }
  func.func @transform_22(%arg0: i32, %arg1: memref<2xi32, #tpu.memory_space<smem>>) -> (i32, i32) {
    %c0_i32 = arith.constant 0 : i32
    %c0_i32_0 = arith.constant 0 : i32
    %c0_i32_1 = arith.constant 0 : i32
    return %c0_i32, %c0_i32_0 : i32, i32
  }
  func.func @transform_23(%arg0: i32, %arg1: memref<2xi32, #tpu.memory_space<smem>>) -> (i32, i32) {
    %c0_i32 = arith.constant 0 : i32
    %c0_i32_0 = arith.constant 0 : i32
    %c0_i32_1 = arith.constant 0 : i32
    return %c0_i32, %c0_i32_0 : i32, i32
  }
  func.func @transform_24(%arg0: i32, %arg1: memref<2xi32, #tpu.memory_space<smem>>) -> (i32, i32) {
    %c0_i32 = arith.constant 0 : i32
    %c0_i32_0 = arith.constant 0 : i32
    %c0_i32_1 = arith.constant 0 : i32
    return %c0_i32, %c0_i32_0 : i32, i32
  }
  func.func @transform_25(%arg0: i32, %arg1: memref<2xi32, #tpu.memory_space<smem>>) -> (i32, i32) {
    %c0_i32 = arith.constant 0 : i32
    %c0_i32_0 = arith.constant 0 : i32
    %c0_i32_1 = arith.constant 0 : i32
    return %c0_i32, %c0_i32_0 : i32, i32
  }
  func.func @transform_26(%arg0: i32, %arg1: memref<2xi32, #tpu.memory_space<smem>>) -> (i32, i32) {
    %c0_i32 = arith.constant 0 : i32
    %c0_i32_0 = arith.constant 0 : i32
    %c0_i32_1 = arith.constant 0 : i32
    return %c0_i32, %c0_i32_0 : i32, i32
  }
  func.func @transform_27(%arg0: i32, %arg1: memref<2xi32, #tpu.memory_space<smem>>) -> (i32, i32) {
    %c0_i32 = arith.constant 0 : i32
    %c0_i32_0 = arith.constant 0 : i32
    %c0_i32_1 = arith.constant 0 : i32
    return %c0_i32, %c0_i32_0 : i32, i32
  }
  func.func @transform_28(%arg0: i32, %arg1: memref<2xi32, #tpu.memory_space<smem>>) -> (i32, i32) {
    %c0_i32 = arith.constant 0 : i32
    %c0_i32_0 = arith.constant 0 : i32
    %c0_i32_1 = arith.constant 0 : i32
    return %c0_i32, %c0_i32_0 : i32, i32
  }
  func.func @transform_29(%arg0: i32, %arg1: memref<2xi32, #tpu.memory_space<smem>>) -> (i32, i32) {
    %c0_i32 = arith.constant 0 : i32
    %c0_i32_0 = arith.constant 0 : i32
    %c0_i32_1 = arith.constant 0 : i32
    return %c0_i32, %c0_i32_0 : i32, i32
  }
  func.func @transform_30(%arg0: i32, %arg1: memref<2xi32, #tpu.memory_space<smem>>) -> (i32, i32) {
    %c0_i32 = arith.constant 0 : i32
    %c0_i32_0 = arith.constant 0 : i32
    %c0_i32_1 = arith.constant 0 : i32
    return %c0_i32, %c0_i32_0 : i32, i32
  }
  func.func @transform_31(%arg0: i32, %arg1: memref<2xi32, #tpu.memory_space<smem>>) -> (i32, i32, i32) {
    %c0_i32 = arith.constant 0 : i32
    %c0_i32_0 = arith.constant 0 : i32
    %c0_i32_1 = arith.constant 0 : i32
    return %arg0, %c0_i32, %c0_i32_0 : i32, i32, i32
  }
}

module attributes {stable_mosaic.version = 11 : i64} {
  func.func @_conformer_layer_kernel(%arg0: i32, %arg1: memref<2xi32, #tpu.memory_space<smem>>, %arg2: memref<1x8x32xf32, #tpu.memory_space<vmem>>, %arg3: memref<1x32xf32, #tpu.memory_space<vmem>>, %arg4: memref<1x32xf32, #tpu.memory_space<vmem>>, %arg5: memref<32x64xf32, #tpu.memory_space<vmem>>, %arg6: memref<1x64xf32, #tpu.memory_space<vmem>>, %arg7: memref<64x32xf32, #tpu.memory_space<vmem>>, %arg8: memref<1x32xf32, #tpu.memory_space<vmem>>, %arg9: memref<1x32xf32, #tpu.memory_space<vmem>>, %arg10: memref<1x32xf32, #tpu.memory_space<vmem>>, %arg11: memref<32x96xf32, #tpu.memory_space<vmem>>, %arg12: memref<1x96xf32, #tpu.memory_space<vmem>>, %arg13: memref<32x32xf32, #tpu.memory_space<vmem>>, %arg14: memref<1x32xf32, #tpu.memory_space<vmem>>, %arg15: memref<1x32xf32, #tpu.memory_space<vmem>>, %arg16: memref<1x32xf32, #tpu.memory_space<vmem>>, %arg17: memref<32x64xf32, #tpu.memory_space<vmem>>, %arg18: memref<1x64xf32, #tpu.memory_space<vmem>>, %arg19: memref<7x32xf32, #tpu.memory_space<vmem>>, %arg20: memref<1x32xf32, #tpu.memory_space<vmem>>, %arg21: memref<1x32xf32, #tpu.memory_space<vmem>>, %arg22: memref<1x32xf32, #tpu.memory_space<vmem>>, %arg23: memref<32x32xf32, #tpu.memory_space<vmem>>, %arg24: memref<1x32xf32, #tpu.memory_space<vmem>>, %arg25: memref<1x32xf32, #tpu.memory_space<vmem>>, %arg26: memref<1x32xf32, #tpu.memory_space<vmem>>, %arg27: memref<32x64xf32, #tpu.memory_space<vmem>>, %arg28: memref<1x64xf32, #tpu.memory_space<vmem>>, %arg29: memref<64x32xf32, #tpu.memory_space<vmem>>, %arg30: memref<1x32xf32, #tpu.memory_space<vmem>>, %arg31: memref<1x32xf32, #tpu.memory_space<vmem>>, %arg32: memref<1x32xf32, #tpu.memory_space<vmem>>, %arg33: memref<1x8x32xf32, #tpu.memory_space<vmem>>, %arg34: memref<24x32xf32, #tpu.memory_space<vmem>>) attributes {dimension_semantics = [#tpu.dimension_semantics<parallel>], iteration_bounds = array<i64: 2>, scalar_prefetch = 1 : i64, scratch_operands = 1 : i64, tpu.core_type = #tpu.core_type<tc>, window_params = [{transform_indices = @transform_0, window_bounds = array<i64: 1, 8, 32>}, {pipeline_mode = #tpu.pipeline_mode<synchronous>, transform_indices = @transform_1, window_bounds = array<i64: 1, 32>}, {pipeline_mode = #tpu.pipeline_mode<synchronous>, transform_indices = @transform_2, window_bounds = array<i64: 1, 32>}, {pipeline_mode = #tpu.pipeline_mode<synchronous>, transform_indices = @transform_3, window_bounds = array<i64: 32, 64>}, {pipeline_mode = #tpu.pipeline_mode<synchronous>, transform_indices = @transform_4, window_bounds = array<i64: 1, 64>}, {pipeline_mode = #tpu.pipeline_mode<synchronous>, transform_indices = @transform_5, window_bounds = array<i64: 64, 32>}, {pipeline_mode = #tpu.pipeline_mode<synchronous>, transform_indices = @transform_6, window_bounds = array<i64: 1, 32>}, {pipeline_mode = #tpu.pipeline_mode<synchronous>, transform_indices = @transform_7, window_bounds = array<i64: 1, 32>}, {pipeline_mode = #tpu.pipeline_mode<synchronous>, transform_indices = @transform_8, window_bounds = array<i64: 1, 32>}, {pipeline_mode = #tpu.pipeline_mode<synchronous>, transform_indices = @transform_9, window_bounds = array<i64: 32, 96>}, {pipeline_mode = #tpu.pipeline_mode<synchronous>, transform_indices = @transform_10, window_bounds = array<i64: 1, 96>}, {pipeline_mode = #tpu.pipeline_mode<synchronous>, transform_indices = @transform_11, window_bounds = array<i64: 32, 32>}, {pipeline_mode = #tpu.pipeline_mode<synchronous>, transform_indices = @transform_12, window_bounds = array<i64: 1, 32>}, {pipeline_mode = #tpu.pipeline_mode<synchronous>, transform_indices = @transform_13, window_bounds = array<i64: 1, 32>}, {pipeline_mode = #tpu.pipeline_mode<synchronous>, transform_indices = @transform_14, window_bounds = array<i64: 1, 32>}, {pipeline_mode = #tpu.pipeline_mode<synchronous>, transform_indices = @transform_15, window_bounds = array<i64: 32, 64>}, {pipeline_mode = #tpu.pipeline_mode<synchronous>, transform_indices = @transform_16, window_bounds = array<i64: 1, 64>}, {pipeline_mode = #tpu.pipeline_mode<synchronous>, transform_indices = @transform_17, window_bounds = array<i64: 7, 32>}, {pipeline_mode = #tpu.pipeline_mode<synchronous>, transform_indices = @transform_18, window_bounds = array<i64: 1, 32>}, {pipeline_mode = #tpu.pipeline_mode<synchronous>, transform_indices = @transform_19, window_bounds = array<i64: 1, 32>}, {pipeline_mode = #tpu.pipeline_mode<synchronous>, transform_indices = @transform_20, window_bounds = array<i64: 1, 32>}, {pipeline_mode = #tpu.pipeline_mode<synchronous>, transform_indices = @transform_21, window_bounds = array<i64: 32, 32>}, {pipeline_mode = #tpu.pipeline_mode<synchronous>, transform_indices = @transform_22, window_bounds = array<i64: 1, 32>}, {pipeline_mode = #tpu.pipeline_mode<synchronous>, transform_indices = @transform_23, window_bounds = array<i64: 1, 32>}, {pipeline_mode = #tpu.pipeline_mode<synchronous>, transform_indices = @transform_24, window_bounds = array<i64: 1, 32>}, {pipeline_mode = #tpu.pipeline_mode<synchronous>, transform_indices = @transform_25, window_bounds = array<i64: 32, 64>}, {pipeline_mode = #tpu.pipeline_mode<synchronous>, transform_indices = @transform_26, window_bounds = array<i64: 1, 64>}, {pipeline_mode = #tpu.pipeline_mode<synchronous>, transform_indices = @transform_27, window_bounds = array<i64: 64, 32>}, {pipeline_mode = #tpu.pipeline_mode<synchronous>, transform_indices = @transform_28, window_bounds = array<i64: 1, 32>}, {pipeline_mode = #tpu.pipeline_mode<synchronous>, transform_indices = @transform_29, window_bounds = array<i64: 1, 32>}, {pipeline_mode = #tpu.pipeline_mode<synchronous>, transform_indices = @transform_30, window_bounds = array<i64: 1, 32>}, {transform_indices = @transform_31, window_bounds = array<i64: 1, 8, 32>}]} {
    %c0 = arith.constant 0 : index
    %c0_0 = arith.constant 0 : index
    %c0_1 = arith.constant 0 : index
    %0 = vector.load %arg2[%c0, %c0_0, %c0_1] : memref<1x8x32xf32, #tpu.memory_space<vmem>>, vector<1x8x32xf32>
    %1 = vector.shape_cast %0 : vector<1x8x32xf32> to vector<8x32xf32>
    %c0_2 = arith.constant 0 : index
    %c0_3 = arith.constant 0 : index
    %2 = vector.load %arg3[%c0_2, %c0_3] : memref<1x32xf32, #tpu.memory_space<vmem>>, vector<1x32xf32>
    %c0_4 = arith.constant 0 : index
    %c0_5 = arith.constant 0 : index
    %3 = vector.load %arg4[%c0_4, %c0_5] : memref<1x32xf32, #tpu.memory_space<vmem>>, vector<1x32xf32>
    %c0_6 = arith.constant 0 : index
    %c0_7 = arith.constant 0 : index
    %4 = vector.load %arg5[%c0_6, %c0_7] : memref<32x64xf32, #tpu.memory_space<vmem>>, vector<32x64xf32>
    %c0_8 = arith.constant 0 : index
    %c0_9 = arith.constant 0 : index
    %5 = vector.load %arg6[%c0_8, %c0_9] : memref<1x64xf32, #tpu.memory_space<vmem>>, vector<1x64xf32>
    %c0_10 = arith.constant 0 : index
    %c0_11 = arith.constant 0 : index
    %6 = vector.load %arg7[%c0_10, %c0_11] : memref<64x32xf32, #tpu.memory_space<vmem>>, vector<64x32xf32>
    %c0_12 = arith.constant 0 : index
    %c0_13 = arith.constant 0 : index
    %7 = vector.load %arg8[%c0_12, %c0_13] : memref<1x32xf32, #tpu.memory_space<vmem>>, vector<1x32xf32>
    %cst = arith.constant dense<0.000000e+00> : vector<8xf32>
    %8 = vector.multi_reduction <add>, %1, %cst [1] : vector<8x32xf32> to vector<8xf32>
    %9 = vector.shape_cast %8 : vector<8xf32> to vector<8x1xf32>
    %cst_14 = arith.constant 3.200000e+01 : f32
    %10 = vector.broadcast %cst_14 : f32 to vector<8x1xf32>
    %11 = arith.divf %9, %10 : vector<8x1xf32>
    %12 = vector.broadcast %11 : vector<8x1xf32> to vector<8x32xf32>
    %13 = arith.subf %1, %12 : vector<8x32xf32>
    %14 = arith.mulf %13, %13 : vector<8x32xf32>
    %cst_15 = arith.constant dense<0.000000e+00> : vector<8xf32>
    %15 = vector.multi_reduction <add>, %14, %cst_15 [1] : vector<8x32xf32> to vector<8xf32>
    %16 = vector.shape_cast %15 : vector<8xf32> to vector<8x1xf32>
    %cst_16 = arith.constant 3.200000e+01 : f32
    %17 = vector.broadcast %cst_16 : f32 to vector<8x1xf32>
    %18 = arith.divf %16, %17 : vector<8x1xf32>
    %19 = vector.broadcast %11 : vector<8x1xf32> to vector<8x32xf32>
    %20 = arith.subf %1, %19 : vector<8x32xf32>
    %cst_17 = arith.constant 9.99999974E-6 : f32
    %21 = vector.broadcast %cst_17 : f32 to vector<8x1xf32>
    %22 = arith.addf %18, %21 : vector<8x1xf32>
    %23 = math.rsqrt %22 : vector<8x1xf32>
    %24 = vector.broadcast %23 : vector<8x1xf32> to vector<8x32xf32>
    %25 = arith.mulf %20, %24 : vector<8x32xf32>
    %26 = vector.broadcast %2 : vector<1x32xf32> to vector<8x32xf32>
    %27 = arith.mulf %25, %26 : vector<8x32xf32>
    %28 = vector.broadcast %3 : vector<1x32xf32> to vector<8x32xf32>
    %29 = arith.addf %27, %28 : vector<8x32xf32>
    %30 = arith.truncf %29 : vector<8x32xf32> to vector<8x32xbf16>
    %31 = arith.truncf %4 : vector<32x64xf32> to vector<32x64xbf16>
    %cst_18 = arith.constant dense<0.000000e+00> : vector<8x64xf32>
    %32 = tpu.matmul %30, %31, %cst_18 {dimension_numbers = #tpu.dot_dimension_numbers<[1], [0], [0], [1], [0, 0, 1, 1], [], []>} : vector<8x32xbf16>, vector<32x64xbf16>, vector<8x64xf32> -> vector<8x64xf32>
    %33 = vector.broadcast %5 : vector<1x64xf32> to vector<8x64xf32>
    %34 = arith.addf %32, %33 : vector<8x64xf32>
    %35 = arith.negf %34 : vector<8x64xf32>
    %36 = math.exp %35 : vector<8x64xf32>
    %cst_19 = arith.constant 1.000000e+00 : f32
    %37 = vector.broadcast %cst_19 : f32 to vector<8x64xf32>
    %38 = arith.addf %37, %36 : vector<8x64xf32>
    %39 = arith.divf %37, %38 : vector<8x64xf32>
    %40 = arith.mulf %34, %39 : vector<8x64xf32>
    %41 = arith.truncf %40 : vector<8x64xf32> to vector<8x64xbf16>
    %42 = arith.truncf %6 : vector<64x32xf32> to vector<64x32xbf16>
    %cst_20 = arith.constant dense<0.000000e+00> : vector<8x32xf32>
    %43 = tpu.matmul %41, %42, %cst_20 {dimension_numbers = #tpu.dot_dimension_numbers<[1], [0], [0], [1], [0, 0, 1, 1], [], []>} : vector<8x64xbf16>, vector<64x32xbf16>, vector<8x32xf32> -> vector<8x32xf32>
    %44 = vector.broadcast %7 : vector<1x32xf32> to vector<8x32xf32>
    %45 = arith.addf %43, %44 : vector<8x32xf32>
    %cst_21 = arith.constant 5.000000e-01 : f32
    %46 = vector.broadcast %cst_21 : f32 to vector<8x32xf32>
    %47 = arith.mulf %46, %45 : vector<8x32xf32>
    %48 = arith.addf %1, %47 : vector<8x32xf32>
    %c0_22 = arith.constant 0 : index
    %c0_23 = arith.constant 0 : index
    %49 = vector.load %arg9[%c0_22, %c0_23] : memref<1x32xf32, #tpu.memory_space<vmem>>, vector<1x32xf32>
    %c0_24 = arith.constant 0 : index
    %c0_25 = arith.constant 0 : index
    %50 = vector.load %arg10[%c0_24, %c0_25] : memref<1x32xf32, #tpu.memory_space<vmem>>, vector<1x32xf32>
    %cst_26 = arith.constant dense<0.000000e+00> : vector<8xf32>
    %51 = vector.multi_reduction <add>, %48, %cst_26 [1] : vector<8x32xf32> to vector<8xf32>
    %52 = vector.shape_cast %51 : vector<8xf32> to vector<8x1xf32>
    %cst_27 = arith.constant 3.200000e+01 : f32
    %53 = vector.broadcast %cst_27 : f32 to vector<8x1xf32>
    %54 = arith.divf %52, %53 : vector<8x1xf32>
    %55 = vector.broadcast %54 : vector<8x1xf32> to vector<8x32xf32>
    %56 = arith.subf %48, %55 : vector<8x32xf32>
    %57 = arith.mulf %56, %56 : vector<8x32xf32>
    %cst_28 = arith.constant dense<0.000000e+00> : vector<8xf32>
    %58 = vector.multi_reduction <add>, %57, %cst_28 [1] : vector<8x32xf32> to vector<8xf32>
    %59 = vector.shape_cast %58 : vector<8xf32> to vector<8x1xf32>
    %cst_29 = arith.constant 3.200000e+01 : f32
    %60 = vector.broadcast %cst_29 : f32 to vector<8x1xf32>
    %61 = arith.divf %59, %60 : vector<8x1xf32>
    %62 = vector.broadcast %54 : vector<8x1xf32> to vector<8x32xf32>
    %63 = arith.subf %48, %62 : vector<8x32xf32>
    %cst_30 = arith.constant 9.99999974E-6 : f32
    %64 = vector.broadcast %cst_30 : f32 to vector<8x1xf32>
    %65 = arith.addf %61, %64 : vector<8x1xf32>
    %66 = math.rsqrt %65 : vector<8x1xf32>
    %67 = vector.broadcast %66 : vector<8x1xf32> to vector<8x32xf32>
    %68 = arith.mulf %63, %67 : vector<8x32xf32>
    %69 = vector.broadcast %49 : vector<1x32xf32> to vector<8x32xf32>
    %70 = arith.mulf %68, %69 : vector<8x32xf32>
    %71 = vector.broadcast %50 : vector<1x32xf32> to vector<8x32xf32>
    %72 = arith.addf %70, %71 : vector<8x32xf32>
    %c0_31 = arith.constant 0 : index
    %c0_32 = arith.constant 0 : index
    %73 = vector.load %arg11[%c0_31, %c0_32] : memref<32x96xf32, #tpu.memory_space<vmem>>, vector<32x96xf32>
    %74 = arith.truncf %72 : vector<8x32xf32> to vector<8x32xbf16>
    %75 = arith.truncf %73 : vector<32x96xf32> to vector<32x96xbf16>
    %cst_33 = arith.constant dense<0.000000e+00> : vector<8x96xf32>
    %76 = tpu.matmul %74, %75, %cst_33 {dimension_numbers = #tpu.dot_dimension_numbers<[1], [0], [0], [1], [0, 0, 1, 1], [], []>} : vector<8x32xbf16>, vector<32x96xbf16>, vector<8x96xf32> -> vector<8x96xf32>
    %c0_34 = arith.constant 0 : index
    %c0_35 = arith.constant 0 : index
    %77 = vector.load %arg12[%c0_34, %c0_35] : memref<1x96xf32, #tpu.memory_space<vmem>>, vector<1x96xf32>
    %78 = vector.broadcast %77 : vector<1x96xf32> to vector<8x96xf32>
    %79 = arith.addf %76, %78 : vector<8x96xf32>
    %80 = vector.extract_strided_slice %79 {offsets = [0, 0], sizes = [8, 32], strides = [1, 1]} : vector<8x96xf32> to vector<8x32xf32>
    %81 = vector.extract_strided_slice %79 {offsets = [0, 32], sizes = [8, 32], strides = [1, 1]} : vector<8x96xf32> to vector<8x32xf32>
    %82 = vector.extract_strided_slice %79 {offsets = [0, 64], sizes = [8, 32], strides = [1, 1]} : vector<8x96xf32> to vector<8x32xf32>
    %83 = arith.index_cast %arg0 : i32 to index
    %84 = memref.load %arg1[%83] : memref<2xi32, #tpu.memory_space<smem>>
    %85 = tpu.iota {dimensions = array<i32: 1>} : vector<1x8xi32>
    %86 = vector.broadcast %84 : i32 to vector<1x8xi32>
    %87 = arith.cmpi sge, %85, %86 : vector<1x8xi32>
    %88 = vector.extract_strided_slice %80 {offsets = [0, 0], sizes = [8, 8], strides = [1, 1]} : vector<8x32xf32> to vector<8x8xf32>
    %89 = vector.extract_strided_slice %81 {offsets = [0, 0], sizes = [8, 8], strides = [1, 1]} : vector<8x32xf32> to vector<8x8xf32>
    %90 = arith.truncf %88 : vector<8x8xf32> to vector<8x8xbf16>
    %91 = arith.truncf %89 : vector<8x8xf32> to vector<8x8xbf16>
    %cst_36 = arith.constant dense<0.000000e+00> : vector<8x8xf32>
    %92 = tpu.matmul %90, %91, %cst_36 {dimension_numbers = #tpu.dot_dimension_numbers<[1], [1], [0], [0], [0, 0, 1, 0], [], []>} : vector<8x8xbf16>, vector<8x8xbf16>, vector<8x8xf32> -> vector<8x8xf32>
    %cst_37 = arith.constant 0.353553385 : f32
    %93 = vector.broadcast %cst_37 : f32 to vector<8x8xf32>
    %94 = arith.mulf %92, %93 : vector<8x8xf32>
    %cst_38 = arith.constant -1.000000e+09 : f32
    %95 = vector.shape_cast %87 : vector<1x8xi1> to vector<1x8xi1>
    %96 = vector.broadcast %95 : vector<1x8xi1> to vector<8x8xi1>
    %97 = vector.broadcast %cst_38 : f32 to vector<8x8xf32>
    %98 = arith.select %96, %97, %94 : vector<8x8xi1>, vector<8x8xf32>
    %cst_39 = arith.constant dense<0xFF800000> : vector<8xf32>
    %99 = vector.multi_reduction <maximumf>, %98, %cst_39 [1] : vector<8x8xf32> to vector<8xf32>
    %100 = vector.shape_cast %99 : vector<8xf32> to vector<8x1xf32>
    %101 = vector.broadcast %100 : vector<8x1xf32> to vector<8x8xf32>
    %102 = arith.subf %98, %101 : vector<8x8xf32>
    %103 = math.exp %102 : vector<8x8xf32>
    %cst_40 = arith.constant dense<0.000000e+00> : vector<8xf32>
    %104 = vector.multi_reduction <add>, %103, %cst_40 [1] : vector<8x8xf32> to vector<8xf32>
    %105 = vector.shape_cast %104 : vector<8xf32> to vector<8x1xf32>
    %106 = tpu.reciprocal %105 {approx = true} : vector<8x1xf32> -> vector<8x1xf32>
    %107 = vector.broadcast %106 : vector<8x1xf32> to vector<8x8xf32>
    %108 = arith.mulf %103, %107 : vector<8x8xf32>
    %109 = vector.extract_strided_slice %82 {offsets = [0, 0], sizes = [8, 8], strides = [1, 1]} : vector<8x32xf32> to vector<8x8xf32>
    %110 = arith.truncf %108 : vector<8x8xf32> to vector<8x8xbf16>
    %111 = arith.truncf %109 : vector<8x8xf32> to vector<8x8xbf16>
    %cst_41 = arith.constant dense<0.000000e+00> : vector<8x8xf32>
    %112 = tpu.matmul %110, %111, %cst_41 {dimension_numbers = #tpu.dot_dimension_numbers<[1], [0], [0], [1], [0, 0, 1, 1], [], []>} : vector<8x8xbf16>, vector<8x8xbf16>, vector<8x8xf32> -> vector<8x8xf32>
    %113 = vector.extract_strided_slice %80 {offsets = [0, 8], sizes = [8, 8], strides = [1, 1]} : vector<8x32xf32> to vector<8x8xf32>
    %114 = vector.extract_strided_slice %81 {offsets = [0, 8], sizes = [8, 8], strides = [1, 1]} : vector<8x32xf32> to vector<8x8xf32>
    %115 = arith.truncf %113 : vector<8x8xf32> to vector<8x8xbf16>
    %116 = arith.truncf %114 : vector<8x8xf32> to vector<8x8xbf16>
    %cst_42 = arith.constant dense<0.000000e+00> : vector<8x8xf32>
    %117 = tpu.matmul %115, %116, %cst_42 {dimension_numbers = #tpu.dot_dimension_numbers<[1], [1], [0], [0], [0, 0, 1, 0], [], []>} : vector<8x8xbf16>, vector<8x8xbf16>, vector<8x8xf32> -> vector<8x8xf32>
    %cst_43 = arith.constant 0.353553385 : f32
    %118 = vector.broadcast %cst_43 : f32 to vector<8x8xf32>
    %119 = arith.mulf %117, %118 : vector<8x8xf32>
    %cst_44 = arith.constant -1.000000e+09 : f32
    %120 = vector.shape_cast %87 : vector<1x8xi1> to vector<1x8xi1>
    %121 = vector.broadcast %120 : vector<1x8xi1> to vector<8x8xi1>
    %122 = vector.broadcast %cst_44 : f32 to vector<8x8xf32>
    %123 = arith.select %121, %122, %119 : vector<8x8xi1>, vector<8x8xf32>
    %cst_45 = arith.constant dense<0xFF800000> : vector<8xf32>
    %124 = vector.multi_reduction <maximumf>, %123, %cst_45 [1] : vector<8x8xf32> to vector<8xf32>
    %125 = vector.shape_cast %124 : vector<8xf32> to vector<8x1xf32>
    %126 = vector.broadcast %125 : vector<8x1xf32> to vector<8x8xf32>
    %127 = arith.subf %123, %126 : vector<8x8xf32>
    %128 = math.exp %127 : vector<8x8xf32>
    %cst_46 = arith.constant dense<0.000000e+00> : vector<8xf32>
    %129 = vector.multi_reduction <add>, %128, %cst_46 [1] : vector<8x8xf32> to vector<8xf32>
    %130 = vector.shape_cast %129 : vector<8xf32> to vector<8x1xf32>
    %131 = tpu.reciprocal %130 {approx = true} : vector<8x1xf32> -> vector<8x1xf32>
    %132 = vector.broadcast %131 : vector<8x1xf32> to vector<8x8xf32>
    %133 = arith.mulf %128, %132 : vector<8x8xf32>
    %134 = vector.extract_strided_slice %82 {offsets = [0, 8], sizes = [8, 8], strides = [1, 1]} : vector<8x32xf32> to vector<8x8xf32>
    %135 = arith.truncf %133 : vector<8x8xf32> to vector<8x8xbf16>
    %136 = arith.truncf %134 : vector<8x8xf32> to vector<8x8xbf16>
    %cst_47 = arith.constant dense<0.000000e+00> : vector<8x8xf32>
    %137 = tpu.matmul %135, %136, %cst_47 {dimension_numbers = #tpu.dot_dimension_numbers<[1], [0], [0], [1], [0, 0, 1, 1], [], []>} : vector<8x8xbf16>, vector<8x8xbf16>, vector<8x8xf32> -> vector<8x8xf32>
    %138 = vector.extract_strided_slice %80 {offsets = [0, 16], sizes = [8, 8], strides = [1, 1]} : vector<8x32xf32> to vector<8x8xf32>
    %139 = vector.extract_strided_slice %81 {offsets = [0, 16], sizes = [8, 8], strides = [1, 1]} : vector<8x32xf32> to vector<8x8xf32>
    %140 = arith.truncf %138 : vector<8x8xf32> to vector<8x8xbf16>
    %141 = arith.truncf %139 : vector<8x8xf32> to vector<8x8xbf16>
    %cst_48 = arith.constant dense<0.000000e+00> : vector<8x8xf32>
    %142 = tpu.matmul %140, %141, %cst_48 {dimension_numbers = #tpu.dot_dimension_numbers<[1], [1], [0], [0], [0, 0, 1, 0], [], []>} : vector<8x8xbf16>, vector<8x8xbf16>, vector<8x8xf32> -> vector<8x8xf32>
    %cst_49 = arith.constant 0.353553385 : f32
    %143 = vector.broadcast %cst_49 : f32 to vector<8x8xf32>
    %144 = arith.mulf %142, %143 : vector<8x8xf32>
    %cst_50 = arith.constant -1.000000e+09 : f32
    %145 = vector.shape_cast %87 : vector<1x8xi1> to vector<1x8xi1>
    %146 = vector.broadcast %145 : vector<1x8xi1> to vector<8x8xi1>
    %147 = vector.broadcast %cst_50 : f32 to vector<8x8xf32>
    %148 = arith.select %146, %147, %144 : vector<8x8xi1>, vector<8x8xf32>
    %cst_51 = arith.constant dense<0xFF800000> : vector<8xf32>
    %149 = vector.multi_reduction <maximumf>, %148, %cst_51 [1] : vector<8x8xf32> to vector<8xf32>
    %150 = vector.shape_cast %149 : vector<8xf32> to vector<8x1xf32>
    %151 = vector.broadcast %150 : vector<8x1xf32> to vector<8x8xf32>
    %152 = arith.subf %148, %151 : vector<8x8xf32>
    %153 = math.exp %152 : vector<8x8xf32>
    %cst_52 = arith.constant dense<0.000000e+00> : vector<8xf32>
    %154 = vector.multi_reduction <add>, %153, %cst_52 [1] : vector<8x8xf32> to vector<8xf32>
    %155 = vector.shape_cast %154 : vector<8xf32> to vector<8x1xf32>
    %156 = tpu.reciprocal %155 {approx = true} : vector<8x1xf32> -> vector<8x1xf32>
    %157 = vector.broadcast %156 : vector<8x1xf32> to vector<8x8xf32>
    %158 = arith.mulf %153, %157 : vector<8x8xf32>
    %159 = vector.extract_strided_slice %82 {offsets = [0, 16], sizes = [8, 8], strides = [1, 1]} : vector<8x32xf32> to vector<8x8xf32>
    %160 = arith.truncf %158 : vector<8x8xf32> to vector<8x8xbf16>
    %161 = arith.truncf %159 : vector<8x8xf32> to vector<8x8xbf16>
    %cst_53 = arith.constant dense<0.000000e+00> : vector<8x8xf32>
    %162 = tpu.matmul %160, %161, %cst_53 {dimension_numbers = #tpu.dot_dimension_numbers<[1], [0], [0], [1], [0, 0, 1, 1], [], []>} : vector<8x8xbf16>, vector<8x8xbf16>, vector<8x8xf32> -> vector<8x8xf32>
    %163 = vector.extract_strided_slice %80 {offsets = [0, 24], sizes = [8, 8], strides = [1, 1]} : vector<8x32xf32> to vector<8x8xf32>
    %164 = vector.extract_strided_slice %81 {offsets = [0, 24], sizes = [8, 8], strides = [1, 1]} : vector<8x32xf32> to vector<8x8xf32>
    %165 = arith.truncf %163 : vector<8x8xf32> to vector<8x8xbf16>
    %166 = arith.truncf %164 : vector<8x8xf32> to vector<8x8xbf16>
    %cst_54 = arith.constant dense<0.000000e+00> : vector<8x8xf32>
    %167 = tpu.matmul %165, %166, %cst_54 {dimension_numbers = #tpu.dot_dimension_numbers<[1], [1], [0], [0], [0, 0, 1, 0], [], []>} : vector<8x8xbf16>, vector<8x8xbf16>, vector<8x8xf32> -> vector<8x8xf32>
    %cst_55 = arith.constant 0.353553385 : f32
    %168 = vector.broadcast %cst_55 : f32 to vector<8x8xf32>
    %169 = arith.mulf %167, %168 : vector<8x8xf32>
    %cst_56 = arith.constant -1.000000e+09 : f32
    %170 = vector.shape_cast %87 : vector<1x8xi1> to vector<1x8xi1>
    %171 = vector.broadcast %170 : vector<1x8xi1> to vector<8x8xi1>
    %172 = vector.broadcast %cst_56 : f32 to vector<8x8xf32>
    %173 = arith.select %171, %172, %169 : vector<8x8xi1>, vector<8x8xf32>
    %cst_57 = arith.constant dense<0xFF800000> : vector<8xf32>
    %174 = vector.multi_reduction <maximumf>, %173, %cst_57 [1] : vector<8x8xf32> to vector<8xf32>
    %175 = vector.shape_cast %174 : vector<8xf32> to vector<8x1xf32>
    %176 = vector.broadcast %175 : vector<8x1xf32> to vector<8x8xf32>
    %177 = arith.subf %173, %176 : vector<8x8xf32>
    %178 = math.exp %177 : vector<8x8xf32>
    %cst_58 = arith.constant dense<0.000000e+00> : vector<8xf32>
    %179 = vector.multi_reduction <add>, %178, %cst_58 [1] : vector<8x8xf32> to vector<8xf32>
    %180 = vector.shape_cast %179 : vector<8xf32> to vector<8x1xf32>
    %181 = tpu.reciprocal %180 {approx = true} : vector<8x1xf32> -> vector<8x1xf32>
    %182 = vector.broadcast %181 : vector<8x1xf32> to vector<8x8xf32>
    %183 = arith.mulf %178, %182 : vector<8x8xf32>
    %184 = vector.extract_strided_slice %82 {offsets = [0, 24], sizes = [8, 8], strides = [1, 1]} : vector<8x32xf32> to vector<8x8xf32>
    %185 = arith.truncf %183 : vector<8x8xf32> to vector<8x8xbf16>
    %186 = arith.truncf %184 : vector<8x8xf32> to vector<8x8xbf16>
    %cst_59 = arith.constant dense<0.000000e+00> : vector<8x8xf32>
    %187 = tpu.matmul %185, %186, %cst_59 {dimension_numbers = #tpu.dot_dimension_numbers<[1], [0], [0], [1], [0, 0, 1, 1], [], []>} : vector<8x8xbf16>, vector<8x8xbf16>, vector<8x8xf32> -> vector<8x8xf32>
    %188 = tpu.concatenate %112, %137, %162, %187 in 1 : vector<8x8xf32>, vector<8x8xf32>, vector<8x8xf32>, vector<8x8xf32> -> vector<8x32xf32>
    %c0_60 = arith.constant 0 : index
    %c0_61 = arith.constant 0 : index
    %189 = vector.load %arg13[%c0_60, %c0_61] : memref<32x32xf32, #tpu.memory_space<vmem>>, vector<32x32xf32>
    %190 = arith.truncf %188 : vector<8x32xf32> to vector<8x32xbf16>
    %191 = arith.truncf %189 : vector<32x32xf32> to vector<32x32xbf16>
    %cst_62 = arith.constant dense<0.000000e+00> : vector<8x32xf32>
    %192 = tpu.matmul %190, %191, %cst_62 {dimension_numbers = #tpu.dot_dimension_numbers<[1], [0], [0], [1], [0, 0, 1, 1], [], []>} : vector<8x32xbf16>, vector<32x32xbf16>, vector<8x32xf32> -> vector<8x32xf32>
    %193 = arith.addf %48, %192 : vector<8x32xf32>
    %c0_63 = arith.constant 0 : index
    %c0_64 = arith.constant 0 : index
    %194 = vector.load %arg14[%c0_63, %c0_64] : memref<1x32xf32, #tpu.memory_space<vmem>>, vector<1x32xf32>
    %195 = vector.broadcast %194 : vector<1x32xf32> to vector<8x32xf32>
    %196 = arith.addf %193, %195 : vector<8x32xf32>
    %c0_65 = arith.constant 0 : index
    %c0_66 = arith.constant 0 : index
    %197 = vector.load %arg15[%c0_65, %c0_66] : memref<1x32xf32, #tpu.memory_space<vmem>>, vector<1x32xf32>
    %c0_67 = arith.constant 0 : index
    %c0_68 = arith.constant 0 : index
    %198 = vector.load %arg16[%c0_67, %c0_68] : memref<1x32xf32, #tpu.memory_space<vmem>>, vector<1x32xf32>
    %cst_69 = arith.constant dense<0.000000e+00> : vector<8xf32>
    %199 = vector.multi_reduction <add>, %196, %cst_69 [1] : vector<8x32xf32> to vector<8xf32>
    %200 = vector.shape_cast %199 : vector<8xf32> to vector<8x1xf32>
    %cst_70 = arith.constant 3.200000e+01 : f32
    %201 = vector.broadcast %cst_70 : f32 to vector<8x1xf32>
    %202 = arith.divf %200, %201 : vector<8x1xf32>
    %203 = vector.broadcast %202 : vector<8x1xf32> to vector<8x32xf32>
    %204 = arith.subf %196, %203 : vector<8x32xf32>
    %205 = arith.mulf %204, %204 : vector<8x32xf32>
    %cst_71 = arith.constant dense<0.000000e+00> : vector<8xf32>
    %206 = vector.multi_reduction <add>, %205, %cst_71 [1] : vector<8x32xf32> to vector<8xf32>
    %207 = vector.shape_cast %206 : vector<8xf32> to vector<8x1xf32>
    %cst_72 = arith.constant 3.200000e+01 : f32
    %208 = vector.broadcast %cst_72 : f32 to vector<8x1xf32>
    %209 = arith.divf %207, %208 : vector<8x1xf32>
    %210 = vector.broadcast %202 : vector<8x1xf32> to vector<8x32xf32>
    %211 = arith.subf %196, %210 : vector<8x32xf32>
    %cst_73 = arith.constant 9.99999974E-6 : f32
    %212 = vector.broadcast %cst_73 : f32 to vector<8x1xf32>
    %213 = arith.addf %209, %212 : vector<8x1xf32>
    %214 = math.rsqrt %213 : vector<8x1xf32>
    %215 = vector.broadcast %214 : vector<8x1xf32> to vector<8x32xf32>
    %216 = arith.mulf %211, %215 : vector<8x32xf32>
    %217 = vector.broadcast %197 : vector<1x32xf32> to vector<8x32xf32>
    %218 = arith.mulf %216, %217 : vector<8x32xf32>
    %219 = vector.broadcast %198 : vector<1x32xf32> to vector<8x32xf32>
    %220 = arith.addf %218, %219 : vector<8x32xf32>
    %c0_74 = arith.constant 0 : index
    %c0_75 = arith.constant 0 : index
    %221 = vector.load %arg17[%c0_74, %c0_75] : memref<32x64xf32, #tpu.memory_space<vmem>>, vector<32x64xf32>
    %222 = arith.truncf %220 : vector<8x32xf32> to vector<8x32xbf16>
    %223 = arith.truncf %221 : vector<32x64xf32> to vector<32x64xbf16>
    %cst_76 = arith.constant dense<0.000000e+00> : vector<8x64xf32>
    %224 = tpu.matmul %222, %223, %cst_76 {dimension_numbers = #tpu.dot_dimension_numbers<[1], [0], [0], [1], [0, 0, 1, 1], [], []>} : vector<8x32xbf16>, vector<32x64xbf16>, vector<8x64xf32> -> vector<8x64xf32>
    %c0_77 = arith.constant 0 : index
    %c0_78 = arith.constant 0 : index
    %225 = vector.load %arg18[%c0_77, %c0_78] : memref<1x64xf32, #tpu.memory_space<vmem>>, vector<1x64xf32>
    %226 = vector.broadcast %225 : vector<1x64xf32> to vector<8x64xf32>
    %227 = arith.addf %224, %226 : vector<8x64xf32>
    %228 = vector.extract_strided_slice %227 {offsets = [0, 0], sizes = [8, 32], strides = [1, 1]} : vector<8x64xf32> to vector<8x32xf32>
    %229 = vector.extract_strided_slice %227 {offsets = [0, 32], sizes = [8, 32], strides = [1, 1]} : vector<8x64xf32> to vector<8x32xf32>
    %230 = arith.negf %229 : vector<8x32xf32>
    %231 = math.exp %230 : vector<8x32xf32>
    %cst_79 = arith.constant 1.000000e+00 : f32
    %232 = vector.broadcast %cst_79 : f32 to vector<8x32xf32>
    %233 = arith.addf %232, %231 : vector<8x32xf32>
    %234 = arith.divf %232, %233 : vector<8x32xf32>
    %235 = arith.mulf %228, %234 : vector<8x32xf32>
    %cst_80 = arith.constant 0.000000e+00 : f32
    %236 = vector.broadcast %cst_80 : f32 to vector<24x32xf32>
    %c0_81 = arith.constant 0 : index
    %c0_82 = arith.constant 0 : index
    %237 = vector.load %arg34[%c0_81, %c0_82] : memref<24x32xf32, #tpu.memory_space<vmem>>, vector<24x32xf32>
    tpu.vector_store %arg34[%c0_81, %c0_82], %236 {strides = array<i32>} : memref<24x32xf32, #tpu.memory_space<vmem>>, vector<24x32xf32>,
    %c8 = arith.constant 8 : index
    %c0_83 = arith.constant 0 : index
    %238 = vector.load %arg34[%c8, %c0_83] : memref<24x32xf32, #tpu.memory_space<vmem>>, vector<8x32xf32>
    tpu.vector_store %arg34[%c8, %c0_83], %235 {strides = array<i32>} : memref<24x32xf32, #tpu.memory_space<vmem>>, vector<8x32xf32>,
    %c0_84 = arith.constant 0 : index
    %c0_85 = arith.constant 0 : index
    %239 = vector.load %arg19[%c0_84, %c0_85] : memref<7x32xf32, #tpu.memory_space<vmem>>, vector<7x32xf32>
    %cst_86 = arith.constant 0.000000e+00 : f32
    %240 = vector.broadcast %cst_86 : f32 to vector<8x32xf32>
    %c5 = arith.constant 5 : index
    %c0_87 = arith.constant 0 : index
    %241 = vector.load %arg34[%c5, %c0_87] : memref<24x32xf32, #tpu.memory_space<vmem>>, vector<8x32xf32>
    %242 = vector.extract_strided_slice %239 {offsets = [0, 0], sizes = [1, 32], strides = [1, 1]} : vector<7x32xf32> to vector<1x32xf32>
    %243 = vector.shape_cast %242 : vector<1x32xf32> to vector<32xf32>
    %244 = vector.shape_cast %243 : vector<32xf32> to vector<1x32xf32>
    %245 = vector.broadcast %244 : vector<1x32xf32> to vector<8x32xf32>
    %246 = arith.mulf %241, %245 : vector<8x32xf32>
    %247 = arith.addf %240, %246 : vector<8x32xf32>
    %c6 = arith.constant 6 : index
    %c0_88 = arith.constant 0 : index
    %248 = vector.load %arg34[%c6, %c0_88] : memref<24x32xf32, #tpu.memory_space<vmem>>, vector<8x32xf32>
    %249 = vector.extract_strided_slice %239 {offsets = [1, 0], sizes = [1, 32], strides = [1, 1]} : vector<7x32xf32> to vector<1x32xf32>
    %250 = vector.shape_cast %249 : vector<1x32xf32> to vector<32xf32>
    %251 = vector.shape_cast %250 : vector<32xf32> to vector<1x32xf32>
    %252 = vector.broadcast %251 : vector<1x32xf32> to vector<8x32xf32>
    %253 = arith.mulf %248, %252 : vector<8x32xf32>
    %254 = arith.addf %247, %253 : vector<8x32xf32>
    %c7 = arith.constant 7 : index
    %c0_89 = arith.constant 0 : index
    %255 = vector.load %arg34[%c7, %c0_89] : memref<24x32xf32, #tpu.memory_space<vmem>>, vector<8x32xf32>
    %256 = vector.extract_strided_slice %239 {offsets = [2, 0], sizes = [1, 32], strides = [1, 1]} : vector<7x32xf32> to vector<1x32xf32>
    %257 = vector.shape_cast %256 : vector<1x32xf32> to vector<32xf32>
    %258 = vector.shape_cast %257 : vector<32xf32> to vector<1x32xf32>
    %259 = vector.broadcast %258 : vector<1x32xf32> to vector<8x32xf32>
    %260 = arith.mulf %255, %259 : vector<8x32xf32>
    %261 = arith.addf %254, %260 : vector<8x32xf32>
    %c8_90 = arith.constant 8 : index
    %c0_91 = arith.constant 0 : index
    %262 = vector.load %arg34[%c8_90, %c0_91] : memref<24x32xf32, #tpu.memory_space<vmem>>, vector<8x32xf32>
    %263 = vector.extract_strided_slice %239 {offsets = [3, 0], sizes = [1, 32], strides = [1, 1]} : vector<7x32xf32> to vector<1x32xf32>
    %264 = vector.shape_cast %263 : vector<1x32xf32> to vector<32xf32>
    %265 = vector.shape_cast %264 : vector<32xf32> to vector<1x32xf32>
    %266 = vector.broadcast %265 : vector<1x32xf32> to vector<8x32xf32>
    %267 = arith.mulf %262, %266 : vector<8x32xf32>
    %268 = arith.addf %261, %267 : vector<8x32xf32>
    %c9 = arith.constant 9 : index
    %c0_92 = arith.constant 0 : index
    %269 = vector.load %arg34[%c9, %c0_92] : memref<24x32xf32, #tpu.memory_space<vmem>>, vector<8x32xf32>
    %270 = vector.extract_strided_slice %239 {offsets = [4, 0], sizes = [1, 32], strides = [1, 1]} : vector<7x32xf32> to vector<1x32xf32>
    %271 = vector.shape_cast %270 : vector<1x32xf32> to vector<32xf32>
    %272 = vector.shape_cast %271 : vector<32xf32> to vector<1x32xf32>
    %273 = vector.broadcast %272 : vector<1x32xf32> to vector<8x32xf32>
    %274 = arith.mulf %269, %273 : vector<8x32xf32>
    %275 = arith.addf %268, %274 : vector<8x32xf32>
    %c10 = arith.constant 10 : index
    %c0_93 = arith.constant 0 : index
    %276 = vector.load %arg34[%c10, %c0_93] : memref<24x32xf32, #tpu.memory_space<vmem>>, vector<8x32xf32>
    %277 = vector.extract_strided_slice %239 {offsets = [5, 0], sizes = [1, 32], strides = [1, 1]} : vector<7x32xf32> to vector<1x32xf32>
    %278 = vector.shape_cast %277 : vector<1x32xf32> to vector<32xf32>
    %279 = vector.shape_cast %278 : vector<32xf32> to vector<1x32xf32>
    %280 = vector.broadcast %279 : vector<1x32xf32> to vector<8x32xf32>
    %281 = arith.mulf %276, %280 : vector<8x32xf32>
    %282 = arith.addf %275, %281 : vector<8x32xf32>
    %c11 = arith.constant 11 : index
    %c0_94 = arith.constant 0 : index
    %283 = vector.load %arg34[%c11, %c0_94] : memref<24x32xf32, #tpu.memory_space<vmem>>, vector<8x32xf32>
    %284 = vector.extract_strided_slice %239 {offsets = [6, 0], sizes = [1, 32], strides = [1, 1]} : vector<7x32xf32> to vector<1x32xf32>
    %285 = vector.shape_cast %284 : vector<1x32xf32> to vector<32xf32>
    %286 = vector.shape_cast %285 : vector<32xf32> to vector<1x32xf32>
    %287 = vector.broadcast %286 : vector<1x32xf32> to vector<8x32xf32>
    %288 = arith.mulf %283, %287 : vector<8x32xf32>
    %289 = arith.addf %282, %288 : vector<8x32xf32>
    %c0_95 = arith.constant 0 : index
    %c0_96 = arith.constant 0 : index
    %290 = vector.load %arg20[%c0_95, %c0_96] : memref<1x32xf32, #tpu.memory_space<vmem>>, vector<1x32xf32>
    %291 = vector.broadcast %290 : vector<1x32xf32> to vector<8x32xf32>
    %292 = arith.addf %289, %291 : vector<8x32xf32>
    %c0_97 = arith.constant 0 : index
    %c0_98 = arith.constant 0 : index
    %293 = vector.load %arg21[%c0_97, %c0_98] : memref<1x32xf32, #tpu.memory_space<vmem>>, vector<1x32xf32>
    %294 = vector.broadcast %293 : vector<1x32xf32> to vector<8x32xf32>
    %295 = arith.mulf %292, %294 : vector<8x32xf32>
    %c0_99 = arith.constant 0 : index
    %c0_100 = arith.constant 0 : index
    %296 = vector.load %arg22[%c0_99, %c0_100] : memref<1x32xf32, #tpu.memory_space<vmem>>, vector<1x32xf32>
    %297 = vector.broadcast %296 : vector<1x32xf32> to vector<8x32xf32>
    %298 = arith.addf %295, %297 : vector<8x32xf32>
    %299 = arith.negf %298 : vector<8x32xf32>
    %300 = math.exp %299 : vector<8x32xf32>
    %cst_101 = arith.constant 1.000000e+00 : f32
    %301 = vector.broadcast %cst_101 : f32 to vector<8x32xf32>
    %302 = arith.addf %301, %300 : vector<8x32xf32>
    %303 = arith.divf %301, %302 : vector<8x32xf32>
    %304 = arith.mulf %298, %303 : vector<8x32xf32>
    %c0_102 = arith.constant 0 : index
    %c0_103 = arith.constant 0 : index
    %305 = vector.load %arg23[%c0_102, %c0_103] : memref<32x32xf32, #tpu.memory_space<vmem>>, vector<32x32xf32>
    %306 = arith.truncf %304 : vector<8x32xf32> to vector<8x32xbf16>
    %307 = arith.truncf %305 : vector<32x32xf32> to vector<32x32xbf16>
    %cst_104 = arith.constant dense<0.000000e+00> : vector<8x32xf32>
    %308 = tpu.matmul %306, %307, %cst_104 {dimension_numbers = #tpu.dot_dimension_numbers<[1], [0], [0], [1], [0, 0, 1, 1], [], []>} : vector<8x32xbf16>, vector<32x32xbf16>, vector<8x32xf32> -> vector<8x32xf32>
    %309 = arith.addf %196, %308 : vector<8x32xf32>
    %c0_105 = arith.constant 0 : index
    %c0_106 = arith.constant 0 : index
    %310 = vector.load %arg24[%c0_105, %c0_106] : memref<1x32xf32, #tpu.memory_space<vmem>>, vector<1x32xf32>
    %311 = vector.broadcast %310 : vector<1x32xf32> to vector<8x32xf32>
    %312 = arith.addf %309, %311 : vector<8x32xf32>
    %c0_107 = arith.constant 0 : index
    %c0_108 = arith.constant 0 : index
    %313 = vector.load %arg25[%c0_107, %c0_108] : memref<1x32xf32, #tpu.memory_space<vmem>>, vector<1x32xf32>
    %c0_109 = arith.constant 0 : index
    %c0_110 = arith.constant 0 : index
    %314 = vector.load %arg26[%c0_109, %c0_110] : memref<1x32xf32, #tpu.memory_space<vmem>>, vector<1x32xf32>
    %c0_111 = arith.constant 0 : index
    %c0_112 = arith.constant 0 : index
    %315 = vector.load %arg27[%c0_111, %c0_112] : memref<32x64xf32, #tpu.memory_space<vmem>>, vector<32x64xf32>
    %c0_113 = arith.constant 0 : index
    %c0_114 = arith.constant 0 : index
    %316 = vector.load %arg28[%c0_113, %c0_114] : memref<1x64xf32, #tpu.memory_space<vmem>>, vector<1x64xf32>
    %c0_115 = arith.constant 0 : index
    %c0_116 = arith.constant 0 : index
    %317 = vector.load %arg29[%c0_115, %c0_116] : memref<64x32xf32, #tpu.memory_space<vmem>>, vector<64x32xf32>
    %c0_117 = arith.constant 0 : index
    %c0_118 = arith.constant 0 : index
    %318 = vector.load %arg30[%c0_117, %c0_118] : memref<1x32xf32, #tpu.memory_space<vmem>>, vector<1x32xf32>
    %cst_119 = arith.constant dense<0.000000e+00> : vector<8xf32>
    %319 = vector.multi_reduction <add>, %312, %cst_119 [1] : vector<8x32xf32> to vector<8xf32>
    %320 = vector.shape_cast %319 : vector<8xf32> to vector<8x1xf32>
    %cst_120 = arith.constant 3.200000e+01 : f32
    %321 = vector.broadcast %cst_120 : f32 to vector<8x1xf32>
    %322 = arith.divf %320, %321 : vector<8x1xf32>
    %323 = vector.broadcast %322 : vector<8x1xf32> to vector<8x32xf32>
    %324 = arith.subf %312, %323 : vector<8x32xf32>
    %325 = arith.mulf %324, %324 : vector<8x32xf32>
    %cst_121 = arith.constant dense<0.000000e+00> : vector<8xf32>
    %326 = vector.multi_reduction <add>, %325, %cst_121 [1] : vector<8x32xf32> to vector<8xf32>
    %327 = vector.shape_cast %326 : vector<8xf32> to vector<8x1xf32>
    %cst_122 = arith.constant 3.200000e+01 : f32
    %328 = vector.broadcast %cst_122 : f32 to vector<8x1xf32>
    %329 = arith.divf %327, %328 : vector<8x1xf32>
    %330 = vector.broadcast %322 : vector<8x1xf32> to vector<8x32xf32>
    %331 = arith.subf %312, %330 : vector<8x32xf32>
    %cst_123 = arith.constant 9.99999974E-6 : f32
    %332 = vector.broadcast %cst_123 : f32 to vector<8x1xf32>
    %333 = arith.addf %329, %332 : vector<8x1xf32>
    %334 = math.rsqrt %333 : vector<8x1xf32>
    %335 = vector.broadcast %334 : vector<8x1xf32> to vector<8x32xf32>
    %336 = arith.mulf %331, %335 : vector<8x32xf32>
    %337 = vector.broadcast %313 : vector<1x32xf32> to vector<8x32xf32>
    %338 = arith.mulf %336, %337 : vector<8x32xf32>
    %339 = vector.broadcast %314 : vector<1x32xf32> to vector<8x32xf32>
    %340 = arith.addf %338, %339 : vector<8x32xf32>
    %341 = arith.truncf %340 : vector<8x32xf32> to vector<8x32xbf16>
    %342 = arith.truncf %315 : vector<32x64xf32> to vector<32x64xbf16>
    %cst_124 = arith.constant dense<0.000000e+00> : vector<8x64xf32>
    %343 = tpu.matmul %341, %342, %cst_124 {dimension_numbers = #tpu.dot_dimension_numbers<[1], [0], [0], [1], [0, 0, 1, 1], [], []>} : vector<8x32xbf16>, vector<32x64xbf16>, vector<8x64xf32> -> vector<8x64xf32>
    %344 = vector.broadcast %316 : vector<1x64xf32> to vector<8x64xf32>
    %345 = arith.addf %343, %344 : vector<8x64xf32>
    %346 = arith.negf %345 : vector<8x64xf32>
    %347 = math.exp %346 : vector<8x64xf32>
    %cst_125 = arith.constant 1.000000e+00 : f32
    %348 = vector.broadcast %cst_125 : f32 to vector<8x64xf32>
    %349 = arith.addf %348, %347 : vector<8x64xf32>
    %350 = arith.divf %348, %349 : vector<8x64xf32>
    %351 = arith.mulf %345, %350 : vector<8x64xf32>
    %352 = arith.truncf %351 : vector<8x64xf32> to vector<8x64xbf16>
    %353 = arith.truncf %317 : vector<64x32xf32> to vector<64x32xbf16>
    %cst_126 = arith.constant dense<0.000000e+00> : vector<8x32xf32>
    %354 = tpu.matmul %352, %353, %cst_126 {dimension_numbers = #tpu.dot_dimension_numbers<[1], [0], [0], [1], [0, 0, 1, 1], [], []>} : vector<8x64xbf16>, vector<64x32xbf16>, vector<8x32xf32> -> vector<8x32xf32>
    %355 = vector.broadcast %318 : vector<1x32xf32> to vector<8x32xf32>
    %356 = arith.addf %354, %355 : vector<8x32xf32>
    %cst_127 = arith.constant 5.000000e-01 : f32
    %357 = vector.broadcast %cst_127 : f32 to vector<8x32xf32>
    %358 = arith.mulf %357, %356 : vector<8x32xf32>
    %359 = arith.addf %312, %358 : vector<8x32xf32>
    %c0_128 = arith.constant 0 : index
    %c0_129 = arith.constant 0 : index
    %360 = vector.load %arg31[%c0_128, %c0_129] : memref<1x32xf32, #tpu.memory_space<vmem>>, vector<1x32xf32>
    %c0_130 = arith.constant 0 : index
    %c0_131 = arith.constant 0 : index
    %361 = vector.load %arg32[%c0_130, %c0_131] : memref<1x32xf32, #tpu.memory_space<vmem>>, vector<1x32xf32>
    %cst_132 = arith.constant dense<0.000000e+00> : vector<8xf32>
    %362 = vector.multi_reduction <add>, %359, %cst_132 [1] : vector<8x32xf32> to vector<8xf32>
    %363 = vector.shape_cast %362 : vector<8xf32> to vector<8x1xf32>
    %cst_133 = arith.constant 3.200000e+01 : f32
    %364 = vector.broadcast %cst_133 : f32 to vector<8x1xf32>
    %365 = arith.divf %363, %364 : vector<8x1xf32>
    %366 = vector.broadcast %365 : vector<8x1xf32> to vector<8x32xf32>
    %367 = arith.subf %359, %366 : vector<8x32xf32>
    %368 = arith.mulf %367, %367 : vector<8x32xf32>
    %cst_134 = arith.constant dense<0.000000e+00> : vector<8xf32>
    %369 = vector.multi_reduction <add>, %368, %cst_134 [1] : vector<8x32xf32> to vector<8xf32>
    %370 = vector.shape_cast %369 : vector<8xf32> to vector<8x1xf32>
    %cst_135 = arith.constant 3.200000e+01 : f32
    %371 = vector.broadcast %cst_135 : f32 to vector<8x1xf32>
    %372 = arith.divf %370, %371 : vector<8x1xf32>
    %373 = vector.broadcast %365 : vector<8x1xf32> to vector<8x32xf32>
    %374 = arith.subf %359, %373 : vector<8x32xf32>
    %cst_136 = arith.constant 9.99999974E-6 : f32
    %375 = vector.broadcast %cst_136 : f32 to vector<8x1xf32>
    %376 = arith.addf %372, %375 : vector<8x1xf32>
    %377 = math.rsqrt %376 : vector<8x1xf32>
    %378 = vector.broadcast %377 : vector<8x1xf32> to vector<8x32xf32>
    %379 = arith.mulf %374, %378 : vector<8x32xf32>
    %380 = vector.broadcast %360 : vector<1x32xf32> to vector<8x32xf32>
    %381 = arith.mulf %379, %380 : vector<8x32xf32>
    %382 = vector.broadcast %361 : vector<1x32xf32> to vector<8x32xf32>
    %383 = arith.addf %381, %382 : vector<8x32xf32>
    %c0_137 = arith.constant 0 : index
    %c0_138 = arith.constant 0 : index
    %c0_139 = arith.constant 0 : index
    %384 = vector.load %arg33[%c0_137, %c0_138, %c0_139] : memref<1x8x32xf32, #tpu.memory_space<vmem>>, vector<1x8x32xf32>
    %385 = vector.shape_cast %384 : vector<1x8x32xf32> to vector<8x32xf32>
    %386 = vector.shape_cast %383 : vector<8x32xf32> to vector<1x8x32xf32>
    tpu.vector_store %arg33[%c0_137, %c0_138, %c0_139], %386 {strides = array<i32>} : memref<1x8x32xf32, #tpu.memory_space<vmem>>, vector<1x8x32xf32>,
    return
  }
  func.func @transform_0(%arg0: i32, %arg1: memref<2xi32, #tpu.memory_space<smem>>) -> (i32, i32, i32) {
    %c0_i32 = arith.constant 0 : i32
    %c0_i32_0 = arith.constant 0 : i32
    %c0_i32_1 = arith.constant 0 : i32
    return %arg0, %c0_i32, %c0_i32_0 : i32, i32, i32
  }
  func.func @transform_1(%arg0: i32, %arg1: memref<2xi32, #tpu.memory_space<smem>>) -> (i32, i32) {
    %c0_i32 = arith.constant 0 : i32
    %c0_i32_0 = arith.constant 0 : i32
    %c0_i32_1 = arith.constant 0 : i32
    return %c0_i32, %c0_i32_0 : i32, i32
  }
  func.func @transform_2(%arg0: i32, %arg1: memref<2xi32, #tpu.memory_space<smem>>) -> (i32, i32) {
    %c0_i32 = arith.constant 0 : i32
    %c0_i32_0 = arith.constant 0 : i32
    %c0_i32_1 = arith.constant 0 : i32
    return %c0_i32, %c0_i32_0 : i32, i32
  }
  func.func @transform_3(%arg0: i32, %arg1: memref<2xi32, #tpu.memory_space<smem>>) -> (i32, i32) {
    %c0_i32 = arith.constant 0 : i32
    %c0_i32_0 = arith.constant 0 : i32
    %c0_i32_1 = arith.constant 0 : i32
    return %c0_i32, %c0_i32_0 : i32, i32
  }
  func.func @transform_4(%arg0: i32, %arg1: memref<2xi32, #tpu.memory_space<smem>>) -> (i32, i32) {
    %c0_i32 = arith.constant 0 : i32
    %c0_i32_0 = arith.constant 0 : i32
    %c0_i32_1 = arith.constant 0 : i32
    return %c0_i32, %c0_i32_0 : i32, i32
  }
  func.func @transform_5(%arg0: i32, %arg1: memref<2xi32, #tpu.memory_space<smem>>) -> (i32, i32) {
    %c0_i32 = arith.constant 0 : i32
    %c0_i32_0 = arith.constant 0 : i32
    %c0_i32_1 = arith.constant 0 : i32
    return %c0_i32, %c0_i32_0 : i32, i32
  }
  func.func @transform_6(%arg0: i32, %arg1: memref<2xi32, #tpu.memory_space<smem>>) -> (i32, i32) {
    %c0_i32 = arith.constant 0 : i32
    %c0_i32_0 = arith.constant 0 : i32
    %c0_i32_1 = arith.constant 0 : i32
    return %c0_i32, %c0_i32_0 : i32, i32
  }
  func.func @transform_7(%arg0: i32, %arg1: memref<2xi32, #tpu.memory_space<smem>>) -> (i32, i32) {
    %c0_i32 = arith.constant 0 : i32
    %c0_i32_0 = arith.constant 0 : i32
    %c0_i32_1 = arith.constant 0 : i32
    return %c0_i32, %c0_i32_0 : i32, i32
  }
  func.func @transform_8(%arg0: i32, %arg1: memref<2xi32, #tpu.memory_space<smem>>) -> (i32, i32) {
    %c0_i32 = arith.constant 0 : i32
    %c0_i32_0 = arith.constant 0 : i32
    %c0_i32_1 = arith.constant 0 : i32
    return %c0_i32, %c0_i32_0 : i32, i32
  }
  func.func @transform_9(%arg0: i32, %arg1: memref<2xi32, #tpu.memory_space<smem>>) -> (i32, i32) {
    %c0_i32 = arith.constant 0 : i32
    %c0_i32_0 = arith.constant 0 : i32
    %c0_i32_1 = arith.constant 0 : i32
    return %c0_i32, %c0_i32_0 : i32, i32
  }
  func.func @transform_10(%arg0: i32, %arg1: memref<2xi32, #tpu.memory_space<smem>>) -> (i32, i32) {
    %c0_i32 = arith.constant 0 : i32
    %c0_i32_0 = arith.constant 0 : i32
    %c0_i32_1 = arith.constant 0 : i32
    return %c0_i32, %c0_i32_0 : i32, i32
  }
  func.func @transform_11(%arg0: i32, %arg1: memref<2xi32, #tpu.memory_space<smem>>) -> (i32, i32) {
    %c0_i32 = arith.constant 0 : i32
    %c0_i32_0 = arith.constant 0 : i32
    %c0_i32_1 = arith.constant 0 : i32
    return %c0_i32, %c0_i32_0 : i32, i32
  }
  func.func @transform_12(%arg0: i32, %arg1: memref<2xi32, #tpu.memory_space<smem>>) -> (i32, i32) {
    %c0_i32 = arith.constant 0 : i32
    %c0_i32_0 = arith.constant 0 : i32
    %c0_i32_1 = arith.constant 0 : i32
    return %c0_i32, %c0_i32_0 : i32, i32
  }
  func.func @transform_13(%arg0: i32, %arg1: memref<2xi32, #tpu.memory_space<smem>>) -> (i32, i32) {
    %c0_i32 = arith.constant 0 : i32
    %c0_i32_0 = arith.constant 0 : i32
    %c0_i32_1 = arith.constant 0 : i32
    return %c0_i32, %c0_i32_0 : i32, i32
  }
  func.func @transform_14(%arg0: i32, %arg1: memref<2xi32, #tpu.memory_space<smem>>) -> (i32, i32) {
    %c0_i32 = arith.constant 0 : i32
    %c0_i32_0 = arith.constant 0 : i32
    %c0_i32_1 = arith.constant 0 : i32
    return %c0_i32, %c0_i32_0 : i32, i32
  }
  func.func @transform_15(%arg0: i32, %arg1: memref<2xi32, #tpu.memory_space<smem>>) -> (i32, i32) {
    %c0_i32 = arith.constant 0 : i32
    %c0_i32_0 = arith.constant 0 : i32
    %c0_i32_1 = arith.constant 0 : i32
    return %c0_i32, %c0_i32_0 : i32, i32
  }
  func.func @transform_16(%arg0: i32, %arg1: memref<2xi32, #tpu.memory_space<smem>>) -> (i32, i32) {
    %c0_i32 = arith.constant 0 : i32
    %c0_i32_0 = arith.constant 0 : i32
    %c0_i32_1 = arith.constant 0 : i32
    return %c0_i32, %c0_i32_0 : i32, i32
  }
  func.func @transform_17(%arg0: i32, %arg1: memref<2xi32, #tpu.memory_space<smem>>) -> (i32, i32) {
    %c0_i32 = arith.constant 0 : i32
    %c0_i32_0 = arith.constant 0 : i32
    %c0_i32_1 = arith.constant 0 : i32
    return %c0_i32, %c0_i32_0 : i32, i32
  }
  func.func @transform_18(%arg0: i32, %arg1: memref<2xi32, #tpu.memory_space<smem>>) -> (i32, i32) {
    %c0_i32 = arith.constant 0 : i32
    %c0_i32_0 = arith.constant 0 : i32
    %c0_i32_1 = arith.constant 0 : i32
    return %c0_i32, %c0_i32_0 : i32, i32
  }
  func.func @transform_19(%arg0: i32, %arg1: memref<2xi32, #tpu.memory_space<smem>>) -> (i32, i32) {
    %c0_i32 = arith.constant 0 : i32
    %c0_i32_0 = arith.constant 0 : i32
    %c0_i32_1 = arith.constant 0 : i32
    return %c0_i32, %c0_i32_0 : i32, i32
  }
  func.func @transform_20(%arg0: i32, %arg1: memref<2xi32, #tpu.memory_space<smem>>) -> (i32, i32) {
    %c0_i32 = arith.constant 0 : i32
    %c0_i32_0 = arith.constant 0 : i32
    %c0_i32_1 = arith.constant 0 : i32
    return %c0_i32, %c0_i32_0 : i32, i32
  }
  func.func @transform_21(%arg0: i32, %arg1: memref<2xi32, #tpu.memory_space<smem>>) -> (i32, i32) {
    %c0_i32 = arith.constant 0 : i32
    %c0_i32_0 = arith.constant 0 : i32
    %c0_i32_1 = arith.constant 0 : i32
    return %c0_i32, %c0_i32_0 : i32, i32
  }
  func.func @transform_22(%arg0: i32, %arg1: memref<2xi32, #tpu.memory_space<smem>>) -> (i32, i32) {
    %c0_i32 = arith.constant 0 : i32
    %c0_i32_0 = arith.constant 0 : i32
    %c0_i32_1 = arith.constant 0 : i32
    return %c0_i32, %c0_i32_0 : i32, i32
  }
  func.func @transform_23(%arg0: i32, %arg1: memref<2xi32, #tpu.memory_space<smem>>) -> (i32, i32) {
    %c0_i32 = arith.constant 0 : i32
    %c0_i32_0 = arith.constant 0 : i32
    %c0_i32_1 = arith.constant 0 : i32
    return %c0_i32, %c0_i32_0 : i32, i32
  }
  func.func @transform_24(%arg0: i32, %arg1: memref<2xi32, #tpu.memory_space<smem>>) -> (i32, i32) {
    %c0_i32 = arith.constant 0 : i32
    %c0_i32_0 = arith.constant 0 : i32
    %c0_i32_1 = arith.constant 0 : i32
    return %c0_i32, %c0_i32_0 : i32, i32
  }
  func.func @transform_25(%arg0: i32, %arg1: memref<2xi32, #tpu.memory_space<smem>>) -> (i32, i32) {
    %c0_i32 = arith.constant 0 : i32
    %c0_i32_0 = arith.constant 0 : i32
    %c0_i32_1 = arith.constant 0 : i32
    return %c0_i32, %c0_i32_0 : i32, i32
  }
  func.func @transform_26(%arg0: i32, %arg1: memref<2xi32, #tpu.memory_space<smem>>) -> (i32, i32) {
    %c0_i32 = arith.constant 0 : i32
    %c0_i32_0 = arith.constant 0 : i32
    %c0_i32_1 = arith.constant 0 : i32
    return %c0_i32, %c0_i32_0 : i32, i32
  }
  func.func @transform_27(%arg0: i32, %arg1: memref<2xi32, #tpu.memory_space<smem>>) -> (i32, i32) {
    %c0_i32 = arith.constant 0 : i32
    %c0_i32_0 = arith.constant 0 : i32
    %c0_i32_1 = arith.constant 0 : i32
    return %c0_i32, %c0_i32_0 : i32, i32
  }
  func.func @transform_28(%arg0: i32, %arg1: memref<2xi32, #tpu.memory_space<smem>>) -> (i32, i32) {
    %c0_i32 = arith.constant 0 : i32
    %c0_i32_0 = arith.constant 0 : i32
    %c0_i32_1 = arith.constant 0 : i32
    return %c0_i32, %c0_i32_0 : i32, i32
  }
  func.func @transform_29(%arg0: i32, %arg1: memref<2xi32, #tpu.memory_space<smem>>) -> (i32, i32) {
    %c0_i32 = arith.constant 0 : i32
    %c0_i32_0 = arith.constant 0 : i32
    %c0_i32_1 = arith.constant 0 : i32
    return %c0_i32, %c0_i32_0 : i32, i32
  }
  func.func @transform_30(%arg0: i32, %arg1: memref<2xi32, #tpu.memory_space<smem>>) -> (i32, i32) {
    %c0_i32 = arith.constant 0 : i32
    %c0_i32_0 = arith.constant 0 : i32
    %c0_i32_1 = arith.constant 0 : i32
    return %c0_i32, %c0_i32_0 : i32, i32
  }
  func.func @transform_31(%arg0: i32, %arg1: memref<2xi32, #tpu.memory_space<smem>>) -> (i32, i32, i32) {
    %c0_i32 = arith.constant 0 : i32
    %c0_i32_0 = arith.constant 0 : i32
    %c0_i32_1 = arith.constant 0 : i32
    return %arg0, %c0_i32, %c0_i32_0 : i32, i32, i32
  }
}

</mosaic_0001>

<bundles_post_ra>
// kernel: _lambda_.7
= control target key start
LH: loop header
LB: loop body
LE: loop exit
PB: predicated region body
PF: predicated region fallthrough
CT: control target
= control target key end

     0   :  { %v193_v3 = vmov 0.0   ;;  %vm194_vm0 = vmmov 0   ;;  %s264_s0 = inlined_call_operand.vmem [shape: f32[16,32], index: 0, kind: input, shape index: {}]   ;;  %s265_s1 = inlined_call_operand.vmem [shape: f32[32,48], index: 1, kind: input, shape index: {}]   ;;  %s266_s2 = inlined_call_operand.vmem [shape: f32[1,48], index: 2, kind: input, shape index: {}]   ;;  %s267_s3 = inlined_call_operand.vmem [shape: f32[1,48], index: 3, kind: input, shape index: {}]   ;;  %s268_s4 = inlined_call_operand.vmem [shape: f32[1,48], index: 4, kind: input, shape index: {}]   ;;  %s269_s5 = inlined_call_operand.hbm [shape: f32[16,48], index: 5, kind: output, shape index: {}]  }
   0x1   :  { %v26_v0 = vld [vmem:[%s265_s1 + $0x10] sm:$0xff]  ;;  %v27_v1 = vld [vmem:[%s265_s1 + $0x18] sm:$0xff]  ;;  %v24_v2 = vld [vmem:[%s265_s1] sm:$0xff]  ;;  %154 = vmatprep.subr.bf16.mxu0 %v193_v3  ;;  %158 = vmatprep.mubr.msk.bf16.mxu0 %vm194_vm0, %v193_v3 }
   0x2   :  { %v30_v4 = vpack.c.bf16 %v27_v1, %v26_v0  ;;  %v25_v5 = vld [vmem:[%s265_s1 + $0x8] sm:$0xff] }
   0x3   :  { %10 = vsyncpa [#allocation3], 0  ;;  %v29_v6 = vpack.c.bf16 %v25_v5, %v24_v2  ;;  %v22_v7 = vld [vmem:[%s264_s0] sm:$0xff]  ;;  %v23_v8 = vld [vmem:[%s264_s0 + $0x8] sm:$0xff]  ;;  %vm38_vm1 = vcmask 261120   ;;  %vm85_vm2 = vcmask 392192  }
   0x4   :  { %155 = vmatpush3.bf16.msra.mxu0 %v30_v4  ;;  %v28_v9 = vpack.c.bf16 %v23_v8, %v22_v7  ;;  %v147_v10 = vld [vmem:[%s266_s2] ss:$0 sm:$0xff]  ;;  %s195_s8 = smov [#allocation2]  }
   0x5   :  { %156 = vmatprep.subr.bf16.mxu0 %v193_v3  ;;  %v149_v36 = vld [vmem:[%s267_s3] ss:$0 sm:$0xff]  ;;  %s136_s9 = sshll.u32 %s195_s8, 4  ;;  %s137_s9 = int_to_ptr.vmem [resolvable:$true] %s136_s9 }
   0x6   :  { %v150_v38 = vld [vmem:[%s268_s4] ss:$0 sm:$0xff]  ;;  %s171_s10 = scalar_lea.vmem %s137_s9, 256  ;;  %p176_p1 = scmp.lt.s32.totalorder %s137_s9, %s137_s9 }
   0x7   :  { %p172_p0 = scmp.ne.s32.totalorder %s137_s9, %s171_s10  ;;  %p177_p2 = scmp.lt.s32.totalorder %s171_s10, %s171_s10 }
   0x8   :  { %157 = vmatpush3.bf16.msra.mxu0 %v29_v6 }
   0x9   :  { %p178_p3 = por %p177_p2, %p176_p1 }
   0xb   :  { %159 = vmatmul.mubr.msk.bf16.vlgmr.msra.gmra.mxu0 %vm38_vm1, %v28_v9  ;;  %p179_p4 = pnand %p178_p3, %p172_p0 }
  0xcb   :  { %v76_v11 = vpop.f32.mrf.mxu0 }
  0xcc   :  { %v77_v12 = vadd.f32 %v147_v10, %v76_v11 }
  0xcd   :  { %v160_v13 = vpop.f32.mrf.mxu0 }
  0xce   :  { %v86_v14 = vsel %vm85_vm2, %v77_v12, 0.0 }
  0xcf   :  { %87 = vadd.xlane.f32.xlu0 %v86_v14  ;;  %v79_v15 = vpop.f32.mrf.mxu0 }
  0xd0   :  { %v80_v16 = vadd.f32 %v147_v10, %v79_v15 }
  0xd1   :  { %v161_v17 = vpop.f32.mrf.mxu0 }
  0xd2   :  { %v89_v18 = vsel %vm85_vm2, %v80_v16, 0.0 }
  0xd3   :  { %90 = vadd.xlane.f32.xlu0 %v89_v18 }
 0x158   :  { %v88_v19 = vpop.xlane.xlu0 %87 }
 0x159   :  { %v93_v20 = vmul.f32 0.020833334, %v88_v19 }
 0x15b   :  { %v95_v21 = vsub.f32 %v77_v12, %v93_v20 }
 0x15c   :  { %v91_v22 = vpop.xlane.xlu0 %90 }
 0x15d   :  { %v94_v23 = vmul.f32 0.020833334, %v91_v22  ;;  %v97_v24 = vmul.f32 %v95_v21, %v95_v21 }
 0x15f   :  { %v96_v25 = vsub.f32 %v80_v16, %v94_v23  ;;  %v99_v26 = vsel %vm85_vm2, %v97_v24, 0.0 }
 0x160   :  { %100 = vadd.xlane.f32.xlu1 %v99_v26 }
 0x161   :  { %v98_v27 = vmul.f32 %v96_v25, %v96_v25 }
 0x163   :  { %v102_v28 = vsel %vm85_vm2, %v98_v27, 0.0 }
 0x164   :  { %103 = vadd.xlane.f32.xlu1 %v102_v28 }
 0x1e9   :  { %v101_v29 = vpop.xlane.xlu1 %100 }
 0x1ea   :  { %v105_v30 = vmul.f32 0.020833334, %v101_v29 }
 0x1ec   :  { %v107_v31 = vadd.f32 1e-05, %v105_v30 }
 0x1ed   :  { %v104_v32 = vpop.xlane.xlu1 %103 }
 0x1ee   :  { %167 = vrsqrt.f32 %v107_v31  ;;  %v106_v33 = vmul.f32 0.020833334, %v104_v32 }
 0x1f0   :  { %v108_v34 = vadd.f32 1e-05, %v106_v33 }
 0x1f2   :  { %169 = vrsqrt.f32 %v108_v34 }
 0x1fb   :  { %v168_v35 = vpop.eup %167 }
 0x1fc   :  { %v111_v37 = vmul.f32 %v168_v35, %v95_v21 }
 0x1fe   :  { %v119_v39 = vmul.f32 %v149_v36, %v111_v37 }
 0x1ff   :  { %v170_v40 = vpop.eup %169 }
 0x200   :  { %v112_v41 = vmul.f32 %v170_v40, %v96_v25  ;;  %v127_v42 = vadd.f32 %v150_v38, %v119_v39 }
 0x202   :  { %v120_v43 = vmul.f32 %v149_v36, %v112_v41  ;;  %129 = vst.msk [vmem:[#allocation2] sm:$0xff] %vm85_vm2, %v127_v42 }
 0x204   :  { %v128_v44 = vadd.f32 %v150_v38, %v120_v43 }
 0x206   :  { %130 = vst.msk [vmem:[#allocation2 + $0x8] sm:$0xff] %vm85_vm2, %v128_v44 }
 0x207   :  { %182 = shalt.err (!%p179_p4)
}
 0x208   :  { %s196_s3 = smov 128   ;;  %s197_s4 = smov 8  }
 0x209   :  { %142 = dma.vmem_to_hbm [thread:$0]  %s137_s9, 256, %s269_s5, [#allocation3], %s196_s3, %s196_s3, %s197_s4  }
 0x20a   :  { %191 = dma.done.wait [#allocation3], 256  }
 0x20b   :  { %192 = vsyncadd [#allocation3], 4294967040 }
 0x20c   :  { %146 = vsyncpa [#allocation3], 1 }

// kernel: _lambda_.4
= control target key start
LH: loop header
LB: loop body
LE: loop exit
PB: predicated region body
PF: predicated region fallthrough
CT: control target
= control target key end

     0   :  { %vm19_vm0 = vcmask 261120   ;;  %v112_v0 = vmov 0.0   ;;  %vm113_vm1 = vmmov 0   ;;  %vm30_vm2 = vcmask 130048   ;;  %s161_s1 = inlined_call_operand.vmem [shape: f32[16,32], index: 1, kind: input, shape index: {}]   ;;  %s162_s0 = inlined_call_operand.vmem [shape: f32[16,16], index: 0, kind: input, shape index: {}]   ;;  %s163_s2 = inlined_call_operand.vmem [shape: f32[1,32], index: 2, kind: input, shape index: {}]   ;;  %s164_s3 = inlined_call_operand.vmem [shape: f32[16,32], index: 3, kind: output, shape index: {}]  }
   0x1   :  { %20 = vst.msk [vmem:[#allocation2] sm:$0xff] %vm19_vm0, %v112_v0  ;;  %21 = vst.msk [vmem:[#allocation2 + $0x8] sm:$0xff] %vm19_vm0, %v112_v0  ;;  %104 = vmatprep.subr.bf16.mxu0 %v112_v0  ;;  %v26_v1 = vld [vmem:[%s161_s1] sm:$0xff]  ;;  %v27_v2 = vld [vmem:[%s161_s1 + $0x8] sm:$0xff]  ;;  %106 = vmatprep.mubr.msk.bf16.mxu0 %vm113_vm1, %v112_v0 }
   0x2   :  { %v24_v3 = vld [vmem:[%s162_s0] sm:$0xff]  ;;  %v29_v4 = vpack.c.bf16 %v27_v2, %v26_v1  ;;  %v25_v5 = vld [vmem:[%s162_s0 + $0x8] sm:$0xff] }
   0x3   :  { %v28_v6 = vpack.c.bf16 %v25_v5, %v24_v3  ;;  %v101_v15 = vld [vmem:[%s163_s2] ss:$0 sm:$0xff] }
   0x4   :  { %105 = vmatpush3.bf16.msra.mxu0 %v29_v4 }
   0x7   :  { %107 = vmatmul.mubr.msk.bf16.vlgmr.msra.gmra.mxu0 %vm30_vm2, %v28_v6 }
   0x8   :  { %v22_v7 = vld [vmem:[#allocation2] sm:$0xff]  ;;  %v23_v11 = vld [vmem:[#allocation2 + $0x8] sm:$0xff] }
  0xc7   :  { %v68_v8 = vpop.f32.mrf.mxu0 }
  0xc8   :  { %v75_v9 = vadd.f32 %v68_v8, %v22_v7 }
  0xc9   :  { %v108_v10 = vpop.f32.mrf.mxu0 }
  0xca   :  { %78 = vst.msk [vmem:[#allocation2] sm:$0xff] %vm19_vm0, %v75_v9 }
  0xcb   :  { %v71_v12 = vpop.f32.mrf.mxu0 }
  0xcc   :  { %v76_v13 = vadd.f32 %v71_v12, %v23_v11 }
  0xcd   :  { %v109_v14 = vpop.f32.mrf.mxu0 }
  0xce   :  { %79 = vst.msk [vmem:[#allocation2 + $0x8] sm:$0xff] %vm19_vm0, %v76_v13 }
  0xd1   :  { %v83_v16 = vld [vmem:[#allocation2] sm:$0xff] }
  0xd2   :  { %v92_v17 = vadd.f32 %v101_v15, %v83_v16 }
  0xd4   :  { %94 = vst.msk [vmem:[%s164_s3] sm:$0xff] %vm19_vm0, %v92_v17 }
  0xd5   :  { %v84_v18 = vld [vmem:[#allocation2 + $0x8] sm:$0xff] }
  0xd6   :  { %v93_v19 = vadd.f32 %v101_v15, %v84_v18 }
  0xd8   :  { %95 = vst.msk [vmem:[%s164_s3 + $0x8] sm:$0xff] %vm19_vm0, %v93_v19 }

// kernel: _lambda_.6
= control target key start
LH: loop header
LB: loop body
LE: loop exit
PB: predicated region body
PF: predicated region fallthrough
CT: control target
= control target key end

     0   :  { %s2593_s6 = smov 1   ;;  %s2594_s10 = smov 2   ;;  %s3061_s0 = inlined_call_operand.smem [shape: u32[33], index: -1, kind: input, shape index: {}] }
   0x1   :  { %s2650_s5 = sld [smem:[%s3061_s0]]   ;;  %s2595_s14 = smov 3  }
   0x2   :  { %s2655_s9 = sld [smem:[%s3061_s0 + %s2593_s6]]   ;;  %s2596_s18 = smov 4  }
   0x3   :  { %s2660_s13 = sld [smem:[%s3061_s0 + %s2594_s10]]   ;;  %s2597_s22 = smov 5  }
   0x4   :  { %s2665_s17 = sld [smem:[%s3061_s0 + %s2595_s14]]   ;;  %s2598_s26 = smov 6  }
   0x5   :  { %s2670_s21 = sld [smem:[%s3061_s0 + %s2596_s18]]   ;;  %s2599_s30 = smov 7  }
   0x6   :  { %s2675_s25 = sld [smem:[%s3061_s0 + %s2597_s22]]   ;;  %s2600_s4 = smov 8  }
   0x7   :  { %s2680_s29 = sld [smem:[%s3061_s0 + %s2598_s26]]   ;;  %s2601_s10 = smov 9  }
   0x8   :  { %s2685_s3 = sld [smem:[%s3061_s0 + %s2599_s30]]   ;;  %s2602_s15 = smov 10  }
   0x9   :  { %s2690_s8 = sld [smem:[%s3061_s0 + %s2600_s4]]   ;;  %s2603_s20 = smov 11  }
   0xa   :  { %s2695_s14 = sld [smem:[%s3061_s0 + %s2601_s10]]   ;;  %s2604_s26 = smov 12  }
   0xb   :  { %s2700_s19 = sld [smem:[%s3061_s0 + %s2602_s15]]   ;;  %s2605_s1 = smov 13  }
   0xc   :  { %s2705_s24 = sld [smem:[%s3061_s0 + %s2603_s20]]   ;;  %s2606_s7 = smov 14  }
   0xd   :  { %s2710_s30 = sld [smem:[%s3061_s0 + %s2604_s26]]   ;;  %s2607_s15 = smov 15  }
   0xe   :  { %s2715_s6 = sld [smem:[%s3061_s0 + %s2605_s1]]   ;;  %s2608_s22 = smov 16  }
   0xf   :  { %s2720_s12 = sld [smem:[%s3061_s0 + %s2606_s7]]   ;;  %s2609_s28 = smov 17  }
  0x10   :  { %s2725_s20 = sld [smem:[%s3061_s0 + %s2607_s15]]   ;;  %s2610_s7 = smov 18  }
  0x11   :  { %s2730_s27 = sld [smem:[%s3061_s0 + %s2608_s22]]   ;;  %s2611_s15 = smov 19  }
  0x12   :  { %s2735_s4 = sld [smem:[%s3061_s0 + %s2609_s28]]   ;;  %s2612_s22 = smov 20  }
  0x13   :  { %s2613_s28 = smov 21  }
  0x15   :  { %3066 = sst [smem:[#allocation6_spill]] %s2720_s12 }
  0x16   :  { %3067 = sst [smem:[#allocation7_spill]] %s2725_s20 }
  0x17   :  { %3068 = sst [smem:[#allocation8_spill]] %s2730_s27 }
  0x18   :  { %3069 = sst [smem:[#allocation9_spill]] %s2735_s4 }
  0x19   :  { %s2740_s12 = sld [smem:[%s3061_s0 + %s2610_s7]]   ;;  %s2614_s7 = smov 22  }
  0x1a   :  { %s2745_s20 = sld [smem:[%s3061_s0 + %s2611_s15]]   ;;  %s2615_s15 = smov 23  }
  0x1b   :  { %s2750_s27 = sld [smem:[%s3061_s0 + %s2612_s22]]   ;;  %s2616_s22 = smov 24  }
  0x1c   :  { %s2755_s4 = sld [smem:[%s3061_s0 + %s2613_s28]]   ;;  %s2617_s28 = smov 25  }
  0x1d   :  { %s2765_s23 = sld [smem:[%s3061_s0 + %s2615_s15]]   ;;  %s2619_s15 = smov 27  }
  0x1e   :  { %s2770_s1 = sld [smem:[%s3061_s0 + %s2616_s22]]  }
  0x1f   :  { %3070 = sst [smem:[#allocation10_spill]] %s2740_s12 }
  0x20   :  { %3071 = sst [smem:[#allocation11_spill]] %s2745_s20  ;;  %s2622_s20 = smov 30  }
  0x21   :  { %3072 = sst [smem:[#allocation12_spill]] %s2750_s27  ;;  %s2620_s27 = smov 28  }
  0x22   :  { %3073 = sst [smem:[#allocation13_spill]] %s2755_s4  ;;  %s2621_s4 = smov 29  }
  0x23   :  { %s2760_s12 = sld [smem:[%s3061_s0 + %s2614_s7]]   ;;  %s2618_s7 = smov 26  }
  0x24   :  { %3075 = sst [smem:[#allocation15_spill]] %s2765_s23  ;;  %s70_s23 = sshll.u32 %s2650_s5, 4  ;;  %s71_s23 = int_to_ptr.vmem [resolvable:$true] %s70_s23 }
  0x25   :  { %3076 = sst [smem:[#allocation16_spill]] %s2770_s1  ;;  %p2576_p1 = scmp.lt.s32.totalorder %s71_s23, %s71_s23 }
  0x26   :  { %s2775_s10 = sld [smem:[%s3061_s0 + %s2617_s28]]   ;;  %s2571_s28 = scalar_lea.vmem %s71_s23, 16 }
  0x27   :  { %s2780_s16 = sld [smem:[%s3061_s0 + %s2618_s7]]   ;;  %p2572_p0 = scmp.ne.s32.totalorder %s71_s23, %s2571_s28 }
  0x28   :  { %s2790_s1 = sld [smem:[%s3061_s0 + %s2620_s27]]   ;;  %s2624_s27 = smov 32  }
  0x29   :  { %3074 = sst [smem:[#allocation14_spill]] %s2760_s12  ;;  %p2577_p2 = scmp.lt.s32.totalorder %s2571_s28, %s2571_s28 }
  0x2a   :  { %s2785_s12 = sld [smem:[%s3061_s0 + %s2619_s15]]   ;;  %s2623_s15 = smov 31  }
  0x2b   :  { %s2806_s22 = sld [smem:[%s3061_s0 + %s2623_s15]]   ;;  %p2578_p3 = por %p2577_p2, %p2576_p1 }
  0x2c   :  { %3077 = sst [smem:[#allocation17_spill]] %s2775_s10 }
  0x2d   :  { %3078 = sst [smem:[#allocation18_spill]] %s2780_s16  ;;  %p2579_p4 = pnand %p2578_p3, %p2572_p0 }
  0x2e   :  { %3080 = sst [smem:[#allocation20_spill]] %s2790_s1 }
  0x2f   :  { %s2795_s10 = sld [smem:[%s3061_s0 + %s2621_s4]]  }
  0x30   :  { %3079 = sst [smem:[#allocation19_spill]] %s2785_s12 }
  0x31   :  { %s2800_s16 = sld [smem:[%s3061_s0 + %s2622_s20]]  }
  0x32   :  { %s2811_s4 = sld [smem:[%s3061_s0 + %s2624_s27]]  }
  0x33   :  { %2582 = shalt.err (!%p2579_p4)  }
  0x34   :  { %s2625_s5 = smov [#allocation4]  }
  0x35   :  { %73 = dma.vmem_to_smem %s71_s23, 16, %s2625_s5, [#allocation3] }
  0x36   :  { %2587 = dma.done.wait [#allocation3], 16 }
  0x37   :  { %2588 = vsyncadd [#allocation3], 4294967280 }
  0x38   :  { %75 = sfence }
  0x39   :  { %s2813_s12 = smov 0  }
  0x3a LB: > { %s2819_s0 = sadd.s32 4294967295, %s2591_s12   ;;  %p2262_p5 = scmp.ge.s32.totalorder %s2591_s12, 1  ;;  %s2591_s12 = sphi %s2813_s12, %s81_s12  }
  0x3b   : > { %p876_p6 = scmp.lt.s32.totalorder %s2591_s12, 3 }
  0x3d   : > { %p877_p7 = pnand %p2262_p5, %p876_p6 }
  0x3e   : > { %p954_p8 = scmp.lt.s32.totalorder (!%p877_p7), %s2819_s0, 1  ;;  %s2628_s7 = smov (!%p877_p7), 88  }
  0x3f   : > { %880 = sbr.rel (%p877_p7) target bundleno = 4487 (0x1187), region = 144  ;;  %s2629_s11 = smov (!%p877_p7), 96  }
  0x40   : > { %s2630_s23 = smov (!%p877_p7), 120   ;;  %s2631_s15 = smov (!%p877_p7), 112  }
  0x41   : > { %s2632_s18 = smov (!%p877_p7), 80   ;;  %s2633_s27 = smov (!%p877_p7), 104  }
  0x42   : > { %s2634_s26 = smov (!%p877_p7), 72   ;;  %s1211_s28 = sld [smem:[#allocation4 + %s2819_s0]] (!%p877_p7) }
  0x43   : > { %s2635_s5 = smov (!%p877_p7), 64  }
  0x44   : > { %s2825_s1 = scalar_select %p954_p8, %s2819_s0, 1  ;;  %vm980_vm0 = vcmask 261120   ;;  %v968_v7 = vld [vmem:[%s2670_s21 + $0x10] sm:$0xff]  ;;  %v969_v8 = vld [vmem:[%s2670_s21 + $0x18] sm:$0xff]  ;;  %v966_v9 = vld [vmem:[%s2670_s21] sm:$0xff]  ;;  %v2626_v10 = vmov 0.0  }
  0x45   : > { %2352 = vmatprep.subr.bf16.mxu1 %v2626_v10  ;;  %1841 = vst.msk [vmem:[#allocation2] sm:$0xff] %vm980_vm0, %v2626_v10  ;;  %1842 = vst.msk [vmem:[#allocation2 + $0x8] sm:$0xff] %vm980_vm0, %v2626_v10  ;;  %v1011_v11 = vpack.c.bf16 %v969_v8, %v968_v7  ;;  %v967_v12 = vld [vmem:[%s2670_s21 + $0x8] sm:$0xff]  ;;  %vm2627_vm1 = vmmov 0   ;;  %2372 = vmatprep.subr.bf16.mxu0 %v2626_v10  ;;  %v2265_v18 = vld [vmem:[%s2660_s13] ss:$0 sm:$0xff] }
  0x46   : > { %s2263_s2 = sshll.u32 %s2825_s1, 3  ;;  %1843 = vst.msk [vmem:[#allocation2 + $0x10] sm:$0xff] %vm980_vm0, %v2626_v10  ;;  %2356 = vmatprep.mubr.msk.bf16.mxu1 %vm2627_vm1, %v2626_v10  ;;  %2376 = vmatprep.mubr.msk.bf16.mxu0 %vm2627_vm1, %v2626_v10  ;;  %v1010_v13 = vpack.c.bf16 %v967_v12, %v966_v9  ;;  %v2266_v20 = vld [vmem:[%s2665_s17] ss:$0 sm:$0xff]  ;;  %v977_v24 = vld [vmem:[%s2680_s29 + $0x30] sm:$0xff]  ;;  %v978_v25 = vld [vmem:[%s2680_s29 + $0x38] sm:$0xff] }
  0x47   : > { %s957_s20 = scalar_lea.vmem %s2655_s9, %s2263_s2  ;;  %2353 = vmatpush3.bf16.msra.mxu1 %v1011_v11  ;;  %v1072_v26 = vpack.c.bf16 %v978_v25, %v977_v24  ;;  %v975_v27 = vld [vmem:[%s2680_s29 + $0x20] sm:$0xff]  ;;  %v976_v28 = vld [vmem:[%s2680_s29 + $0x28] sm:$0xff]  ;;  %v973_v30 = vld [vmem:[%s2680_s29 + $0x10] sm:$0xff]  ;;  %vm1079_vm2 = vcmask 523264   ;;  %vm1220_vm3 = vcmask 64512   ;;  %s2636_s0 = smov 56  }
  0x48   : > { %v2831_v0 = vld [vmem:[%s957_s20] sm:$0xff]  ;;  %2354 = vmatprep.subr.bf16.mxu1 %v2626_v10  ;;  %v1071_v29 = vpack.c.bf16 %v976_v28, %v975_v27  ;;  %v974_v31 = vld [vmem:[%s2680_s29 + $0x18] sm:$0xff]  ;;  %v972_v34 = vld [vmem:[%s2680_s29 + $0x8] sm:$0xff]  ;;  %s2637_s20 = smov 48   ;;  %vm1288_vm5 = vcmask 1043456   ;;  %vm1681_vm6 = vcmask 130048  }
  0x49   : > { %v981_v1 = vsel %vm980_vm0, %v2831_v0, 0.0  ;;  %v1070_v32 = vpack.c.bf16 %v974_v31, %v973_v30  ;;  %v971_v33 = vld [vmem:[%s2680_s29] sm:$0xff]  ;;  %v1156_v62 = vld [vmem:[%s2700_s19 + $0x10] sm:$0xff]  ;;  %v1157_v63 = vld [vmem:[%s2700_s19 + $0x18] sm:$0xff]  ;;  %vm1683_vm7 = vcmask 195584  }
  0x4a   : > { %982 = vadd.xlane.f32.xlu0 %v981_v1  ;;  %v1069_v35 = vpack.c.bf16 %v972_v34, %v971_v33  ;;  %v2267_v36 = vld [vmem:[%s2675_s25] ss:$0 sm:$0xff]  ;;  %v1212_v33 = vlaneseq }
  0x4b   : > { %2355 = vmatpush3.bf16.msra.mxu1 %v1010_v13  ;;  %v2270_v48 = vld [vmem:[%s2685_s3] ss:$0 sm:$0xff] }
  0x4c   : > { %2360 = vmatprep.subr.bf16.mxu1 %v2626_v10  ;;  %v1154_v1 = vld [vmem:[%s2700_s19] sm:$0xff]  ;;  %v1213_v34 = vand.u32 127, %v1212_v33 }
  0x4d   : > { %v2272_v8 = vld [vmem:[%s2690_s8] ss:$0 sm:$0xff] }
  0x4e   : > { %v2273_v11 = vld [vmem:[%s2695_s14] ss:$0 sm:$0xff] }
  0xd3   : > { %v983_v2 = vpop.xlane.xlu0 %982 }
  0xd4   : > { %v985_v3 = vmul.f32 0.03125, %v983_v2  ;;  %v1155_v2 = vld [vmem:[%s2700_s19 + $0x8] sm:$0xff] }
  0xd6   : > { %v986_v4 = vsub.f32 %v2831_v0, %v985_v3  ;;  %v1159_v3 = vpack.c.bf16 %v1155_v2, %v1154_v1 }
  0xd8   : > { %v987_v5 = vmul.f32 %v986_v4, %v986_v4 }
  0xda   : > { %v988_v6 = vsel %vm980_vm0, %v987_v5, 0.0 }
  0xdb   : > { %989 = vadd.xlane.f32.xlu0 %v988_v6 }
 0x164   : > { %v990_v14 = vpop.xlane.xlu0 %989 }
 0x165   : > { %v991_v15 = vmul.f32 0.03125, %v990_v14 }
 0x167   : > { %v992_v16 = vadd.f32 1e-05, %v991_v15  ;;  %v2274_v15 = vld [vmem:[%s2705_s24] ss:$0 sm:$0xff] }
 0x169   : > { %2529 = vrsqrt.f32 %v992_v16 }
 0x176   : > { %v2530_v17 = vpop.eup %2529 }
 0x177   : > { %v994_v19 = vmul.f32 %v2530_v17, %v986_v4 }
 0x179   : > { %v1001_v21 = vmul.f32 %v2265_v18, %v994_v19 }
 0x17b   : > { %v1008_v22 = vadd.f32 %v2266_v20, %v1001_v21 }
 0x17d   : > { %v1009_v23 = vpack.c.bf16 %v1008_v22, %v1008_v22 }
 0x17f   : > { %2357 = vmatmul.mubr.msk.bf16.vlgmr.msra.gmra.mxu1 %vm980_vm0, %v1009_v23 }
 0x180   : > { %2368 = vmatprep.mubr.msk.bf16.mxu1 %vm2627_vm1, %v2626_v10  ;;  %2361 = vmatpush3.bf16.msra.mxu1 %v1072_v26 }
 0x181   : > { %2362 = vmatprep.subr.bf16.mxu1 %v2626_v10 }
 0x184   : > { %2363 = vmatpush3.bf16.msra.mxu1 %v1071_v29 }
 0x185   : > { %2364 = vmatprep.subr.bf16.mxu1 %v2626_v10 }
 0x188   : > { %2365 = vmatpush3.bf16.msra.mxu1 %v1070_v32 }
 0x189   : > { %2366 = vmatprep.subr.bf16.mxu1 %v2626_v10 }
 0x18c   : > { %2367 = vmatpush3.bf16.msra.mxu1 %v1069_v35  ;;  %v1214_v35 = vstv %s1211_s28  ;;  %s3085_s28 = sld [smem:[#allocation7_spill]] }
 0x18d   : > { %2386 = vmatprep.subr.bf16.mxu1 %v2626_v10  ;;  %vm2929_vm4 = vcmp.ge.s32.totalorder %v1213_v34, %v1214_v35 }
 0x23f   : > { %v1055_v37 = vpop.f32.mrf.mxu1 }
 0x240   : > { %v1056_v38 = vadd.f32 %v2267_v36, %v1055_v37 }
 0x241   : > { %v2358_v39 = vpop.f32.mrf.mxu1 }
 0x242   : > { %v2269_v40 = vmul.f32 -1.442695, %v1056_v38 }
 0x243   : > { %v1058_v41 = vpop.f32.mrf.mxu1 }
 0x244   : > { %2531 = vpow2.f32 %v2269_v40 }
 0x245   : > { %v2359_v42 = vpop.f32.mrf.mxu1 }
 0x251   : > { %v2532_v43 = vpop.eup %2531 }
 0x252   : > { %v1064_v44 = vadd.f32 1.0, %v2532_v43 }
 0x254   : > { %2533 = vrcp.f32 %v1064_v44 }
 0x261   : > { %v2534_v45 = vpop.eup %2533 }
 0x262   : > { %v1067_v46 = vmul.f32 %v2534_v45, %v1056_v38 }
 0x264   : > { %v1068_v47 = vpack.c.bf16 %v1067_v46, %v1067_v46 }
 0x266   : > { %2369 = vmatmul.mubr.msk.bf16.vlgmr.msra.gmra.mxu1 %vm1079_vm2, %v1068_v47 }
 0x267   : > { %2388 = vmatprep.mubr.msk.bf16.mxu1 %vm2627_vm1, %v2626_v10 }
 0x326   : > { %v1117_v49 = vpop.f32.mrf.mxu1 }
 0x327   : > { %v1118_v50 = vadd.f32 %v2270_v48, %v1117_v49 }
 0x328   : > { %v2370_v51 = vpop.f32.mrf.mxu1 }
 0x329   : > { %v1123_v52 = vmul.f32 0.5, %v1118_v50 }
 0x32a   : > { %v1120_v53 = vpop.f32.mrf.mxu1 }
 0x32b   : > { %v2878_v54 = vadd.f32 %v1123_v52, %v2831_v0  ;;  %v1160_v0 = vpack.c.bf16 %v1157_v63, %v1156_v62 }
 0x32c   : > { %v2371_v55 = vpop.f32.mrf.mxu1 }
 0x32d   : > { %v1127_v56 = vsel %vm980_vm0, %v2878_v54, 0.0  ;;  %2373 = vmatpush3.bf16.msra.mxu0 %v1160_v0 }
 0x32e   : > { %1128 = vadd.xlane.f32.xlu1 %v1127_v56  ;;  %2374 = vmatprep.subr.bf16.mxu0 %v2626_v10 }
 0x331   : > { %2375 = vmatpush3.bf16.msra.mxu0 %v1159_v3 }
 0x332   : > { %2380 = vmatprep.subr.bf16.mxu0 %v2626_v10 }
 0x3b7   : > { %v1129_v57 = vpop.xlane.xlu1 %1128 }
 0x3b8   : > { %v1130_v58 = vmul.f32 0.03125, %v1129_v57 }
 0x3ba   : > { %v1131_v59 = vsub.f32 %v2878_v54, %v1130_v58 }
 0x3bc   : > { %v1132_v60 = vmul.f32 %v1131_v59, %v1131_v59 }
 0x3be   : > { %v1133_v61 = vsel %vm980_vm0, %v1132_v60, 0.0 }
 0x3bf   : > { %1134 = vadd.xlane.f32.xlu1 %v1133_v61 }
 0x448   : > { %v1135_v4 = vpop.xlane.xlu1 %1134 }
 0x449   : > { %v1136_v5 = vmul.f32 0.03125, %v1135_v4 }
 0x44b   : > { %v1137_v6 = vadd.f32 1e-05, %v1136_v5 }
 0x44d   : > { %2535 = vrsqrt.f32 %v1137_v6 }
 0x45a   : > { %v2536_v7 = vpop.eup %2535 }
 0x45b   : > { %v1139_v9 = vmul.f32 %v2536_v7, %v1131_v59 }
 0x45d   : > { %v1146_v12 = vmul.f32 %v2272_v8, %v1139_v9 }
 0x45f   : > { %v1153_v13 = vadd.f32 %v2273_v11, %v1146_v12 }
 0x461   : > { %v1158_v14 = vpack.c.bf16 %v1153_v13, %v1153_v13 }
 0x463   : > { %2377 = vmatmul.mubr.msk.bf16.vlgmr.msra.gmra.mxu0 %vm980_vm0, %v1158_v14 }
 0x464   : > { %2382 = vmatprep.mubr.msk.bf16.mxu0 %vm2627_vm1, %v2626_v10 }
 0x523   : > { %v1205_v16 = vpop.f32.mrf.mxu0 }
 0x524   : > { %v1206_v17 = vadd.f32 %v2274_v15, %v1205_v16 }
 0x525   : > { %v2378_v18 = vpop.f32.mrf.mxu0 }
 0x526   : > { %v2896_v19 = vpack.c.bf16 %v1206_v17, %v1206_v17 }
 0x527   : > { %v1208_v20 = vpop.f32.mrf.mxu0 }
 0x528   : > { %1334 = vrot.lane.b32.xlu1 %v2896_v19, %s2628_s7  ;;  %1218 = vrot.lane.b32.xlu0 %v2896_v19, %s2629_s11  ;;  %s2638_s7 = smov 40  }
 0x529   : > { %v2379_v21 = vpop.f32.mrf.mxu0 }
 0x52c   : > { %1332 = vrot.lane.b32.xlu1 %v2896_v19, %s2630_s23  ;;  %1444 = vrot.lane.b32.xlu0 %v2896_v19, %s2631_s15  ;;  %s2639_s23 = smov 8   ;;  %s2640_s15 = smov 16  }
 0x530   : > { %1446 = vrot.lane.b32.xlu1 %v2896_v19, %s2632_s18  ;;  %1556 = vrot.lane.b32.xlu0 %v2896_v19, %s2633_s27  ;;  %s2641_s18 = smov 24   ;;  %s3083_s27 = sld [smem:[#allocation8_spill]] }
 0x534   : > { %1558 = vrot.lane.b32.xlu1 %v2896_v19, %s2634_s26  ;;  %s3084_s26 = sld [smem:[#allocation6_spill]] }
 0x59a   : > { %v1219_v22 = vpop.permute.xlu0 %1218  ;;  %v1335_v24 = vpop.permute.xlu1 %1334 }
 0x59b   : > { %v1225_v23 = vsel %vm1220_vm3, %v1219_v22, 0  ;;  %v1340_v26 = vsel %vm1220_vm3, %v1335_v24, 0 }
 0x59c   : > { %2381 = vmatpush3.bf16.xpose.msra.mxu0 %v1225_v23 }
 0x59d   : > { %2392 = vmatprep.subr.bf16.mxu0 %v2626_v10 }
 0x59e   : > { %v1333_v25 = vpop.permute.xlu1 %1332  ;;  %v1445_v30 = vpop.permute.xlu0 %1444 }
 0x5a2   : > { %v1447_v27 = vpop.permute.xlu1 %1446  ;;  %v1557_v32 = vpop.permute.xlu0 %1556 }
 0x5a3   : > { %2383 = vmatmul.mubr.msk.bf16.vlgmr.msra.gmra.mxu0 %vm1220_vm3, %v2896_v19  ;;  %v1452_v28 = vsel %vm1220_vm3, %v1447_v27, 0 }
 0x5a4   : > { %2393 = vmatpush3.bf16.xpose.msra.mxu0 %v1340_v26  ;;  %2394 = vmatprep.mubr.msk.bf16.mxu0 %vm2627_vm1, %v2626_v10 }
 0x5a5   : > { %2404 = vmatprep.subr.bf16.mxu0 %v2626_v10 }
 0x5a6   : > { %v1559_v29 = vpop.permute.xlu1 %1558 }
 0x5a7   : > { %v1564_v31 = vsel %vm1220_vm3, %v1559_v29, 0 }
 0x5ab   : > { %2395 = vmatmul.mubr.msk.bf16.vlgmr.msra.gmra.mxu0 %vm1220_vm3, %v1333_v25 }
 0x5ac   : > { %2405 = vmatpush3.bf16.xpose.msra.mxu0 %v1452_v28  ;;  %2406 = vmatprep.mubr.msk.bf16.mxu0 %vm2627_vm1, %v2626_v10 }
 0x5ad   : > { %2416 = vmatprep.subr.bf16.mxu0 %v2626_v10 }
 0x5b3   : > { %2407 = vmatmul.mubr.msk.bf16.vlgmr.msra.gmra.mxu0 %vm1220_vm3, %v1445_v30 }
 0x5b4   : > { %2417 = vmatpush3.bf16.xpose.msra.mxu0 %v1564_v31  ;;  %2418 = vmatprep.mubr.msk.bf16.mxu0 %vm2627_vm1, %v2626_v10 }
 0x5b5   : > { %2428 = vmatprep.subr.bf16.mxu0 %v2626_v10 }
 0x5bb   : > { %2419 = vmatmul.mubr.msk.bf16.vlgmr.msra.gmra.mxu0 %vm1220_vm3, %v1557_v32 }
 0x5bc   : > { %2432 = vmatprep.mubr.msk.bf16.mxu0 %vm2627_vm1, %v2626_v10 }
 0x663   : > { %v1261_v36 = vpop.f32.mrf.mxu0 }
 0x664   : > { %v1267_v38 = vmul.f32 0.35355338, %v1261_v36 }
 0x665   : > { %v2384_v39 = vpop.f32.mrf.mxu0 }
 0x666   : > { %v1270_v40 = vsel %vm2929_vm4, -1e+09, %v1267_v38 }
 0x667   : > { %v1264_v41 = vpop.f32.mrf.mxu0  ;;  %v1271_v42 = vsel %vm1220_vm3, %v1270_v40, -inf }
 0x668   : > { %1272 = vmax.xlane.f32.xlu1 %v1271_v42 }
 0x669   : > { %v2385_v43 = vpop.f32.mrf.mxu0 }
 0x66b   : > { %v1376_v44 = vpop.f32.mrf.mxu0 }
 0x66c   : > { %v1382_v45 = vmul.f32 0.35355338, %v1376_v44 }
 0x66d   : > { %v2396_v46 = vpop.f32.mrf.mxu0 }
 0x66e   : > { %v1383_v47 = vsel %vm2929_vm4, -1e+09, %v1382_v45 }
 0x66f   : > { %v1379_v48 = vpop.f32.mrf.mxu0  ;;  %v1384_v49 = vsel %vm1220_vm3, %v1383_v47, -inf }
 0x670   : > { %1385 = vmax.xlane.f32.xlu0 %v1384_v49 }
 0x671   : > { %v2397_v50 = vpop.f32.mrf.mxu0 }
 0x673   : > { %v1488_v51 = vpop.f32.mrf.mxu0 }
 0x674   : > { %v1494_v52 = vmul.f32 0.35355338, %v1488_v51 }
 0x675   : > { %v2408_v53 = vpop.f32.mrf.mxu0 }
 0x676   : > { %v1495_v55 = vsel %vm2929_vm4, -1e+09, %v1494_v52 }
 0x677   : > { %v1491_v56 = vpop.f32.mrf.mxu0  ;;  %v1496_v57 = vsel %vm1220_vm3, %v1495_v55, -inf }
 0x678   : > { %1497 = vmax.xlane.f32.xlu0 %v1496_v57  ;;  %v1687_v57 = vld [vmem:[%s2710_s30 + $0x10] sm:$0xff] }
 0x679   : > { %v2409_v58 = vpop.f32.mrf.mxu0 }
 0x67a   : > { %v1688_v58 = vld [vmem:[%s2710_s30 + $0x18] sm:$0xff] }
 0x67b   : > { %v1600_v59 = vpop.f32.mrf.mxu0 }
 0x67c   : > { %v1606_v60 = vmul.f32 0.35355338, %v1600_v59  ;;  %v1691_v59 = vpack.c.bf16 %v1688_v58, %v1687_v57 }
 0x67d   : > { %v2420_v61 = vpop.f32.mrf.mxu0 }
 0x67e   : > { %v1607_v62 = vsel %vm2929_vm4, -1e+09, %v1606_v60  ;;  %2429 = vmatpush3.bf16.msra.mxu0 %v1691_v59  ;;  %v1685_v60 = vld [vmem:[%s2710_s30] sm:$0xff]  ;;  %v1686_v61 = vld [vmem:[%s2710_s30 + $0x8] sm:$0xff] }
 0x67f   : > { %v1603_v63 = vpop.f32.mrf.mxu0  ;;  %v1608_v1 = vsel %vm1220_vm3, %v1607_v62, -inf  ;;  %2430 = vmatprep.subr.bf16.mxu0 %v2626_v10 }
 0x680   : > { %1609 = vmax.xlane.f32.xlu0 %v1608_v1 }
 0x681   : > { %v2421_v0 = vpop.f32.mrf.mxu0 }
 0x6f1   : > { %v1273_v2 = vpop.xlane.xlu1 %1272 }
 0x6f2   : > { %v1274_v3 = vsub.f32 %v1270_v40, %v1273_v2 }
 0x6f4   : > { %v1275_v4 = vmul.f32 1.442695, %v1274_v3 }
 0x6f6   : > { %2537 = vpow2.f32 %v1275_v4 }
 0x6f9   : > { %v1386_v5 = vpop.xlane.xlu0 %1385 }
 0x6fa   : > { %v1387_v6 = vsub.f32 %v1383_v47, %v1386_v5 }
 0x6fc   : > { %v1388_v7 = vmul.f32 1.442695, %v1387_v6 }
 0x6fe   : > { %2539 = vpow2.f32 %v1388_v7 }
 0x701   : > { %v1498_v11 = vpop.xlane.xlu0 %1497 }
 0x702   : > { %v1499_v20 = vsub.f32 %v1495_v55, %v1498_v11 }
 0x703   : > { %v2538_v8 = vpop.eup %2537 }
 0x704   : > { %v1277_v9 = vsel %vm1220_vm3, %v2538_v8, 0.0  ;;  %v1500_v21 = vmul.f32 1.442695, %v1499_v20 }
 0x705   : > { %1278 = vadd.xlane.f32.xlu1 %v1277_v9 }
 0x709   : > { %v1610_v12 = vpop.xlane.xlu0 %1609 }
 0x70a   : > { %v1611_v13 = vsub.f32 %v1607_v62, %v1610_v12  ;;  %v1690_v62 = vpack.c.bf16 %v1686_v61, %v1685_v60  ;;  %v1848_v61 = vshrl.u32 %v1212_v33, 7 }
 0x70b   : > { %v2540_v14 = vpop.eup %2539 }
 0x70c   : > { %v1612_v15 = vmul.f32 1.442695, %v1611_v13  ;;  %v1390_v16 = vsel %vm1220_vm3, %v2540_v14, 0.0  ;;  %2431 = vmatpush3.bf16.msra.mxu0 %v1690_v62  ;;  %v1884_v33 = vsub.s32 5, %v1848_v61 }
 0x70d   : > { %1391 = vadd.xlane.f32.xlu0 %v1390_v16  ;;  %2444 = vmatprep.subr.bf16.mxu0 %v2626_v10  ;;  %v2285_v16 = vld [vmem:[%s2715_s6] ss:$0 sm:$0xff] }
 0x70e   : > { %2541 = vpow2.f32 %v1612_v15 }
 0x70f   : > { %2543 = vpow2.f32 %v1500_v21 }
 0x716   : > { %1283 = vrot.lane.b32.xlu1 %v2896_v19, %s2635_s5  ;;  %s3086_s5 = sld [smem:[#allocation9_spill]] }
 0x71b   : > { %v2542_v17 = vpop.eup %2541 }
 0x71c   : > { %v1614_v18 = vsel %vm1220_vm3, %v2542_v17, 0.0  ;;  %v2544_v22 = vpop.eup %2543 }
 0x71d   : > { %1615 = vadd.xlane.f32.xlu0 %v1614_v18  ;;  %v1502_v23 = vsel %vm1220_vm3, %v2544_v22, 0.0 }
 0x733   : > { %1396 = vrot.lane.b32.xlu0 %v2896_v19, %s2636_s0  ;;  %s3087_s0 = sld [smem:[#allocation14_spill]] }
 0x739   : > { %v1927_v58 = vld [vmem:[%s3087_s0 + $0x8] sm:$0xff] }
 0x73a   : > { %1503 = vadd.xlane.f32.xlu1 %v1502_v23 }
 0x74b   : > { %1508 = vrot.lane.b32.xlu1 %v2896_v19, %s2637_s20  ;;  %s3088_s20 = sld [smem:[#allocation10_spill]] }
 0x74f   : > { %1620 = vrot.lane.b32.xlu1 %v2896_v19, %s2638_s7  ;;  %s3090_s7 = sld [smem:[#allocation12_spill]] }
 0x78e   : > { %v1279_v24 = vpop.xlane.xlu1 %1278 }
 0x78f   : > { %2545 = vrcp.f32 %v1279_v24 }
 0x792   : > { %v1284_v25 = vpop.permute.xlu1 %1283 }
 0x793   : > { %v1290_v26 = vsel %vm1288_vm5, %v1284_v25, 0 }
 0x794   : > { %2387 = vmatpush3.bf16.msra.mxu1 %v1290_v26 }
 0x795   : > { %2398 = vmatprep.subr.bf16.mxu1 %v2626_v10 }
 0x796   : > { %v1392_v27 = vpop.xlane.xlu0 %1391 }
 0x797   : > { %2547 = vrcp.f32 %v1392_v27 }
 0x79c   : > { %v2546_v28 = vpop.eup %2545 }
 0x79d   : > { %v1281_v29 = vmul.f32 %v2546_v28, %v2538_v8 }
 0x79f   : > { %v1282_v30 = vpack.c.bf16 %v1281_v29, %v1281_v29  ;;  %v1776_v29 = vld [vmem:[%s3083_s27 + $0x18] sm:$0xff] }
 0x7a1   : > { %2389 = vmatmul.mubr.msk.bf16.vlgmr.msra.gmra.mxu1 %vm1220_vm3, %v1282_v30 }
 0x7a2   : > { %2400 = vmatprep.mubr.msk.bf16.mxu1 %vm2627_vm1, %v2626_v10 }
 0x7a4   : > { %v2548_v19 = vpop.eup %2547 }
 0x7a5   : > { %v1394_v32 = vmul.f32 %v2548_v19, %v2540_v14  ;;  %v1773_v19 = vld [vmem:[%s3083_s27] sm:$0xff] }
 0x7a6   : > { %v1616_v31 = vpop.xlane.xlu0 %1615 }
 0x7a7   : > { %v1395_v36 = vpack.c.bf16 %v1394_v32, %v1394_v32 }
 0x7aa   : > { %v1397_v34 = vpop.permute.xlu0 %1396 }
 0x7ab   : > { %v1402_v35 = vsel %vm1288_vm5, %v1397_v34, 0 }
 0x7ac   : > { %2399 = vmatpush3.bf16.msra.mxu1 %v1402_v35 }
 0x7ad   : > { %2410 = vmatprep.subr.bf16.mxu1 %v2626_v10 }
 0x7af   : > { %2401 = vmatmul.mubr.msk.bf16.vlgmr.msra.gmra.mxu1 %vm1220_vm3, %v1395_v36 }
 0x7b0   : > { %2412 = vmatprep.mubr.msk.bf16.mxu1 %vm2627_vm1, %v2626_v10 }
 0x7c3   : > { %v1504_v37 = vpop.xlane.xlu1 %1503 }
 0x7c4   : > { %2549 = vrcp.f32 %v1504_v37 }
 0x7c5   : > { %2551 = vrcp.f32 %v1616_v31  ;;  %v1774_v31 = vld [vmem:[%s3083_s27 + $0x8] sm:$0xff] }
 0x7c6   : > { %v1778_v32 = vpack.c.bf16 %v1774_v31, %v1773_v19 }
 0x7c7   : > { %v1509_v38 = vpop.permute.xlu1 %1508 }
 0x7c8   : > { %v1514_v39 = vsel %vm1288_vm5, %v1509_v38, 0  ;;  %v2286_v38 = vld [vmem:[%s3084_s26] ss:$0 sm:$0xff]  ;;  %s3094_s26 = sld [smem:[#allocation16_spill]] }
 0x7c9   : > { %2411 = vmatpush3.bf16.msra.mxu1 %v1514_v39 }
 0x7ca   : > { %2422 = vmatprep.subr.bf16.mxu1 %v2626_v10 }
 0x7cb   : > { %v1621_v42 = vpop.permute.xlu1 %1620 }
 0x7cc   : > { %v1626_v45 = vsel %vm1288_vm5, %v1621_v42, 0 }
 0x7d1   : > { %v2550_v40 = vpop.eup %2549 }
 0x7d2   : > { %v1506_v41 = vmul.f32 %v2550_v40, %v2544_v22  ;;  %v2552_v44 = vpop.eup %2551  ;;  %v2287_v40 = vld [vmem:[%s3085_s28] ss:$0 sm:$0xff]  ;;  %s3095_s28 = sld [smem:[#allocation17_spill]] }
 0x7d3   : > { %v1618_v46 = vmul.f32 %v2552_v44, %v2542_v17  ;;  %v2288_v44 = vld [vmem:[%s3086_s5] ss:$0 sm:$0xff]  ;;  %s3096_s5 = sld [smem:[#allocation20_spill]] }
 0x7d4   : > { %v1507_v43 = vpack.c.bf16 %v1506_v41, %v1506_v41 }
 0x7d5   : > { %v1619_v47 = vpack.c.bf16 %v1618_v46, %v1618_v46 }
 0x7d6   : > { %2413 = vmatmul.mubr.msk.bf16.vlgmr.msra.gmra.mxu1 %vm1220_vm3, %v1507_v43 }
 0x7d7   : > { %2423 = vmatpush3.bf16.msra.mxu1 %v1626_v45  ;;  %2424 = vmatprep.mubr.msk.bf16.mxu1 %vm2627_vm1, %v2626_v10 }
 0x7d8   : > { %2436 = vmatprep.subr.bf16.mxu1 %v2626_v10 }
 0x7de   : > { %2425 = vmatmul.mubr.msk.bf16.vlgmr.msra.gmra.mxu1 %vm1220_vm3, %v1619_v47 }
 0x7df   : > { %2440 = vmatprep.mubr.msk.bf16.mxu1 %vm2627_vm1, %v2626_v10 }
 0x861   : > { %v1326_v48 = vpop.f32.mrf.mxu1 }
 0x863   : > { %v2390_v49 = vpop.f32.mrf.mxu1 }
 0x865   : > { %v1329_v50 = vpop.f32.mrf.mxu1 }
 0x867   : > { %v2391_v51 = vpop.f32.mrf.mxu1 }
 0x86f   : > { %v1438_v52 = vpop.f32.mrf.mxu1 }
 0x870   : > { %1669 = vrot.lane.b32.xlu1 %v1438_v52, %s2639_s23  ;;  %s3091_s23 = sld [smem:[#allocation13_spill]] }
 0x871   : > { %v2402_v53 = vpop.f32.mrf.mxu1 }
 0x872   : > { %v1928_v53 = vld [vmem:[%s3087_s0 + $0x10] sm:$0xff] }
 0x873   : > { %v1441_v55 = vpop.f32.mrf.mxu1 }
 0x874   : > { %v1929_v55 = vld [vmem:[%s3087_s0 + $0x18] sm:$0xff] }
 0x875   : > { %v2403_v56 = vpop.f32.mrf.mxu1  ;;  %v1932_v57 = vpack.c.bf16 %v1929_v55, %v1928_v53 }
 0x876   : > { %v1926_v56 = vld [vmem:[%s3087_s0] sm:$0xff] }
 0x877   : > { %v1931_v59 = vpack.c.bf16 %v1927_v58, %v1926_v56 }
 0x896   : > { %v1550_v63 = vpop.f32.mrf.mxu1 }
 0x897   : > { %1673 = vrot.lane.b32.xlu0 %v1550_v63, %s2640_s15  ;;  %s3092_s15 = sld [smem:[#allocation15_spill]] }
 0x898   : > { %v2414_v1 = vpop.f32.mrf.mxu1 }
 0x899   : > { %v1849_v1 = vsub.s32 0, %v1848_v61 }
 0x89a   : > { %v1553_v0 = vpop.f32.mrf.mxu1 }
 0x89b   : > { %v1856_v0 = vsub.s32 1, %v1848_v61 }
 0x89c   : > { %v2415_v2 = vpop.f32.mrf.mxu1 }
 0x89d   : > { %v1845_v2 = vld [vmem:[%s3088_s20] sm:$0x7f]  ;;  %s3097_s20 = sld [smem:[#allocation19_spill]] }
 0x89e   : > { %v1662_v3 = vpop.f32.mrf.mxu1 }
 0x89f   : > { %1677 = vrot.lane.b32.xlu1 %v1662_v3, %s2641_s18  ;;  %v1863_v3 = vsub.s32 2, %v1848_v61  ;;  %s3093_s18 = sld [smem:[#allocation18_spill]] }
 0x8a0   : > { %v2426_v4 = vpop.f32.mrf.mxu1 }
 0x8a1   : > { %v1850_v4 = vrot.slane %v1845_v2, %v1849_v1 }
 0x8a2   : > { %v1665_v5 = vpop.f32.mrf.mxu1 }
 0x8a3   : > { %v1857_v5 = vrot.slane %v1845_v2, %v1856_v0 }
 0x8a4   : > { %v2427_v6 = vpop.f32.mrf.mxu1 }
 0x8a5   : > { %v1870_v6 = vsub.s32 3, %v1848_v61  ;;  %v1988_v0 = vld [vmem:[%s3093_s18 + $0x8] sm:$0xff] }
 0x8e2   : > { %v1670_v7 = vpop.permute.xlu1 %1669 }
 0x8e3   : > { %v1680_v9 = vsel %vm1220_vm3, %v1326_v48, %v1670_v7  ;;  %v1864_v7 = vrot.slane %v1845_v2, %v1863_v3 }
 0x909   : > { %v1674_v8 = vpop.permute.xlu0 %1673 }
 0x90a   : > { %v1682_v11 = vsel %vm1681_vm6, %v1680_v9, %v1674_v8  ;;  %v1877_v8 = vsub.s32 4, %v1848_v61 }
 0x911   : > { %v1678_v12 = vpop.permute.xlu1 %1677 }
 0x912   : > { %v1684_v13 = vsel %vm1683_vm7, %v1682_v11, %v1678_v12 }
 0x913   : > { %v1689_v14 = vpack.c.bf16 %v1684_v13, %v1684_v13 }
 0x915   : > { %2433 = vmatmul.mubr.msk.bf16.vlgmr.msra.gmra.mxu0 %vm980_vm0, %v1689_v14 }
 0x916   : > { %2448 = vmatprep.mubr.msk.bf16.mxu0 %vm2627_vm1, %v2626_v10  ;;  %2445 = vmatpush3.bf16.msra.mxu0 %v1932_v57 }
 0x917   : > { %2446 = vmatprep.subr.bf16.mxu0 %v2626_v10 }
 0x91a   : > { %2447 = vmatpush3.bf16.msra.mxu0 %v1931_v59 }
 0x91b   : > { %2460 = vmatprep.subr.bf16.mxu0 %v2626_v10 }
 0x9d5   : > { %v1729_v15 = vpop.f32.mrf.mxu0 }
 0x9d6   : > { %v1735_v17 = vadd.f32 %v1729_v15, %v2878_v54  ;;  %v1775_v54 = vld [vmem:[%s3083_s27 + $0x10] sm:$0xff]  ;;  %v1871_v15 = vrot.slane %v1845_v2, %v1870_v6 }
 0x9d7   : > { %v2434_v18 = vpop.f32.mrf.mxu0  ;;  %v1779_v30 = vpack.c.bf16 %v1776_v29, %v1775_v54 }
 0x9d8   : > { %v2985_v20 = vadd.f32 %v2285_v16, %v1735_v17 }
 0x9d9   : > { %v1732_v21 = vpop.f32.mrf.mxu0  ;;  %2437 = vmatpush3.bf16.msra.mxu1 %v1779_v30 }
 0x9da   : > { %v1746_v22 = vsel %vm980_vm0, %v2985_v20, 0.0  ;;  %2438 = vmatprep.subr.bf16.mxu1 %v2626_v10  ;;  %v1878_v21 = vrot.slane %v1845_v2, %v1877_v8 }
 0x9db   : > { %1747 = vadd.xlane.f32.xlu0 %v1746_v22  ;;  %v2435_v23 = vpop.f32.mrf.mxu0  ;;  %v1891_v22 = vsub.s32 6, %v1848_v61 }
 0x9dd   : > { %2439 = vmatpush3.bf16.msra.mxu1 %v1778_v32  ;;  %v1892_v29 = vrot.slane %v1845_v2, %v1891_v22  ;;  %v1995_v22 = vld [vmem:[%s3096_s5 + $0x18] sm:$0xff] }
 0x9de   : > { %2452 = vmatprep.subr.bf16.mxu1 %v2626_v10 }
 0xa64   : > { %v1748_v24 = vpop.xlane.xlu0 %1747 }
 0xa65   : > { %v1749_v25 = vmul.f32 0.03125, %v1748_v24 }
 0xa67   : > { %v1750_v26 = vsub.f32 %v2985_v20, %v1749_v25 }
 0xa69   : > { %v1751_v27 = vmul.f32 %v1750_v26, %v1750_v26 }
 0xa6b   : > { %v1752_v28 = vsel %vm980_vm0, %v1751_v27, 0.0 }
 0xa6c   : > { %1753 = vadd.xlane.f32.xlu1 %v1752_v28 }
 0xaf5   : > { %v1754_v34 = vpop.xlane.xlu1 %1753 }
 0xaf6   : > { %v1755_v35 = vmul.f32 0.03125, %v1754_v34 }
 0xaf8   : > { %v1756_v36 = vadd.f32 1e-05, %v1755_v35 }
 0xafa   : > { %2553 = vrsqrt.f32 %v1756_v36 }
 0xb07   : > { %v2554_v37 = vpop.eup %2553 }
 0xb08   : > { %v1758_v39 = vmul.f32 %v2554_v37, %v1750_v26  ;;  %v1885_v26 = vrot.slane %v1845_v2, %v1884_v33  ;;  %v2292_v37 = vld [vmem:[%s3090_s7] ss:$0 sm:$0xff] }
 0xb0a   : > { %v1765_v41 = vmul.f32 %v2286_v38, %v1758_v39  ;;  %v2293_v39 = vld [vmem:[%s3091_s23] ss:$0 sm:$0xff] }
 0xb0c   : > { %v1772_v42 = vadd.f32 %v2287_v40, %v1765_v41 }
 0xb0e   : > { %v1777_v43 = vpack.c.bf16 %v1772_v42, %v1772_v42 }
 0xb10   : > { %2441 = vmatmul.mubr.msk.bf16.vlgmr.msra.gmra.mxu1 %vm980_vm0, %v1777_v43 }
 0xb11   : > { %2456 = vmatprep.mubr.msk.bf16.mxu1 %vm2627_vm1, %v2626_v10 }
 0xbd0   : > { %v1824_v45 = vpop.f32.mrf.mxu1 }
 0xbd1   : > { %v1825_v46 = vadd.f32 %v2288_v44, %v1824_v45 }
 0xbd2   : > { %v2442_v47 = vpop.f32.mrf.mxu1 }
 0xbd3   : > { %v2290_v48 = vmul.f32 -1.442695, %v1825_v46 }
 0xbd4   : > { %v1827_v49 = vpop.f32.mrf.mxu1 }
 0xbd5   : > { %2555 = vpow2.f32 %v2290_v48  ;;  %v2296_v49 = vld [vmem:[%s3092_s15] ss:$0 sm:$0xff] }
 0xbd6   : > { %v2443_v50 = vpop.f32.mrf.mxu1 }
 0xbe2   : > { %v2556_v51 = vpop.eup %2555 }
 0xbe3   : > { %v1833_v52 = vadd.f32 1.0, %v2556_v51 }
 0xbe5   : > { %2557 = vrcp.f32 %v1833_v52 }
 0xbf2   : > { %v2558_v60 = vpop.eup %2557 }
 0xbf3   : > { %1837 = vrot.lane.b32.xlu0 %v2558_v60, %s2629_s11  ;;  %s3089_s11 = sld [smem:[#allocation11_spill]] }
 0xbf9   : > { %v2291_v35 = vld [vmem:[%s3089_s11] ss:$0 sm:$0xff]  ;;  %s961_s11 = scalar_lea.vmem %s2811_s4, %s2263_s2 }
 0xc65   : > { %v1838_v62 = vpop.permute.xlu0 %1837 }
 0xc66   : > { %v1840_v63 = vmul.f32 %v1838_v62, %v1825_v46  ;;  %v1990_v62 = vld [vmem:[%s3093_s18 + $0x18] sm:$0xff] }
 0xc68   : > { %1844 = vst.msk [vmem:[#allocation2 + $0x8] sm:$0xff] %vm980_vm0, %v1840_v63  ;;  %v1987_v63 = vld [vmem:[%s3093_s18] sm:$0xff] }
 0xc69   : > { %v2029_v2 = vpack.c.bf16 %v1988_v0, %v1987_v63 }
 0xc6f   : > { %v1846_v9 = vld [vmem:[#allocation2 + $0x5] sm:$0xff] }
 0xc70   : > { %v1853_v11 = vld [vmem:[#allocation2 + $0x6] sm:$0xff]  ;;  %v1851_v13 = vmul.f32 %v1850_v4, %v1846_v9  ;;  %v2298_v9 = vld [vmem:[%s3095_s28] ss:$0 sm:$0xff] }
 0xc71   : > { %v1860_v12 = vld [vmem:[#allocation2 + $0x7] sm:$0xff]  ;;  %v1858_v14 = vmul.f32 %v1857_v5, %v1853_v11 }
 0xc72   : > { %v1867_v16 = vld [vmem:[#allocation2 + $0x8] sm:$0xff]  ;;  %v1865_v18 = vmul.f32 %v1864_v7, %v1860_v12  ;;  %v2297_v7 = vld [vmem:[%s3094_s26] ss:$0 sm:$0xff] }
 0xc73   : > { %v1859_v17 = vadd.f32 %v1858_v14, %v1851_v13  ;;  %v1874_v23 = vld [vmem:[#allocation2 + $0x9] sm:$0xff]  ;;  %v1872_v25 = vmul.f32 %v1871_v15, %v1867_v16  ;;  %v1999_v15 = vld [vmem:[%s3096_s5 + $0x38] sm:$0xff]  ;;  %v1996_v16 = vld [vmem:[%s3096_s5 + $0x20] sm:$0xff] }
 0xc74   : > { %v1881_v27 = vld [vmem:[#allocation2 + $0xa] sm:$0xff]  ;;  %v1879_v54 = vmul.f32 %v1878_v21, %v1874_v23 }
 0xc75   : > { %v1866_v24 = vadd.f32 %v1865_v18, %v1859_v17  ;;  %v1888_v30 = vld [vmem:[#allocation2 + $0xb] sm:$0xff]  ;;  %v1886_v31 = vmul.f32 %v1885_v26, %v1881_v27  ;;  %v2299_v27 = vld [vmem:[%s3097_s20] ss:$0 sm:$0xff] }
 0xc76   : > { %v1893_v34 = vmul.f32 %v1892_v29, %v1888_v30  ;;  %v1998_v14 = vld [vmem:[%s3096_s5 + $0x30] sm:$0xff]  ;;  %v1997_v17 = vld [vmem:[%s3096_s5 + $0x28] sm:$0xff] }
 0xc77   : > { %v1873_v28 = vadd.f32 %v1872_v25, %v1866_v24  ;;  %v2091_v33 = vpack.c.bf16 %v1999_v15, %v1998_v14  ;;  %v2090_v18 = vpack.c.bf16 %v1997_v17, %v1996_v16  ;;  %v1994_v21 = vld [vmem:[%s3096_s5 + $0x10] sm:$0xff]  ;;  %v1992_v24 = vld [vmem:[%s3096_s5] sm:$0xff]  ;;  %v1993_v25 = vld [vmem:[%s3096_s5 + $0x8] sm:$0xff] }
 0xc78   : > { %v2089_v23 = vpack.c.bf16 %v1995_v22, %v1994_v21  ;;  %v2088_v26 = vpack.c.bf16 %v1993_v25, %v1992_v24 }
 0xc79   : > { %v1880_v19 = vadd.f32 %v1879_v54, %v1873_v28 }
 0xc7b   : > { %v1887_v32 = vadd.f32 %v1886_v31, %v1880_v19 }
 0xc7d   : > { %v1894_v36 = vadd.f32 %v1893_v34, %v1887_v32 }
 0xc7f   : > { %v1902_v38 = vadd.f32 %v2291_v35, %v1894_v36 }
 0xc81   : > { %v1910_v40 = vmul.f32 %v2292_v37, %v1902_v38 }
 0xc83   : > { %v1918_v41 = vadd.f32 %v2293_v39, %v1910_v40 }
 0xc85   : > { %v2294_v42 = vmul.f32 -1.442695, %v1918_v41 }
 0xc87   : > { %2559 = vpow2.f32 %v2294_v42 }
 0xc94   : > { %v2560_v43 = vpop.eup %2559 }
 0xc95   : > { %v1922_v44 = vadd.f32 1.0, %v2560_v43 }
 0xc97   : > { %2561 = vrcp.f32 %v1922_v44 }
 0xca4   : > { %v2562_v45 = vpop.eup %2561 }
 0xca5   : > { %v1925_v46 = vmul.f32 %v2562_v45, %v1918_v41 }
 0xca7   : > { %v1930_v47 = vpack.c.bf16 %v1925_v46, %v1925_v46 }
 0xca9   : > { %2449 = vmatmul.mubr.msk.bf16.vlgmr.msra.gmra.mxu0 %vm980_vm0, %v1930_v47 }
 0xcaa   : > { %2468 = vmatprep.mubr.msk.bf16.mxu0 %vm2627_vm1, %v2626_v10  ;;  %2461 = vmatpush3.bf16.msra.mxu0 %v2091_v33 }
 0xcab   : > { %2462 = vmatprep.subr.bf16.mxu0 %v2626_v10 }
 0xcae   : > { %2463 = vmatpush3.bf16.msra.mxu0 %v2090_v18 }
 0xcaf   : > { %2464 = vmatprep.subr.bf16.mxu0 %v2626_v10 }
 0xcb2   : > { %2465 = vmatpush3.bf16.msra.mxu0 %v2089_v23 }
 0xcb3   : > { %2466 = vmatprep.subr.bf16.mxu0 %v2626_v10 }
 0xcb6   : > { %2467 = vmatpush3.bf16.msra.mxu0 %v2088_v26 }
 0xd69   : > { %v1970_v48 = vpop.f32.mrf.mxu0 }
 0xd6a   : > { %v1976_v50 = vadd.f32 %v1970_v48, %v2985_v20  ;;  %v1989_v20 = vld [vmem:[%s3093_s18 + $0x10] sm:$0xff] }
 0xd6b   : > { %v2450_v51 = vpop.f32.mrf.mxu0  ;;  %v2030_v1 = vpack.c.bf16 %v1990_v62, %v1989_v20 }
 0xd6c   : > { %v3021_v52 = vadd.f32 %v2296_v49, %v1976_v50 }
 0xd6d   : > { %v1973_v53 = vpop.f32.mrf.mxu0  ;;  %2453 = vmatpush3.bf16.msra.mxu1 %v2030_v1 }
 0xd6e   : > { %v2001_v55 = vsel %vm980_vm0, %v3021_v52, 0.0  ;;  %2454 = vmatprep.subr.bf16.mxu1 %v2626_v10  ;;  %v2302_v10 = vld [vmem:[%s2795_s10] ss:$0 sm:$0xff] }
 0xd6f   : > { %2002 = vadd.xlane.f32.xlu1 %v2001_v55  ;;  %v2451_v56 = vpop.f32.mrf.mxu0 }
 0xd71   : > { %2455 = vmatpush3.bf16.msra.mxu1 %v2029_v2 }
 0xdf8   : > { %v2003_v57 = vpop.xlane.xlu1 %2002 }
 0xdf9   : > { %v2004_v58 = vmul.f32 0.03125, %v2003_v57 }
 0xdfb   : > { %v2005_v59 = vsub.f32 %v3021_v52, %v2004_v58  ;;  %v2305_v58 = vld [vmem:[%s2806_s22] ss:$0 sm:$0xff] }
 0xdfd   : > { %v2006_v60 = vmul.f32 %v2005_v59, %v2005_v59 }
 0xdff   : > { %v2007_v61 = vsel %vm980_vm0, %v2006_v60, 0.0 }
 0xe00   : > { %2008 = vadd.xlane.f32.xlu1 %v2007_v61 }
 0xe89   : > { %v2009_v3 = vpop.xlane.xlu1 %2008 }
 0xe8a   : > { %v2010_v4 = vmul.f32 0.03125, %v2009_v3 }
 0xe8c   : > { %v2011_v5 = vadd.f32 1e-05, %v2010_v4 }
 0xe8e   : > { %2563 = vrsqrt.f32 %v2011_v5 }
 0xe9b   : > { %v2564_v6 = vpop.eup %2563 }
 0xe9c   : > { %v2013_v8 = vmul.f32 %v2564_v6, %v2005_v59 }
 0xe9e   : > { %v2020_v11 = vmul.f32 %v2297_v7, %v2013_v8 }
 0xea0   : > { %v2027_v12 = vadd.f32 %v2298_v9, %v2020_v11 }
 0xea2   : > { %v2028_v13 = vpack.c.bf16 %v2027_v12, %v2027_v12 }
 0xea4   : > { %2457 = vmatmul.mubr.msk.bf16.vlgmr.msra.gmra.mxu1 %vm980_vm0, %v2028_v13 }
 0xf64   : > { %v2074_v28 = vpop.f32.mrf.mxu1 }
 0xf65   : > { %v2075_v54 = vadd.f32 %v2299_v27, %v2074_v28 }
 0xf66   : > { %v2458_v29 = vpop.f32.mrf.mxu1 }
 0xf67   : > { %v2301_v30 = vmul.f32 -1.442695, %v2075_v54 }
 0xf68   : > { %v2077_v19 = vpop.f32.mrf.mxu1 }
 0xf69   : > { %2565 = vpow2.f32 %v2301_v30 }
 0xf6a   : > { %v2459_v31 = vpop.f32.mrf.mxu1 }
 0xf76   : > { %v2566_v32 = vpop.eup %2565 }
 0xf77   : > { %v2083_v34 = vadd.f32 1.0, %v2566_v32 }
 0xf79   : > { %2567 = vrcp.f32 %v2083_v34 }
 0xf86   : > { %v2568_v35 = vpop.eup %2567 }
 0xf87   : > { %v2086_v36 = vmul.f32 %v2568_v35, %v2075_v54 }
 0xf89   : > { %v2087_v37 = vpack.c.bf16 %v2086_v36, %v2086_v36 }
 0xf8b   : > { %2469 = vmatmul.mubr.msk.bf16.vlgmr.msra.gmra.mxu0 %vm1079_vm2, %v2087_v37 }
0x104b   : > { %v2135_v38 = vpop.f32.mrf.mxu0 }
0x104c   : > { %v2136_v39 = vadd.f32 %v2302_v10, %v2135_v38 }
0x104d   : > { %v2470_v40 = vpop.f32.mrf.mxu0 }
0x104e   : > { %v2141_v41 = vmul.f32 0.5, %v2136_v39 }
0x104f   : > { %v2138_v42 = vpop.f32.mrf.mxu0 }
0x1050   : > { %v2142_v43 = vadd.f32 %v2141_v41, %v3021_v52  ;;  %v2304_v52 = vld [vmem:[%s2800_s16] ss:$0 sm:$0xff] }
0x1051   : > { %v2471_v44 = vpop.f32.mrf.mxu0 }
0x1052   : > { %v2145_v45 = vsel %vm980_vm0, %v2142_v43, 0.0 }
0x1053   : > { %2146 = vadd.xlane.f32.xlu1 %v2145_v45 }
0x10dc   : > { %v2147_v46 = vpop.xlane.xlu1 %2146 }
0x10dd   : > { %v2148_v47 = vmul.f32 0.03125, %v2147_v46 }
0x10df   : > { %v2149_v48 = vsub.f32 %v2142_v43, %v2148_v47 }
0x10e1   : > { %v2150_v49 = vmul.f32 %v2149_v48, %v2149_v48 }
0x10e3   : > { %v2151_v50 = vsel %vm980_vm0, %v2150_v49, 0.0 }
0x10e4   : > { %2152 = vadd.xlane.f32.xlu1 %v2151_v50 }
0x116d   : > { %v2153_v51 = vpop.xlane.xlu1 %2152 }
0x116e   : > { %v2154_v53 = vmul.f32 0.03125, %v2153_v51 }
0x1170   : > { %v2155_v55 = vadd.f32 1e-05, %v2154_v53 }
0x1172   : > { %2569 = vrsqrt.f32 %v2155_v55 }
0x117f   : > { %v2570_v56 = vpop.eup %2569 }
0x1180   : > { %v2157_v57 = vmul.f32 %v2570_v56, %v2149_v48 }
0x1182   : > { %v2164_v59 = vmul.f32 %v2304_v52, %v2157_v57 }
0x1184   : > { %v2171_v60 = vadd.f32 %v2305_v58, %v2164_v59 }
0x1186   : > { %2172 = vst.msk [vmem:[%s961_s11] sm:$0xff] %vm980_vm0, %v2171_v60 }
0x1187 PF: > { %s81_s12 = sadd.s32 1, %s2591_s12  }
0x1188   : > { %p78_p9 = scmp.ge.s32.totalorder %s81_s12, 4  }
0x118a   :  { %80 = sbr.rel (!%p78_p9) target bundleno = 58 (0x3a), region = 206 }

// kernel: _lambda_.5
= control target key start
LH: loop header
LB: loop body
LE: loop exit
PB: predicated region body
PF: predicated region fallthrough
CT: control target
= control target key end

     0   :  { %s3232_s6 = smov 1   ;;  %s3233_s10 = smov 2   ;;  %s3814_s0 = inlined_call_operand.smem [shape: u32[33], index: -1, kind: input, shape index: {}] }
   0x1   :  { %s3301_s5 = sld [smem:[%s3814_s0]]   ;;  %s3234_s14 = smov 3  }
   0x2   :  { %s3306_s9 = sld [smem:[%s3814_s0 + %s3232_s6]]   ;;  %s3235_s18 = smov 4  }
   0x3   :  { %s3311_s13 = sld [smem:[%s3814_s0 + %s3233_s10]]   ;;  %s3236_s22 = smov 5  }
   0x4   :  { %s3316_s17 = sld [smem:[%s3814_s0 + %s3234_s14]]   ;;  %s3237_s26 = smov 6  }
   0x5   :  { %s3321_s21 = sld [smem:[%s3814_s0 + %s3235_s18]]   ;;  %s3238_s30 = smov 7  }
   0x6   :  { %s3326_s25 = sld [smem:[%s3814_s0 + %s3236_s22]]   ;;  %s3239_s4 = smov 8  }
   0x7   :  { %s3331_s29 = sld [smem:[%s3814_s0 + %s3237_s26]]   ;;  %s3240_s10 = smov 9  }
   0x8   :  { %s3336_s3 = sld [smem:[%s3814_s0 + %s3238_s30]]   ;;  %s3241_s15 = smov 10  }
   0x9   :  { %s3341_s8 = sld [smem:[%s3814_s0 + %s3239_s4]]   ;;  %s3242_s20 = smov 11  }
   0xa   :  { %s3346_s14 = sld [smem:[%s3814_s0 + %s3240_s10]]   ;;  %s3243_s26 = smov 12  }
   0xb   :  { %s3351_s19 = sld [smem:[%s3814_s0 + %s3241_s15]]   ;;  %s3244_s1 = smov 13  }
   0xc   :  { %3820 = sst [smem:[#allocation28_spill]] %s3326_s25  ;;  %s3245_s7 = smov 14  }
   0xd   :  { %3821 = sst [smem:[#allocation29_spill]] %s3331_s29  ;;  %s3246_s15 = smov 15  }
   0xe   :  { %3822 = sst [smem:[#allocation30_spill]] %s3336_s3  ;;  %s3247_s22 = smov 16  }
   0xf   :  { %3823 = sst [smem:[#allocation31_spill]] %s3341_s8  ;;  %s3248_s28 = smov 17  }
  0x10   :  { %3824 = sst [smem:[#allocation32_spill]] %s3346_s14  ;;  %s3261_s8 = smov 30  }
  0x11   :  { %3825 = sst [smem:[#allocation33_spill]] %s3351_s19  ;;  %s70_s19 = sshll.u32 %s3301_s5, 4  ;;  %s71_s19 = int_to_ptr.vmem [resolvable:$true] %s70_s19 }
  0x12   :  { %s3356_s24 = sld [smem:[%s3814_s0 + %s3242_s20]]   ;;  %p2931_p1 = scmp.lt.s32.totalorder %s71_s19, %s71_s19 }
  0x13   :  { %s3361_s30 = sld [smem:[%s3814_s0 + %s3243_s26]]  }
  0x14   :  { %s3366_s6 = sld [smem:[%s3814_s0 + %s3244_s1]]  }
  0x15   :  { %s3371_s12 = sld [smem:[%s3814_s0 + %s3245_s7]]   ;;  %s3249_s7 = smov 18  }
  0x16   :  { %s3376_s20 = sld [smem:[%s3814_s0 + %s3246_s15]]   ;;  %s3250_s15 = smov 19  }
  0x17   :  { %s3381_s27 = sld [smem:[%s3814_s0 + %s3247_s22]]   ;;  %s3251_s22 = smov 20  }
  0x18   :  { %3826 = sst [smem:[#allocation34_spill]] %s3356_s24 }
  0x19   :  { %s3386_s4 = sld [smem:[%s3814_s0 + %s3248_s28]]   ;;  %s3252_s28 = smov 21  }
  0x1a   :  { %3827 = sst [smem:[#allocation35_spill]] %s3366_s6 }
  0x1b   :  { %3828 = sst [smem:[#allocation36_spill]] %s3371_s12 }
  0x1c   :  { %3829 = sst [smem:[#allocation37_spill]] %s3376_s20 }
  0x1d   :  { %s3391_s12 = sld [smem:[%s3814_s0 + %s3249_s7]]   ;;  %s3253_s7 = smov 22  }
  0x1e   :  { %s3396_s20 = sld [smem:[%s3814_s0 + %s3250_s15]]   ;;  %s3254_s15 = smov 23  }
  0x1f   :  { %s3401_s6 = sld [smem:[%s3814_s0 + %s3251_s22]]   ;;  %s3255_s22 = smov 24  }
  0x20   :  { %s3406_s24 = sld [smem:[%s3814_s0 + %s3252_s28]]   ;;  %s3256_s28 = smov 25  }
  0x21   :  { %s3411_s14 = sld [smem:[%s3814_s0 + %s3253_s7]]   ;;  %s3257_s7 = smov 26  }
  0x22   :  { %s3416_s23 = sld [smem:[%s3814_s0 + %s3254_s15]]   ;;  %s3258_s15 = smov 27  }
  0x23   :  { %s3421_s1 = sld [smem:[%s3814_s0 + %s3255_s22]]  }
  0x24   :  { %s3426_s10 = sld [smem:[%s3814_s0 + %s3256_s28]]   ;;  %s2926_s28 = scalar_lea.vmem %s71_s19, 16 }
  0x25   :  { %3830 = sst [smem:[#allocation38_spill]] %s3401_s6  ;;  %s3259_s6 = smov 28  }
  0x26   :  { %3831 = sst [smem:[#allocation39_spill]] %s3406_s24  ;;  %s3260_s24 = smov 29  }
  0x27   :  { %s3431_s16 = sld [smem:[%s3814_s0 + %s3257_s7]]   ;;  %p2927_p0 = scmp.ne.s32.totalorder %s71_s19, %s2926_s28 }
  0x28   :  { %s3436_s3 = sld [smem:[%s3814_s0 + %s3258_s15]]   ;;  %s3262_s15 = smov 31  }
  0x29   :  { %3832 = sst [smem:[#allocation40_spill]] %s3421_s1  ;;  %p2932_p2 = scmp.lt.s32.totalorder %s2926_s28, %s2926_s28 }
  0x2a   :  { %3833 = sst [smem:[#allocation41_spill]] %s3426_s10 }
  0x2b   :  { %s3441_s1 = sld [smem:[%s3814_s0 + %s3259_s6]]   ;;  %s3263_s6 = smov 32  }
  0x2c   :  { %s3446_s10 = sld [smem:[%s3814_s0 + %s3260_s24]]   ;;  %p2933_p3 = por %p2932_p2, %p2931_p1 }
  0x2d   :  { %s3451_s25 = sld [smem:[%s3814_s0 + %s3261_s8]]  }
  0x2e   :  { %s3457_s22 = sld [smem:[%s3814_s0 + %s3262_s15]]   ;;  %p2934_p4 = pnand %p2933_p3, %p2927_p0 }
  0x2f   :  { %s3462_s24 = sld [smem:[%s3814_s0 + %s3263_s6]]  }
  0x31   :  { %3834 = sst [smem:[#allocation42_spill]] %s3441_s1 }
  0x32   :  { %2937 = shalt.err (!%p2934_p4)  }
  0x33   :  { %s3264_s5 = smov [#allocation4]  }
  0x34   :  { %73 = dma.vmem_to_smem %s71_s19, 16, %s3264_s5, [#allocation3] }
  0x35   :  { %3202 = dma.done.wait [#allocation3], 16 }
  0x36   :  { %3203 = vsyncadd [#allocation3], 4294967280 }
  0x37   :  { %75 = sfence }
  0x38   :  { %76 = vsyncpa [#allocation6], 0 }
  0x39   :  { %77 = vsyncpa [#allocation8], 0 }
  0x3a   :  { %78 = vsyncpa [#allocation11], 0 }
  0x3b   :  { %79 = vsyncpa [#allocation14], 0 }
  0x3c   :  { %80 = vsyncpa [#allocation17], 0 }
  0x3d   :  { %81 = vsyncpa [#allocation20], 0  ;;  %s3464_s0 = smov 0  }
  0x3e LB: > { %s3470_s29 = sadd.s32 4294967295, %s3230_s0   ;;  %p2492_p5 = scmp.ge.s32.totalorder %s3230_s0, 1  ;;  %s3230_s0 = sphi %s3464_s0, %s87_s0  }
  0x3f   : > { %p774_p6 = scmp.lt.s32.totalorder %s3230_s0, 3  ;;  %p3818_p7 = scmp.eq.s32.totalorder %s3470_s29, 0 }
  0x40   : > { %s3265_s2 = smov [#allocation7]   ;;  %s3266_s7 = smov [#allocation10]  }
  0x41   : > { %p3475_p8 = pnand %p2492_p5, %p774_p6  ;;  %s838_s8 = sshll.u32 %s3265_s2, 4  ;;  %s839_s8 = int_to_ptr.vmem [resolvable:$true] %s838_s8 }
  0x42   : > { %s863_s11 = sshll.u32 %s3266_s7, 4  ;;  %s3267_s15 = smov [#allocation13]   ;;  %s3481_s11 = int_to_ptr.vmem [resolvable:$true] %s863_s11 }
  0x43   : > { %s3835_s1 = scalar_select %p3475_p8, 1, 0 }
  0x44   : > { %p2764_p9 = pneg %p3475_p8  ;;  %s890_s18 = sshll.u32 %s3267_s15, 4  ;;  %s3489_s18 = int_to_ptr.vmem [resolvable:$true] %s890_s18 }
  0x45   : > { %s3268_s6 = smov [#allocation16]   ;;  %s2949_s5 = scalar_lea.vmem %s839_s8, 512 }
  0x46   : > { %p3485_p10 = pnand %p3818_p7, %p2764_p9  ;;  %s3491_s26 = sshll.u32 %s3268_s6, 4  ;;  %s921_s26 = int_to_ptr.vmem [resolvable:$true] %s3491_s26 }
  0x47   : > { %p2950_p12 = scmp.ne.s32.totalorder %s839_s8, %s2949_s5  ;;  %p2957_p1 = scmp.lt.s32.totalorder %s839_s8, %s839_s8 }
  0x48   : > { %p3495_p11 = pneg %p3485_p10  ;;  %p2958_p2 = scmp.lt.s32.totalorder %s2949_s5, %s2949_s5 }
  0x4a   : > { %p2952_p13 = pnand %p2950_p12, %p3495_p11  ;;  %p2959_p3 = por %p2958_p2, %p2957_p1 }
  0x4c   : > { %p2953_p0 = pneg %p2952_p13 }
  0x4e   : > { %p2960_p4 = pnand %p2959_p3, %p2953_p0 }
  0x50   : > { %2963 = shalt.err (!%p2960_p4)
}
  0x51   : > { %s3269_s2 = smov 128   ;;  %s3270_s7 = smov 8  }
  0x52   : > { %2770 = dma.hbm_to_vmem [thread:$0]  (!%p3485_p10), %s3381_s27, 512, %s839_s8, [#allocation8], %s3269_s2, %s3269_s2, %s3270_s7  }
  0x53   : > { %s2975_s15 = scalar_lea.vmem %s3481_s11, 128  ;;  %p2983_p12 = scmp.lt.s32.totalorder %s3481_s11, %s3481_s11 }
  0x54   : > { %p2976_p5 = scmp.ne.s32.totalorder %s3481_s11, %s2975_s15  ;;  %p2984_p13 = scmp.lt.s32.totalorder %s2975_s15, %s2975_s15 }
  0x56   : > { %p2978_p6 = pnand %p2976_p5, %p3495_p11  ;;  %p2985_p0 = por %p2984_p13, %p2983_p12 }
  0x58   : > { %p2979_p9 = pneg %p2978_p6 }
  0x5a   : > { %p2986_p1 = pnand %p2985_p0, %p2979_p9 }
  0x5c   : > { %2989 = shalt.err (!%p2986_p1)
}
  0x5d   : > { %2776 = dma.hbm_to_vmem [thread:$0]  (!%p3485_p10), %s3391_s12, 128, %s3481_s11, [#allocation11]  }
  0x5e   : > { %s3001_s8 = scalar_lea.vmem %s3489_s18, 512  ;;  %p3009_p5 = scmp.lt.s32.totalorder %s3489_s18, %s3489_s18 }
  0x5f   : > { %p3002_p2 = scmp.ne.s32.totalorder %s3489_s18, %s3001_s8  ;;  %p3010_p6 = scmp.lt.s32.totalorder %s3001_s8, %s3001_s8 }
  0x61   : > { %p3004_p3 = pnand %p3002_p2, %p3495_p11  ;;  %p3011_p12 = por %p3010_p6, %p3009_p5 }
  0x63   : > { %p3005_p4 = pneg %p3004_p3 }
  0x65   : > { %p3012_p9 = pnand %p3011_p12, %p3005_p4 }
  0x67   : > { %3015 = shalt.err (!%p3012_p9)
}
  0x68   : > { %2782 = dma.hbm_to_vmem [thread:$0]  (!%p3485_p10), %s3411_s14, 512, %s3489_s18, [#allocation14], %s3269_s2, %s3269_s2, %s3270_s7  }
  0x69   : > { %s3027_s11 = scalar_lea.vmem %s921_s26, 512  ;;  %p3035_p2 = scmp.lt.s32.totalorder %s921_s26, %s921_s26 }
  0x6a   : > { %p3028_p13 = scmp.ne.s32.totalorder %s921_s26, %s3027_s11  ;;  %p3036_p3 = scmp.lt.s32.totalorder %s3027_s11, %s3027_s11 }
  0x6c   : > { %p3030_p0 = pnand %p3028_p13, %p3495_p11  ;;  %p3037_p4 = por %p3036_p3, %p3035_p2 }
  0x6e   : > { %p3031_p1 = pneg %p3030_p0 }
  0x70   : > { %p3038_p5 = pnand %p3037_p4, %p3031_p1 }
  0x72   : > { %3041 = shalt.err (!%p3038_p5)
}
  0x73   : > { %2788 = dma.hbm_to_vmem [thread:$0]  (!%p3485_p10), %s3431_s16, 512, %s921_s26, [#allocation17], %s3269_s2, %s3269_s2, %s3270_s7  }
  0x74   : > { %s3271_s18 = smov [#allocation5]   ;;  %s3272_s5 = smov [#allocation9]  }
  0x75   : > { %s816_s6 = sshll.u32 %s3271_s18, 4  ;;  %s852_s15 = sshll.u32 %s3272_s5, 4  ;;  %s817_s6 = int_to_ptr.vmem [resolvable:$true] %s816_s6  ;;  %s853_s15 = int_to_ptr.vmem [resolvable:$true] %s852_s15 }
  0x76   : > { %s3053_s8 = scalar_lea.vmem %s817_s6, 512  ;;  %p3061_p13 = scmp.lt.s32.totalorder %s817_s6, %s817_s6 }
  0x77   : > { %p3054_p6 = scmp.ne.s32.totalorder %s817_s6, %s3053_s8  ;;  %p3062_p0 = scmp.lt.s32.totalorder %s3053_s8, %s3053_s8 }
  0x79   : > { %p3056_p12 = pnand %p3054_p6, %p3495_p11  ;;  %p3063_p1 = por %p3062_p0, %p3061_p13 }
  0x7b   : > { %p3057_p9 = pneg %p3056_p12 }
  0x7d   : > { %p3064_p2 = pnand %p3063_p1, %p3057_p9 }
  0x7f   : > { %3067 = shalt.err (!%p3064_p2)
}
  0x80   : > { %2767 = dma.hbm_to_vmem [thread:$0]  (!%p3485_p10), %s3361_s30, 512, %s817_s6, [#allocation6], %s3269_s2, %s3269_s2, %s3270_s7  }
  0x81   : > { %s3079_s26 = scalar_lea.vmem %s853_s15, 16  ;;  %s3086_s11 = scalar_lea.vmem %s853_s15, 32 }
  0x82   : > { %p3080_p3 = scmp.ne.s32.totalorder %s853_s15, %s3079_s26  ;;  %p3087_p6 = scmp.lt.s32.totalorder %s853_s15, %s853_s15 }
  0x83   : > { %p3088_p12 = scmp.lt.s32.totalorder %s3086_s11, %s3079_s26 }
  0x84   : > { %p3082_p4 = pnand %p3080_p3, %p3495_p11 }
  0x85   : > { %p3089_p13 = por %p3088_p12, %p3087_p6 }
  0x86   : > { %p3083_p5 = pneg %p3082_p4 }
  0x88   : > { %p3090_p9 = pnand %p3089_p13, %p3083_p5 }
  0x8a   : > { %3093 = shalt.err (!%p3090_p9)
}
  0x8b   : > { %2773 = dma.hbm_to_vmem [thread:$0]  (!%p3485_p10), %s3386_s4, 16, %s853_s15, [#allocation8]  }
  0x8c   : > { %s3273_s18 = smov [#allocation12]   ;;  %s3274_s2 = smov [#allocation15]  }
  0x8d   : > { %s874_s5 = sshll.u32 %s3273_s18, 4  ;;  %s904_s7 = sshll.u32 %s3274_s2, 4  ;;  %s875_s5 = int_to_ptr.vmem [resolvable:$true] %s874_s5  ;;  %s905_s7 = int_to_ptr.vmem [resolvable:$true] %s904_s7 }
  0x8e   : > { %s3105_s6 = scalar_lea.vmem %s875_s5, 16  ;;  %s3112_s8 = scalar_lea.vmem %s875_s5, 32 }
  0x8f   : > { %p3106_p0 = scmp.ne.s32.totalorder %s875_s5, %s3105_s6  ;;  %p3113_p3 = scmp.lt.s32.totalorder %s875_s5, %s875_s5 }
  0x90   : > { %p3114_p4 = scmp.lt.s32.totalorder %s3112_s8, %s3105_s6 }
  0x91   : > { %p3108_p1 = pnand %p3106_p0, %p3495_p11 }
  0x92   : > { %p3115_p5 = por %p3114_p4, %p3113_p3 }
  0x93   : > { %p3109_p2 = pneg %p3108_p1 }
  0x95   : > { %p3116_p6 = pnand %p3115_p5, %p3109_p2 }
  0x97   : > { %3119 = shalt.err (!%p3116_p6)
}
  0x98   : > { %2779 = dma.hbm_to_vmem [thread:$0]  (!%p3485_p10), %s3396_s20, 16, %s875_s5, [#allocation11]  }
  0x99   : > { %s3131_s15 = scalar_lea.vmem %s905_s7, 16  ;;  %s3138_s26 = scalar_lea.vmem %s905_s7, 32 }
  0x9a   : > { %p3132_p12 = scmp.ne.s32.totalorder %s905_s7, %s3131_s15  ;;  %p3139_p0 = scmp.lt.s32.totalorder %s905_s7, %s905_s7 }
  0x9b   : > { %p3140_p1 = scmp.lt.s32.totalorder %s3138_s26, %s3131_s15 }
  0x9c   : > { %p3134_p13 = pnand %p3132_p12, %p3495_p11 }
  0x9d   : > { %p3141_p7 = por %p3140_p1, %p3139_p0 }
  0x9e   : > { %p3135_p9 = pneg %p3134_p13 }
  0xa0   : > { %p3142_p8 = pnand %p3141_p7, %p3135_p9 }
  0xa2   : > { %3145 = shalt.err (!%p3142_p8)
}
  0xa3   : > { %2785 = dma.hbm_to_vmem [thread:$0]  (!%p3485_p10), %s3416_s23, 16, %s905_s7, [#allocation14]  }
  0xa4   : > { %s3275_s11 = smov [#allocation18]   ;;  %s3276_s5 = smov [#allocation19]  }
  0xa5   : > { %s934_s18 = sshll.u32 %s3275_s11, 4  ;;  %s948_s2 = sshll.u32 %s3276_s5, 4  ;;  %s935_s18 = int_to_ptr.vmem [resolvable:$true] %s934_s18  ;;  %s949_s2 = int_to_ptr.vmem [resolvable:$true] %s948_s2 }
  0xa6   : > { %s3157_s6 = scalar_lea.vmem %s935_s18, 16  ;;  %s3164_s8 = scalar_lea.vmem %s935_s18, 32 }
  0xa7   : > { %p3158_p2 = scmp.ne.s32.totalorder %s935_s18, %s3157_s6  ;;  %p3165_p5 = scmp.lt.s32.totalorder %s935_s18, %s935_s18 }
  0xa8   : > { %p3166_p6 = scmp.lt.s32.totalorder %s3164_s8, %s3157_s6 }
  0xa9   : > { %p3160_p3 = pnand %p3158_p2, %p3495_p11 }
  0xaa   : > { %p3167_p7 = por %p3166_p6, %p3165_p5 }
  0xab   : > { %p3161_p4 = pneg %p3160_p3 }
  0xad   : > { %p3168_p8 = pnand %p3167_p7, %p3161_p4 }
  0xaf   : > { %3171 = shalt.err (!%p3168_p8)
}
  0xb0   : > { %2791 = dma.hbm_to_vmem [thread:$0]  (!%p3485_p10), %s3436_s3, 16, %s935_s18, [#allocation17]  }
  0xb1   : > { %s3183_s7 = scalar_lea.vmem %s949_s2, 16  ;;  %s3190_s15 = scalar_lea.vmem %s949_s2, 32 }
  0xb2   : > { %p3184_p12 = scmp.ne.s32.totalorder %s949_s2, %s3183_s7  ;;  %p3191_p0 = scmp.lt.s32.totalorder %s949_s2, %s949_s2 }
  0xb3   : > { %p3192_p1 = scmp.lt.s32.totalorder %s3190_s15, %s3183_s7 }
  0xb4   : > { %p3186_p13 = pnand %p3184_p12, %p3495_p11 }
  0xb5   : > { %p3193_p2 = por %p3192_p1, %p3191_p0 }
  0xb6   : > { %p3187_p9 = pneg %p3186_p13 }
  0xb8   : > { %p3194_p3 = pnand %p3193_p2, %p3187_p9 }
  0xba   : > { %3197 = shalt.err (!%p3194_p3)
}
  0xbb   : > { %2794 = dma.hbm_to_vmem [thread:$0]  (!%p3485_p10), %s3446_s10, 16, %s949_s2, [#allocation20]  }
  0xbc   : > { %p3838_p4 = scmp.ne.s32.totalorder %s3835_s1, 0 }
  0xbd   : > { %p3839_p5 = scmp.eq.s32.totalorder (!%p3838_p4), %s3470_s29, 0 }
  0xbe   : > { %974 = sbr.rel (%p3838_p4) target bundleno = 4633 (0x1219), region = 144 }
  0xc3   : > { %3205 = dma.done.wait (%p3839_p5), [#allocation6], 512   ;;  %p3840_p6 = pmov %p3839_p5 }
  0xc4   : > { %p3841_p11 = pmov %p3839_p5 }
  0xc5   : > { %3207 = vsyncadd (%p3840_p6), [#allocation6], 4294966784 }
  0xc6   : > { %3209 = dma.done.wait (%p3841_p11), [#allocation8], 528   ;;  %p3842_p7 = pmov %p3839_p5 }
  0xc7   : > { %p3843_p8 = pmov %p3839_p5 }
  0xc8   : > { %3211 = vsyncadd (%p3842_p7), [#allocation8], 4294966768 }
  0xc9   : > { %3213 = dma.done.wait (%p3843_p8), [#allocation11], 144   ;;  %p3844_p10 = pmov %p3839_p5 }
  0xca   : > { %p3845_p12 = pmov %p3839_p5 }
  0xcb   : > { %3215 = vsyncadd (%p3844_p10), [#allocation11], 4294967152 }
  0xcc   : > { %3217 = dma.done.wait (%p3845_p12), [#allocation14], 528   ;;  %p3846_p13 = pmov %p3839_p5 }
  0xcd   : > { %p3847_p9 = pmov %p3839_p5 }
  0xce   : > { %3219 = vsyncadd (%p3846_p13), [#allocation14], 4294966768 }
  0xcf   : > { %3221 = dma.done.wait (%p3847_p9), [#allocation17], 528   ;;  %p3848_p0 = pmov %p3839_p5 }
  0xd1   : > { %3223 = vsyncadd (%p3848_p0), [#allocation17], 4294966768  ;;  %p3849_p1 = pmov %p3848_p0 }
  0xd2   : > { %p3850_p2 = pmov %p3848_p0 }
  0xd3   : > { %3225 = dma.done.wait (%p3849_p1), [#allocation20], 16  }
  0xd4   : > { %3227 = vsyncadd (%p3850_p2), [#allocation20], 4294967280  ;;  %p1088_p3 = scmp.lt.s32.totalorder %s3470_s29, 1  ;;  %vm1114_vm0 = vcmask 261120   ;;  %v1102_v7 = vld [vmem:[%s3321_s21 + $0x10] sm:$0xff]  ;;  %v1103_v8 = vld [vmem:[%s3321_s21 + $0x18] sm:$0xff] }
  0xd5   : > { %v1100_v9 = vld [vmem:[%s3321_s21] sm:$0xff]  ;;  %v3277_v10 = vmov 0.0   ;;  %v1145_v11 = vpack.c.bf16 %v1103_v8, %v1102_v7  ;;  %v1101_v12 = vld [vmem:[%s3321_s21 + $0x8] sm:$0xff]  ;;  %vm3278_vm1 = vmmov 0   ;;  %s3851_s26 = sld [smem:[#allocation29_spill]]  ;;  %vm1213_vm2 = vcmask 523264  }
  0xd6   : > { %s3600_s1 = scalar_select %p1088_p3, %s3470_s29, 1  ;;  %2604 = vmatprep.subr.bf16.mxu1 %v3277_v10  ;;  %1975 = vst.msk [vmem:[#allocation2] sm:$0xff] %vm1114_vm0, %v3277_v10  ;;  %1976 = vst.msk [vmem:[#allocation2 + $0x8] sm:$0xff] %vm1114_vm0, %v3277_v10  ;;  %2608 = vmatprep.mubr.msk.bf16.mxu1 %vm3278_vm1, %v3277_v10  ;;  %v1144_v13 = vpack.c.bf16 %v1101_v12, %v1100_v9  ;;  %v2517_v18 = vld [vmem:[%s3311_s13] ss:$0 sm:$0xff]  ;;  %vm1354_vm3 = vcmask 64512  }
  0xd7   : > { %1977 = vst.msk [vmem:[#allocation2 + $0x10] sm:$0xff] %vm1114_vm0, %v3277_v10  ;;  %2624 = vmatprep.subr.bf16.mxu0 %v3277_v10  ;;  %2628 = vmatprep.mubr.msk.bf16.mxu0 %vm3278_vm1, %v3277_v10  ;;  %v2518_v20 = vld [vmem:[%s3316_s17] ss:$0 sm:$0xff]  ;;  %s3852_s11 = sld [smem:[#allocation28_spill]]  ;;  %s3279_s7 = smov 88   ;;  %vm1422_vm5 = vcmask 1043456  }
  0xd8   : > { %s2515_s19 = sshll.u32 %s3600_s1, 3  ;;  %2605 = vmatpush3.bf16.msra.mxu1 %v1145_v11  ;;  %s3853_s18 = sld [smem:[#allocation30_spill]]  ;;  %vm1815_vm6 = vcmask 130048   ;;  %vm1817_vm7 = vcmask 195584  }
  0xd9   : > { %s1091_s28 = scalar_lea.vmem %s3306_s9, %s2515_s19  ;;  %2606 = vmatprep.subr.bf16.mxu1 %v3277_v10  ;;  %s3854_s5 = sld [smem:[#allocation33_spill]] }
  0xda   : > { %v3606_v0 = vld [vmem:[%s1091_s28] sm:$0xff]  ;;  %s3855_s2 = sld [smem:[#allocation31_spill]]  ;;  %s3280_s15 = smov 96  }
  0xdb   : > { %v1115_v1 = vsel %vm1114_vm0, %v3606_v0, 0.0  ;;  %v1111_v24 = vld [vmem:[%s3851_s26 + $0x30] sm:$0xff]  ;;  %v1112_v25 = vld [vmem:[%s3851_s26 + $0x38] sm:$0xff]  ;;  %v1109_v27 = vld [vmem:[%s3851_s26 + $0x20] sm:$0xff]  ;;  %s3856_s6 = sld [smem:[#allocation32_spill]]  ;;  %s3281_s28 = smov 120  }
  0xdc   : > { %1116 = vadd.xlane.f32.xlu0 %v1115_v1  ;;  %2607 = vmatpush3.bf16.msra.mxu1 %v1144_v13  ;;  %v1206_v26 = vpack.c.bf16 %v1112_v25, %v1111_v24  ;;  %v1110_v28 = vld [vmem:[%s3851_s26 + $0x28] sm:$0xff]  ;;  %v1107_v30 = vld [vmem:[%s3851_s26 + $0x10] sm:$0xff]  ;;  %v1108_v31 = vld [vmem:[%s3851_s26 + $0x18] sm:$0xff]  ;;  %s3857_s8 = sld [smem:[#allocation34_spill]] }
  0xdd   : > { %2612 = vmatprep.subr.bf16.mxu1 %v3277_v10  ;;  %v1205_v29 = vpack.c.bf16 %v1110_v28, %v1109_v27  ;;  %v1204_v32 = vpack.c.bf16 %v1108_v31, %v1107_v30  ;;  %v1105_v33 = vld [vmem:[%s3851_s26] sm:$0xff]  ;;  %v1106_v34 = vld [vmem:[%s3851_s26 + $0x8] sm:$0xff] }
  0xde   : > { %v1203_v35 = vpack.c.bf16 %v1106_v34, %v1105_v33  ;;  %v2519_v36 = vld [vmem:[%s3852_s11] ss:$0 sm:$0xff]  ;;  %s3282_s11 = smov 112   ;;  %v1346_v33 = vlaneseq }
  0xdf   : > { %v2522_v48 = vld [vmem:[%s3853_s18] ss:$0 sm:$0xff]  ;;  %v1290_v62 = vld [vmem:[%s3854_s5 + $0x10] sm:$0xff]  ;;  %v1291_v63 = vld [vmem:[%s3854_s5 + $0x18] sm:$0xff]  ;;  %s3283_s18 = smov 80  }
  0xe0   : > { %v1288_v1 = vld [vmem:[%s3854_s5] sm:$0xff]  ;;  %v1347_v34 = vand.u32 127, %v1346_v33 }
  0xe1   : > { %v2524_v8 = vld [vmem:[%s3855_s2] ss:$0 sm:$0xff]  ;;  %s3284_s2 = smov 104  }
  0xe2   : > { %v2525_v11 = vld [vmem:[%s3856_s6] ss:$0 sm:$0xff]  ;;  %s3285_s6 = smov 72  }
 0x165   : > { %v1117_v2 = vpop.xlane.xlu0 %1116 }
 0x166   : > { %v1119_v3 = vmul.f32 0.03125, %v1117_v2  ;;  %v1289_v2 = vld [vmem:[%s3854_s5 + $0x8] sm:$0xff] }
 0x168   : > { %v1120_v4 = vsub.f32 %v3606_v0, %v1119_v3  ;;  %v1293_v3 = vpack.c.bf16 %v1289_v2, %v1288_v1 }
 0x16a   : > { %v1121_v5 = vmul.f32 %v1120_v4, %v1120_v4 }
 0x16c   : > { %v1122_v6 = vsel %vm1114_vm0, %v1121_v5, 0.0 }
 0x16d   : > { %1123 = vadd.xlane.f32.xlu0 %v1122_v6 }
 0x1f6   : > { %v1124_v14 = vpop.xlane.xlu0 %1123 }
 0x1f7   : > { %v1125_v15 = vmul.f32 0.03125, %v1124_v14 }
 0x1f9   : > { %v1126_v16 = vadd.f32 1e-05, %v1125_v15  ;;  %v2526_v15 = vld [vmem:[%s3857_s8] ss:$0 sm:$0xff]  ;;  %s1345_s8 = sld [smem:[#allocation4 + %s3470_s29]]  ;;  %s3286_s29 = smov 64  }
 0x1fb   : > { %2884 = vrsqrt.f32 %v1126_v16 }
 0x208   : > { %v2885_v17 = vpop.eup %2884 }
 0x209   : > { %v1128_v19 = vmul.f32 %v2885_v17, %v1120_v4 }
 0x20b   : > { %v1135_v21 = vmul.f32 %v2517_v18, %v1128_v19 }
 0x20d   : > { %v1142_v22 = vadd.f32 %v2518_v20, %v1135_v21 }
 0x20f   : > { %v1143_v23 = vpack.c.bf16 %v1142_v22, %v1142_v22 }
 0x211   : > { %2609 = vmatmul.mubr.msk.bf16.vlgmr.msra.gmra.mxu1 %vm1114_vm0, %v1143_v23 }
 0x212   : > { %2620 = vmatprep.mubr.msk.bf16.mxu1 %vm3278_vm1, %v3277_v10  ;;  %2613 = vmatpush3.bf16.msra.mxu1 %v1206_v26 }
 0x213   : > { %2614 = vmatprep.subr.bf16.mxu1 %v3277_v10 }
 0x216   : > { %2615 = vmatpush3.bf16.msra.mxu1 %v1205_v29 }
 0x217   : > { %2616 = vmatprep.subr.bf16.mxu1 %v3277_v10 }
 0x21a   : > { %2617 = vmatpush3.bf16.msra.mxu1 %v1204_v32 }
 0x21b   : > { %2618 = vmatprep.subr.bf16.mxu1 %v3277_v10 }
 0x21e   : > { %2619 = vmatpush3.bf16.msra.mxu1 %v1203_v35  ;;  %v1348_v35 = vstv %s1345_s8  ;;  %s3860_s8 = sld [smem:[#allocation35_spill]] }
 0x21f   : > { %2638 = vmatprep.subr.bf16.mxu1 %v3277_v10  ;;  %vm3704_vm4 = vcmp.ge.s32.totalorder %v1347_v34, %v1348_v35 }
 0x2d1   : > { %v1189_v37 = vpop.f32.mrf.mxu1 }
 0x2d2   : > { %v1190_v38 = vadd.f32 %v2519_v36, %v1189_v37 }
 0x2d3   : > { %v2610_v39 = vpop.f32.mrf.mxu1 }
 0x2d4   : > { %v2521_v40 = vmul.f32 -1.442695, %v1190_v38 }
 0x2d5   : > { %v1192_v41 = vpop.f32.mrf.mxu1 }
 0x2d6   : > { %2886 = vpow2.f32 %v2521_v40 }
 0x2d7   : > { %v2611_v42 = vpop.f32.mrf.mxu1 }
 0x2e3   : > { %v2887_v43 = vpop.eup %2886 }
 0x2e4   : > { %v1198_v44 = vadd.f32 1.0, %v2887_v43 }
 0x2e6   : > { %2888 = vrcp.f32 %v1198_v44 }
 0x2f3   : > { %v2889_v45 = vpop.eup %2888 }
 0x2f4   : > { %v1201_v46 = vmul.f32 %v2889_v45, %v1190_v38 }
 0x2f6   : > { %v1202_v47 = vpack.c.bf16 %v1201_v46, %v1201_v46 }
 0x2f8   : > { %2621 = vmatmul.mubr.msk.bf16.vlgmr.msra.gmra.mxu1 %vm1213_vm2, %v1202_v47 }
 0x2f9   : > { %2640 = vmatprep.mubr.msk.bf16.mxu1 %vm3278_vm1, %v3277_v10 }
 0x3b8   : > { %v1251_v49 = vpop.f32.mrf.mxu1 }
 0x3b9   : > { %v1252_v50 = vadd.f32 %v2522_v48, %v1251_v49 }
 0x3ba   : > { %v2622_v51 = vpop.f32.mrf.mxu1 }
 0x3bb   : > { %v1257_v52 = vmul.f32 0.5, %v1252_v50 }
 0x3bc   : > { %v1254_v53 = vpop.f32.mrf.mxu1 }
 0x3bd   : > { %v3653_v54 = vadd.f32 %v1257_v52, %v3606_v0  ;;  %v1294_v0 = vpack.c.bf16 %v1291_v63, %v1290_v62 }
 0x3be   : > { %v2623_v55 = vpop.f32.mrf.mxu1 }
 0x3bf   : > { %v1261_v56 = vsel %vm1114_vm0, %v3653_v54, 0.0  ;;  %2625 = vmatpush3.bf16.msra.mxu0 %v1294_v0 }
 0x3c0   : > { %1262 = vadd.xlane.f32.xlu1 %v1261_v56  ;;  %2626 = vmatprep.subr.bf16.mxu0 %v3277_v10 }
 0x3c3   : > { %2627 = vmatpush3.bf16.msra.mxu0 %v1293_v3 }
 0x3c4   : > { %2632 = vmatprep.subr.bf16.mxu0 %v3277_v10 }
 0x449   : > { %v1263_v57 = vpop.xlane.xlu1 %1262 }
 0x44a   : > { %v1264_v58 = vmul.f32 0.03125, %v1263_v57 }
 0x44c   : > { %v1265_v59 = vsub.f32 %v3653_v54, %v1264_v58 }
 0x44e   : > { %v1266_v60 = vmul.f32 %v1265_v59, %v1265_v59 }
 0x450   : > { %v1267_v61 = vsel %vm1114_vm0, %v1266_v60, 0.0 }
 0x451   : > { %1268 = vadd.xlane.f32.xlu1 %v1267_v61 }
 0x4da   : > { %v1269_v4 = vpop.xlane.xlu1 %1268 }
 0x4db   : > { %v1270_v5 = vmul.f32 0.03125, %v1269_v4 }
 0x4dd   : > { %v1271_v6 = vadd.f32 1e-05, %v1270_v5 }
 0x4df   : > { %2890 = vrsqrt.f32 %v1271_v6 }
 0x4ec   : > { %v2891_v7 = vpop.eup %2890 }
 0x4ed   : > { %v1273_v9 = vmul.f32 %v2891_v7, %v1265_v59 }
 0x4ef   : > { %v1280_v12 = vmul.f32 %v2524_v8, %v1273_v9 }
 0x4f1   : > { %v1287_v13 = vadd.f32 %v2525_v11, %v1280_v12 }
 0x4f3   : > { %v1292_v14 = vpack.c.bf16 %v1287_v13, %v1287_v13 }
 0x4f5   : > { %2629 = vmatmul.mubr.msk.bf16.vlgmr.msra.gmra.mxu0 %vm1114_vm0, %v1292_v14 }
 0x4f6   : > { %2634 = vmatprep.mubr.msk.bf16.mxu0 %vm3278_vm1, %v3277_v10 }
 0x5b5   : > { %v1339_v16 = vpop.f32.mrf.mxu0 }
 0x5b6   : > { %v1340_v17 = vadd.f32 %v2526_v15, %v1339_v16 }
 0x5b7   : > { %v2630_v18 = vpop.f32.mrf.mxu0 }
 0x5b8   : > { %v3671_v19 = vpack.c.bf16 %v1340_v17, %v1340_v17 }
 0x5b9   : > { %v1342_v20 = vpop.f32.mrf.mxu0 }
 0x5ba   : > { %1468 = vrot.lane.b32.xlu1 %v3671_v19, %s3279_s7  ;;  %1352 = vrot.lane.b32.xlu0 %v3671_v19, %s3280_s15  ;;  %s3287_s7 = smov 56  }
 0x5bb   : > { %v2631_v21 = vpop.f32.mrf.mxu0 }
 0x5be   : > { %1466 = vrot.lane.b32.xlu1 %v3671_v19, %s3281_s28  ;;  %1578 = vrot.lane.b32.xlu0 %v3671_v19, %s3282_s11  ;;  %s3288_s28 = smov 48   ;;  %s3289_s11 = smov 40  }
 0x5c2   : > { %1580 = vrot.lane.b32.xlu1 %v3671_v19, %s3283_s18  ;;  %1690 = vrot.lane.b32.xlu0 %v3671_v19, %s3284_s2  ;;  %s3290_s18 = smov 8   ;;  %s3291_s2 = smov 16  }
 0x5c6   : > { %1692 = vrot.lane.b32.xlu1 %v3671_v19, %s3285_s6  ;;  %s3292_s6 = smov 24  }
 0x62c   : > { %v1353_v22 = vpop.permute.xlu0 %1352  ;;  %v1469_v24 = vpop.permute.xlu1 %1468 }
 0x62d   : > { %v1359_v23 = vsel %vm1354_vm3, %v1353_v22, 0  ;;  %v1474_v26 = vsel %vm1354_vm3, %v1469_v24, 0 }
 0x62e   : > { %2633 = vmatpush3.bf16.xpose.msra.mxu0 %v1359_v23 }
 0x62f   : > { %2644 = vmatprep.subr.bf16.mxu0 %v3277_v10 }
 0x630   : > { %v1467_v25 = vpop.permute.xlu1 %1466  ;;  %v1579_v30 = vpop.permute.xlu0 %1578 }
 0x634   : > { %v1581_v27 = vpop.permute.xlu1 %1580  ;;  %v1691_v32 = vpop.permute.xlu0 %1690 }
 0x635   : > { %2635 = vmatmul.mubr.msk.bf16.vlgmr.msra.gmra.mxu0 %vm1354_vm3, %v3671_v19  ;;  %v1586_v28 = vsel %vm1354_vm3, %v1581_v27, 0 }
 0x636   : > { %2645 = vmatpush3.bf16.xpose.msra.mxu0 %v1474_v26  ;;  %2646 = vmatprep.mubr.msk.bf16.mxu0 %vm3278_vm1, %v3277_v10 }
 0x637   : > { %2656 = vmatprep.subr.bf16.mxu0 %v3277_v10 }
 0x638   : > { %v1693_v29 = vpop.permute.xlu1 %1692 }
 0x639   : > { %v1698_v31 = vsel %vm1354_vm3, %v1693_v29, 0 }
 0x63d   : > { %2647 = vmatmul.mubr.msk.bf16.vlgmr.msra.gmra.mxu0 %vm1354_vm3, %v1467_v25 }
 0x63e   : > { %2657 = vmatpush3.bf16.xpose.msra.mxu0 %v1586_v28  ;;  %2658 = vmatprep.mubr.msk.bf16.mxu0 %vm3278_vm1, %v3277_v10 }
 0x63f   : > { %2668 = vmatprep.subr.bf16.mxu0 %v3277_v10 }
 0x645   : > { %2659 = vmatmul.mubr.msk.bf16.vlgmr.msra.gmra.mxu0 %vm1354_vm3, %v1579_v30 }
 0x646   : > { %2669 = vmatpush3.bf16.xpose.msra.mxu0 %v1698_v31  ;;  %2670 = vmatprep.mubr.msk.bf16.mxu0 %vm3278_vm1, %v3277_v10 }
 0x647   : > { %2680 = vmatprep.subr.bf16.mxu0 %v3277_v10 }
 0x64d   : > { %2671 = vmatmul.mubr.msk.bf16.vlgmr.msra.gmra.mxu0 %vm1354_vm3, %v1691_v32 }
 0x64e   : > { %2684 = vmatprep.mubr.msk.bf16.mxu0 %vm3278_vm1, %v3277_v10 }
 0x6f5   : > { %v1395_v36 = vpop.f32.mrf.mxu0 }
 0x6f6   : > { %v1401_v38 = vmul.f32 0.35355338, %v1395_v36 }
 0x6f7   : > { %v2636_v39 = vpop.f32.mrf.mxu0 }
 0x6f8   : > { %v1404_v40 = vsel %vm3704_vm4, -1e+09, %v1401_v38 }
 0x6f9   : > { %v1398_v41 = vpop.f32.mrf.mxu0  ;;  %v1405_v42 = vsel %vm1354_vm3, %v1404_v40, -inf }
 0x6fa   : > { %1406 = vmax.xlane.f32.xlu1 %v1405_v42 }
 0x6fb   : > { %v2637_v43 = vpop.f32.mrf.mxu0 }
 0x6fd   : > { %v1510_v44 = vpop.f32.mrf.mxu0 }
 0x6fe   : > { %v1516_v45 = vmul.f32 0.35355338, %v1510_v44 }
 0x6ff   : > { %v2648_v46 = vpop.f32.mrf.mxu0 }
 0x700   : > { %v1517_v47 = vsel %vm3704_vm4, -1e+09, %v1516_v45 }
 0x701   : > { %v1513_v48 = vpop.f32.mrf.mxu0  ;;  %v1518_v49 = vsel %vm1354_vm3, %v1517_v47, -inf }
 0x702   : > { %1519 = vmax.xlane.f32.xlu0 %v1518_v49 }
 0x703   : > { %v2649_v50 = vpop.f32.mrf.mxu0 }
 0x705   : > { %v1622_v51 = vpop.f32.mrf.mxu0 }
 0x706   : > { %v1628_v52 = vmul.f32 0.35355338, %v1622_v51 }
 0x707   : > { %v2660_v53 = vpop.f32.mrf.mxu0 }
 0x708   : > { %v1629_v55 = vsel %vm3704_vm4, -1e+09, %v1628_v52 }
 0x709   : > { %v1625_v56 = vpop.f32.mrf.mxu0  ;;  %v1630_v57 = vsel %vm1354_vm3, %v1629_v55, -inf }
 0x70a   : > { %1631 = vmax.xlane.f32.xlu0 %v1630_v57  ;;  %v1821_v57 = vld [vmem:[#allocation5 + $0x10] sm:$0xff] }
 0x70b   : > { %v2661_v58 = vpop.f32.mrf.mxu0 }
 0x70c   : > { %v1822_v58 = vld [vmem:[#allocation5 + $0x18] sm:$0xff] }
 0x70d   : > { %v1734_v59 = vpop.f32.mrf.mxu0 }
 0x70e   : > { %v1740_v60 = vmul.f32 0.35355338, %v1734_v59  ;;  %v1825_v59 = vpack.c.bf16 %v1822_v58, %v1821_v57  ;;  %v2061_v58 = vld [vmem:[#allocation13 + $0x8] sm:$0xff] }
 0x70f   : > { %v2672_v61 = vpop.f32.mrf.mxu0 }
 0x710   : > { %v1741_v62 = vsel %vm3704_vm4, -1e+09, %v1740_v60  ;;  %2681 = vmatpush3.bf16.msra.mxu0 %v1825_v59  ;;  %v1819_v60 = vld [vmem:[#allocation5] sm:$0xff]  ;;  %v1820_v61 = vld [vmem:[#allocation5 + $0x8] sm:$0xff] }
 0x711   : > { %v1737_v63 = vpop.f32.mrf.mxu0  ;;  %v1742_v1 = vsel %vm1354_vm3, %v1741_v62, -inf  ;;  %2682 = vmatprep.subr.bf16.mxu0 %v3277_v10 }
 0x712   : > { %1743 = vmax.xlane.f32.xlu0 %v1742_v1 }
 0x713   : > { %v2673_v0 = vpop.f32.mrf.mxu0 }
 0x783   : > { %v1407_v2 = vpop.xlane.xlu1 %1406 }
 0x784   : > { %v1408_v3 = vsub.f32 %v1404_v40, %v1407_v2 }
 0x786   : > { %v1409_v4 = vmul.f32 1.442695, %v1408_v3 }
 0x788   : > { %2892 = vpow2.f32 %v1409_v4 }
 0x78b   : > { %v1520_v5 = vpop.xlane.xlu0 %1519 }
 0x78c   : > { %v1521_v6 = vsub.f32 %v1517_v47, %v1520_v5 }
 0x78e   : > { %v1522_v7 = vmul.f32 1.442695, %v1521_v6 }
 0x790   : > { %2894 = vpow2.f32 %v1522_v7 }
 0x793   : > { %v1632_v11 = vpop.xlane.xlu0 %1631 }
 0x794   : > { %v1633_v20 = vsub.f32 %v1629_v55, %v1632_v11 }
 0x795   : > { %v2893_v8 = vpop.eup %2892 }
 0x796   : > { %v1411_v9 = vsel %vm1354_vm3, %v2893_v8, 0.0  ;;  %v1634_v21 = vmul.f32 1.442695, %v1633_v20 }
 0x797   : > { %1412 = vadd.xlane.f32.xlu1 %v1411_v9 }
 0x79b   : > { %v1744_v12 = vpop.xlane.xlu0 %1743 }
 0x79c   : > { %v1745_v13 = vsub.f32 %v1741_v62, %v1744_v12  ;;  %v1824_v62 = vpack.c.bf16 %v1820_v61, %v1819_v60  ;;  %v1982_v61 = vshrl.u32 %v1346_v33, 7 }
 0x79d   : > { %v2895_v14 = vpop.eup %2894 }
 0x79e   : > { %v1746_v15 = vmul.f32 1.442695, %v1745_v13  ;;  %v1524_v16 = vsel %vm1354_vm3, %v2895_v14, 0.0  ;;  %2683 = vmatpush3.bf16.msra.mxu0 %v1824_v62  ;;  %v2018_v33 = vsub.s32 5, %v1982_v61 }
 0x79f   : > { %1525 = vadd.xlane.f32.xlu0 %v1524_v16  ;;  %2696 = vmatprep.subr.bf16.mxu0 %v3277_v10  ;;  %v2537_v16 = vld [vmem:[%s3860_s8] ss:$0 sm:$0xff] }
 0x7a0   : > { %2896 = vpow2.f32 %v1746_v15 }
 0x7a1   : > { %2898 = vpow2.f32 %v1634_v21 }
 0x7a8   : > { %1417 = vrot.lane.b32.xlu1 %v3671_v19, %s3286_s29  ;;  %s3861_s29 = sld [smem:[#allocation36_spill]] }
 0x7ad   : > { %v2897_v17 = vpop.eup %2896 }
 0x7ae   : > { %v1748_v18 = vsel %vm1354_vm3, %v2897_v17, 0.0  ;;  %v2899_v22 = vpop.eup %2898 }
 0x7af   : > { %1749 = vadd.xlane.f32.xlu0 %v1748_v18  ;;  %v1636_v23 = vsel %vm1354_vm3, %v2899_v22, 0.0 }
 0x7c5   : > { %1530 = vrot.lane.b32.xlu0 %v3671_v19, %s3287_s7  ;;  %s3862_s7 = sld [smem:[#allocation37_spill]] }
 0x7cc   : > { %1637 = vadd.xlane.f32.xlu1 %v1636_v23 }
 0x7dd   : > { %1642 = vrot.lane.b32.xlu1 %v3671_v19, %s3288_s28  ;;  %s3864_s28 = sld [smem:[#allocation39_spill]] }
 0x7e1   : > { %1754 = vrot.lane.b32.xlu1 %v3671_v19, %s3289_s11  ;;  %s3865_s11 = sld [smem:[#allocation40_spill]] }
 0x820   : > { %v1413_v24 = vpop.xlane.xlu1 %1412 }
 0x821   : > { %2900 = vrcp.f32 %v1413_v24 }
 0x824   : > { %v1418_v25 = vpop.permute.xlu1 %1417 }
 0x825   : > { %v1424_v26 = vsel %vm1422_vm5, %v1418_v25, 0 }
 0x826   : > { %2639 = vmatpush3.bf16.msra.mxu1 %v1424_v26 }
 0x827   : > { %2650 = vmatprep.subr.bf16.mxu1 %v3277_v10 }
 0x828   : > { %v1526_v27 = vpop.xlane.xlu0 %1525 }
 0x829   : > { %2902 = vrcp.f32 %v1526_v27 }
 0x82e   : > { %v2901_v28 = vpop.eup %2900 }
 0x82f   : > { %v1415_v29 = vmul.f32 %v2901_v28, %v2893_v8 }
 0x831   : > { %v1416_v30 = vpack.c.bf16 %v1415_v29, %v1415_v29  ;;  %v1909_v29 = vld [vmem:[#allocation7 + $0x10] sm:$0xff] }
 0x833   : > { %2641 = vmatmul.mubr.msk.bf16.vlgmr.msra.gmra.mxu1 %vm1354_vm3, %v1416_v30 }
 0x834   : > { %2652 = vmatprep.mubr.msk.bf16.mxu1 %vm3278_vm1, %v3277_v10 }
 0x836   : > { %v2903_v19 = vpop.eup %2902 }
 0x837   : > { %v1528_v32 = vmul.f32 %v2903_v19, %v2895_v14  ;;  %v1907_v19 = vld [vmem:[#allocation7] sm:$0xff] }
 0x838   : > { %v1750_v31 = vpop.xlane.xlu0 %1749 }
 0x839   : > { %v1529_v36 = vpack.c.bf16 %v1528_v32, %v1528_v32 }
 0x83c   : > { %v1531_v34 = vpop.permute.xlu0 %1530 }
 0x83d   : > { %v1536_v35 = vsel %vm1422_vm5, %v1531_v34, 0 }
 0x83e   : > { %2651 = vmatpush3.bf16.msra.mxu1 %v1536_v35 }
 0x83f   : > { %2662 = vmatprep.subr.bf16.mxu1 %v3277_v10 }
 0x841   : > { %2653 = vmatmul.mubr.msk.bf16.vlgmr.msra.gmra.mxu1 %vm1354_vm3, %v1529_v36 }
 0x842   : > { %2664 = vmatprep.mubr.msk.bf16.mxu1 %vm3278_vm1, %v3277_v10 }
 0x855   : > { %v1638_v37 = vpop.xlane.xlu1 %1637 }
 0x856   : > { %2904 = vrcp.f32 %v1638_v37 }
 0x857   : > { %2906 = vrcp.f32 %v1750_v31  ;;  %v1908_v31 = vld [vmem:[#allocation7 + $0x8] sm:$0xff] }
 0x858   : > { %v1912_v32 = vpack.c.bf16 %v1908_v31, %v1907_v19 }
 0x859   : > { %v1643_v38 = vpop.permute.xlu1 %1642 }
 0x85a   : > { %v1648_v39 = vsel %vm1422_vm5, %v1643_v38, 0  ;;  %v2538_v38 = vld [vmem:[%s3861_s29] ss:$0 sm:$0xff] }
 0x85b   : > { %2663 = vmatpush3.bf16.msra.mxu1 %v1648_v39 }
 0x85c   : > { %2674 = vmatprep.subr.bf16.mxu1 %v3277_v10 }
 0x85d   : > { %v1755_v42 = vpop.permute.xlu1 %1754 }
 0x85e   : > { %v1760_v45 = vsel %vm1422_vm5, %v1755_v42, 0 }
 0x863   : > { %v2905_v40 = vpop.eup %2904 }
 0x864   : > { %v1640_v41 = vmul.f32 %v2905_v40, %v2899_v22  ;;  %v2907_v44 = vpop.eup %2906  ;;  %v2539_v40 = vld [vmem:[%s3862_s7] ss:$0 sm:$0xff] }
 0x865   : > { %v1752_v46 = vmul.f32 %v2907_v44, %v2897_v17  ;;  %v2540_v44 = vld [vmem:[#allocation9] ss:$0 sm:$0xff] }
 0x866   : > { %v1641_v43 = vpack.c.bf16 %v1640_v41, %v1640_v41 }
 0x867   : > { %v1753_v47 = vpack.c.bf16 %v1752_v46, %v1752_v46 }
 0x868   : > { %2665 = vmatmul.mubr.msk.bf16.vlgmr.msra.gmra.mxu1 %vm1354_vm3, %v1641_v43 }
 0x869   : > { %2675 = vmatpush3.bf16.msra.mxu1 %v1760_v45  ;;  %2676 = vmatprep.mubr.msk.bf16.mxu1 %vm3278_vm1, %v3277_v10 }
 0x86a   : > { %2688 = vmatprep.subr.bf16.mxu1 %v3277_v10 }
 0x870   : > { %2677 = vmatmul.mubr.msk.bf16.vlgmr.msra.gmra.mxu1 %vm1354_vm3, %v1753_v47 }
 0x871   : > { %2692 = vmatprep.mubr.msk.bf16.mxu1 %vm3278_vm1, %v3277_v10 }
 0x8f3   : > { %v1460_v48 = vpop.f32.mrf.mxu1 }
 0x8f5   : > { %v2642_v49 = vpop.f32.mrf.mxu1 }
 0x8f7   : > { %v1463_v50 = vpop.f32.mrf.mxu1 }
 0x8f9   : > { %v2643_v51 = vpop.f32.mrf.mxu1 }
 0x901   : > { %v1572_v52 = vpop.f32.mrf.mxu1 }
 0x902   : > { %1803 = vrot.lane.b32.xlu1 %v1572_v52, %s3290_s18  ;;  %s3866_s18 = sld [smem:[#allocation41_spill]] }
 0x903   : > { %v2654_v53 = vpop.f32.mrf.mxu1 }
 0x904   : > { %v2062_v53 = vld [vmem:[#allocation13 + $0x10] sm:$0xff] }
 0x905   : > { %v1575_v55 = vpop.f32.mrf.mxu1 }
 0x906   : > { %v2063_v55 = vld [vmem:[#allocation13 + $0x18] sm:$0xff] }
 0x907   : > { %v2655_v56 = vpop.f32.mrf.mxu1  ;;  %v2066_v57 = vpack.c.bf16 %v2063_v55, %v2062_v53 }
 0x908   : > { %v2060_v56 = vld [vmem:[#allocation13] sm:$0xff] }
 0x909   : > { %v2065_v59 = vpack.c.bf16 %v2061_v58, %v2060_v56 }
 0x928   : > { %v1684_v63 = vpop.f32.mrf.mxu1 }
 0x929   : > { %1807 = vrot.lane.b32.xlu0 %v1684_v63, %s3291_s2  ;;  %s3867_s2 = sld [smem:[#allocation42_spill]] }
 0x92a   : > { %v2666_v1 = vpop.f32.mrf.mxu1 }
 0x92b   : > { %v1983_v1 = vsub.s32 0, %v1982_v61 }
 0x92c   : > { %v1687_v0 = vpop.f32.mrf.mxu1 }
 0x92d   : > { %v1990_v0 = vsub.s32 1, %v1982_v61 }
 0x92e   : > { %v2667_v2 = vpop.f32.mrf.mxu1 }
 0x92f   : > { %v1979_v2 = vld [vmem:[#allocation10] sm:$0x7f] }
 0x930   : > { %v1796_v3 = vpop.f32.mrf.mxu1 }
 0x931   : > { %1811 = vrot.lane.b32.xlu1 %v1796_v3, %s3292_s6  ;;  %v1997_v3 = vsub.s32 2, %v1982_v61  ;;  %s1095_s6 = scalar_lea.vmem %s3462_s24, %s2515_s19 }
 0x932   : > { %v2678_v4 = vpop.f32.mrf.mxu1 }
 0x933   : > { %v1984_v4 = vrot.slane %v1979_v2, %v1983_v1 }
 0x934   : > { %v1799_v5 = vpop.f32.mrf.mxu1 }
 0x935   : > { %v1991_v5 = vrot.slane %v1979_v2, %v1990_v0  ;;  %v2122_v0 = vld [vmem:[#allocation16 + $0x8] sm:$0xff] }
 0x936   : > { %v2679_v6 = vpop.f32.mrf.mxu1 }
 0x937   : > { %v2004_v6 = vsub.s32 3, %v1982_v61 }
 0x974   : > { %v1804_v7 = vpop.permute.xlu1 %1803 }
 0x975   : > { %v1814_v9 = vsel %vm1354_vm3, %v1460_v48, %v1804_v7  ;;  %v1998_v7 = vrot.slane %v1979_v2, %v1997_v3 }
 0x99b   : > { %v1808_v8 = vpop.permute.xlu0 %1807 }
 0x99c   : > { %v1816_v11 = vsel %vm1815_vm6, %v1814_v9, %v1808_v8  ;;  %v2011_v8 = vsub.s32 4, %v1982_v61 }
 0x9a3   : > { %v1812_v12 = vpop.permute.xlu1 %1811 }
 0x9a4   : > { %v1818_v13 = vsel %vm1817_vm7, %v1816_v11, %v1812_v12 }
 0x9a5   : > { %v1823_v14 = vpack.c.bf16 %v1818_v13, %v1818_v13 }
 0x9a7   : > { %2685 = vmatmul.mubr.msk.bf16.vlgmr.msra.gmra.mxu0 %vm1114_vm0, %v1823_v14 }
 0x9a8   : > { %2700 = vmatprep.mubr.msk.bf16.mxu0 %vm3278_vm1, %v3277_v10  ;;  %2697 = vmatpush3.bf16.msra.mxu0 %v2066_v57 }
 0x9a9   : > { %2698 = vmatprep.subr.bf16.mxu0 %v3277_v10 }
 0x9ac   : > { %2699 = vmatpush3.bf16.msra.mxu0 %v2065_v59 }
 0x9ad   : > { %2712 = vmatprep.subr.bf16.mxu0 %v3277_v10 }
 0xa67   : > { %v1863_v15 = vpop.f32.mrf.mxu0 }
 0xa68   : > { %v1869_v17 = vadd.f32 %v1863_v15, %v3653_v54  ;;  %v1910_v54 = vld [vmem:[#allocation7 + $0x18] sm:$0xff]  ;;  %v2005_v15 = vrot.slane %v1979_v2, %v2004_v6 }
 0xa69   : > { %v2686_v18 = vpop.f32.mrf.mxu0  ;;  %v1913_v30 = vpack.c.bf16 %v1910_v54, %v1909_v29 }
 0xa6a   : > { %v3756_v20 = vadd.f32 %v2537_v16, %v1869_v17 }
 0xa6b   : > { %v1866_v21 = vpop.f32.mrf.mxu0  ;;  %2689 = vmatpush3.bf16.msra.mxu1 %v1913_v30 }
 0xa6c   : > { %v1880_v22 = vsel %vm1114_vm0, %v3756_v20, 0.0  ;;  %2690 = vmatprep.subr.bf16.mxu1 %v3277_v10  ;;  %v2012_v21 = vrot.slane %v1979_v2, %v2011_v8 }
 0xa6d   : > { %1881 = vadd.xlane.f32.xlu0 %v1880_v22  ;;  %v2687_v23 = vpop.f32.mrf.mxu0  ;;  %v2025_v22 = vsub.s32 6, %v1982_v61 }
 0xa6f   : > { %2691 = vmatpush3.bf16.msra.mxu1 %v1912_v32  ;;  %v2026_v54 = vrot.slane %v1979_v2, %v2025_v22  ;;  %v2129_v22 = vld [vmem:[%s3867_s2 + $0x18] sm:$0xff] }
 0xa70   : > { %2704 = vmatprep.subr.bf16.mxu1 %v3277_v10 }
 0xaf6   : > { %v1882_v24 = vpop.xlane.xlu0 %1881 }
 0xaf7   : > { %v1883_v25 = vmul.f32 0.03125, %v1882_v24 }
 0xaf9   : > { %v1884_v26 = vsub.f32 %v3756_v20, %v1883_v25 }
 0xafb   : > { %v1885_v27 = vmul.f32 %v1884_v26, %v1884_v26 }
 0xafd   : > { %v1886_v28 = vsel %vm1114_vm0, %v1885_v27, 0.0 }
 0xafe   : > { %1887 = vadd.xlane.f32.xlu1 %v1886_v28 }
 0xb87   : > { %v1888_v34 = vpop.xlane.xlu1 %1887 }
 0xb88   : > { %v1889_v35 = vmul.f32 0.03125, %v1888_v34 }
 0xb8a   : > { %v1890_v36 = vadd.f32 1e-05, %v1889_v35  ;;  %v2543_v35 = vld [vmem:[#allocation12] ss:$0 sm:$0xff] }
 0xb8c   : > { %2908 = vrsqrt.f32 %v1890_v36 }
 0xb99   : > { %v2909_v37 = vpop.eup %2908 }
 0xb9a   : > { %v1892_v39 = vmul.f32 %v2909_v37, %v1884_v26  ;;  %v2019_v26 = vrot.slane %v1979_v2, %v2018_v33 }
 0xb9c   : > { %v1899_v41 = vmul.f32 %v2538_v38, %v1892_v39  ;;  %v2545_v39 = vld [vmem:[%s3864_s28] ss:$0 sm:$0xff] }
 0xb9e   : > { %v1906_v42 = vadd.f32 %v2539_v40, %v1899_v41 }
 0xba0   : > { %v1911_v43 = vpack.c.bf16 %v1906_v42, %v1906_v42 }
 0xba2   : > { %2693 = vmatmul.mubr.msk.bf16.vlgmr.msra.gmra.mxu1 %vm1114_vm0, %v1911_v43 }
 0xba3   : > { %2708 = vmatprep.mubr.msk.bf16.mxu1 %vm3278_vm1, %v3277_v10 }
 0xc62   : > { %v1958_v45 = vpop.f32.mrf.mxu1 }
 0xc63   : > { %v1959_v46 = vadd.f32 %v2540_v44, %v1958_v45 }
 0xc64   : > { %v2694_v47 = vpop.f32.mrf.mxu1 }
 0xc65   : > { %v2542_v48 = vmul.f32 -1.442695, %v1959_v46 }
 0xc66   : > { %v1961_v49 = vpop.f32.mrf.mxu1 }
 0xc67   : > { %2910 = vpow2.f32 %v2542_v48  ;;  %v2548_v49 = vld [vmem:[#allocation15] ss:$0 sm:$0xff] }
 0xc68   : > { %v2695_v50 = vpop.f32.mrf.mxu1 }
 0xc74   : > { %v2911_v51 = vpop.eup %2910 }
 0xc75   : > { %v1967_v52 = vadd.f32 1.0, %v2911_v51 }
 0xc77   : > { %2912 = vrcp.f32 %v1967_v52 }
 0xc84   : > { %v2913_v60 = vpop.eup %2912 }
 0xc85   : > { %1971 = vrot.lane.b32.xlu0 %v2913_v60, %s3280_s15  ;;  %s3863_s15 = sld [smem:[#allocation38_spill]] }
 0xc8b   : > { %v2544_v37 = vld [vmem:[%s3863_s15] ss:$0 sm:$0xff] }
 0xcf7   : > { %v1972_v62 = vpop.permute.xlu0 %1971 }
 0xcf8   : > { %v1974_v63 = vmul.f32 %v1972_v62, %v1959_v46  ;;  %v2123_v62 = vld [vmem:[#allocation16 + $0x10] sm:$0xff] }
 0xcfa   : > { %1978 = vst.msk [vmem:[#allocation2 + $0x8] sm:$0xff] %vm1114_vm0, %v1974_v63  ;;  %v2121_v63 = vld [vmem:[#allocation16] sm:$0xff] }
 0xcfb   : > { %v2163_v2 = vpack.c.bf16 %v2122_v0, %v2121_v63 }
 0xd01   : > { %v1980_v9 = vld [vmem:[#allocation2 + $0x5] sm:$0xff] }
 0xd02   : > { %v1987_v11 = vld [vmem:[#allocation2 + $0x6] sm:$0xff]  ;;  %v1985_v13 = vmul.f32 %v1984_v4, %v1980_v9  ;;  %v2550_v9 = vld [vmem:[%s3866_s18] ss:$0 sm:$0xff] }
 0xd03   : > { %v1994_v12 = vld [vmem:[#allocation2 + $0x7] sm:$0xff]  ;;  %v1992_v14 = vmul.f32 %v1991_v5, %v1987_v11 }
 0xd04   : > { %v2001_v16 = vld [vmem:[#allocation2 + $0x8] sm:$0xff]  ;;  %v1999_v18 = vmul.f32 %v1998_v7, %v1994_v12  ;;  %v2549_v7 = vld [vmem:[%s3865_s11] ss:$0 sm:$0xff] }
 0xd05   : > { %v1993_v17 = vadd.f32 %v1992_v14, %v1985_v13  ;;  %v2008_v23 = vld [vmem:[#allocation2 + $0x9] sm:$0xff]  ;;  %v2006_v25 = vmul.f32 %v2005_v15, %v2001_v16  ;;  %v2133_v15 = vld [vmem:[%s3867_s2 + $0x38] sm:$0xff]  ;;  %v2130_v16 = vld [vmem:[%s3867_s2 + $0x20] sm:$0xff] }
 0xd06   : > { %v2015_v27 = vld [vmem:[#allocation2 + $0xa] sm:$0xff]  ;;  %v2013_v29 = vmul.f32 %v2012_v21, %v2008_v23 }
 0xd07   : > { %v2000_v24 = vadd.f32 %v1999_v18, %v1993_v17  ;;  %v2022_v30 = vld [vmem:[#allocation2 + $0xb] sm:$0xff]  ;;  %v2020_v31 = vmul.f32 %v2019_v26, %v2015_v27  ;;  %v2551_v27 = vld [vmem:[#allocation18] ss:$0 sm:$0xff] }
 0xd08   : > { %v2027_v34 = vmul.f32 %v2026_v54, %v2022_v30  ;;  %v2132_v14 = vld [vmem:[%s3867_s2 + $0x30] sm:$0xff]  ;;  %v2131_v17 = vld [vmem:[%s3867_s2 + $0x28] sm:$0xff] }
 0xd09   : > { %v2007_v28 = vadd.f32 %v2006_v25, %v2000_v24  ;;  %v2225_v33 = vpack.c.bf16 %v2133_v15, %v2132_v14  ;;  %v2224_v18 = vpack.c.bf16 %v2131_v17, %v2130_v16  ;;  %v2128_v21 = vld [vmem:[%s3867_s2 + $0x10] sm:$0xff]  ;;  %v2126_v24 = vld [vmem:[%s3867_s2] sm:$0xff]  ;;  %v2127_v25 = vld [vmem:[%s3867_s2 + $0x8] sm:$0xff] }
 0xd0a   : > { %v2223_v23 = vpack.c.bf16 %v2129_v22, %v2128_v21  ;;  %v2222_v26 = vpack.c.bf16 %v2127_v25, %v2126_v24 }
 0xd0b   : > { %v2014_v19 = vadd.f32 %v2013_v29, %v2007_v28 }
 0xd0d   : > { %v2021_v32 = vadd.f32 %v2020_v31, %v2014_v19 }
 0xd0f   : > { %v2028_v36 = vadd.f32 %v2027_v34, %v2021_v32 }
 0xd11   : > { %v2036_v38 = vadd.f32 %v2543_v35, %v2028_v36 }
 0xd13   : > { %v2044_v40 = vmul.f32 %v2544_v37, %v2036_v38 }
 0xd15   : > { %v2052_v41 = vadd.f32 %v2545_v39, %v2044_v40 }
 0xd17   : > { %v2546_v42 = vmul.f32 -1.442695, %v2052_v41 }
 0xd19   : > { %2914 = vpow2.f32 %v2546_v42 }
 0xd26   : > { %v2915_v43 = vpop.eup %2914 }
 0xd27   : > { %v2056_v44 = vadd.f32 1.0, %v2915_v43 }
 0xd29   : > { %2916 = vrcp.f32 %v2056_v44 }
 0xd36   : > { %v2917_v45 = vpop.eup %2916 }
 0xd37   : > { %v2059_v46 = vmul.f32 %v2917_v45, %v2052_v41 }
 0xd39   : > { %v2064_v47 = vpack.c.bf16 %v2059_v46, %v2059_v46 }
 0xd3b   : > { %2701 = vmatmul.mubr.msk.bf16.vlgmr.msra.gmra.mxu0 %vm1114_vm0, %v2064_v47 }
 0xd3c   : > { %2720 = vmatprep.mubr.msk.bf16.mxu0 %vm3278_vm1, %v3277_v10  ;;  %2713 = vmatpush3.bf16.msra.mxu0 %v2225_v33 }
 0xd3d   : > { %2714 = vmatprep.subr.bf16.mxu0 %v3277_v10 }
 0xd40   : > { %2715 = vmatpush3.bf16.msra.mxu0 %v2224_v18 }
 0xd41   : > { %2716 = vmatprep.subr.bf16.mxu0 %v3277_v10 }
 0xd44   : > { %2717 = vmatpush3.bf16.msra.mxu0 %v2223_v23 }
 0xd45   : > { %2718 = vmatprep.subr.bf16.mxu0 %v3277_v10 }
 0xd48   : > { %2719 = vmatpush3.bf16.msra.mxu0 %v2222_v26 }
 0xdfb   : > { %v2104_v48 = vpop.f32.mrf.mxu0 }
 0xdfc   : > { %v2110_v50 = vadd.f32 %v2104_v48, %v3756_v20  ;;  %v2124_v20 = vld [vmem:[#allocation16 + $0x18] sm:$0xff] }
 0xdfd   : > { %v2702_v51 = vpop.f32.mrf.mxu0  ;;  %v2164_v1 = vpack.c.bf16 %v2124_v20, %v2123_v62 }
 0xdfe   : > { %v3780_v52 = vadd.f32 %v2548_v49, %v2110_v50 }
 0xdff   : > { %v2107_v53 = vpop.f32.mrf.mxu0  ;;  %2705 = vmatpush3.bf16.msra.mxu1 %v2164_v1 }
 0xe00   : > { %v2135_v55 = vsel %vm1114_vm0, %v3780_v52, 0.0  ;;  %2706 = vmatprep.subr.bf16.mxu1 %v3277_v10  ;;  %v2554_v10 = vld [vmem:[#allocation19] ss:$0 sm:$0xff] }
 0xe01   : > { %2136 = vadd.xlane.f32.xlu1 %v2135_v55  ;;  %v2703_v56 = vpop.f32.mrf.mxu0 }
 0xe03   : > { %2707 = vmatpush3.bf16.msra.mxu1 %v2163_v2 }
 0xe8a   : > { %v2137_v57 = vpop.xlane.xlu1 %2136 }
 0xe8b   : > { %v2138_v58 = vmul.f32 0.03125, %v2137_v57 }
 0xe8d   : > { %v2139_v59 = vsub.f32 %v3780_v52, %v2138_v58  ;;  %v2557_v58 = vld [vmem:[%s3457_s22] ss:$0 sm:$0xff] }
 0xe8f   : > { %v2140_v60 = vmul.f32 %v2139_v59, %v2139_v59 }
 0xe91   : > { %v2141_v61 = vsel %vm1114_vm0, %v2140_v60, 0.0 }
 0xe92   : > { %2142 = vadd.xlane.f32.xlu1 %v2141_v61 }
 0xf1b   : > { %v2143_v3 = vpop.xlane.xlu1 %2142 }
 0xf1c   : > { %v2144_v4 = vmul.f32 0.03125, %v2143_v3 }
 0xf1e   : > { %v2145_v5 = vadd.f32 1e-05, %v2144_v4 }
 0xf20   : > { %2918 = vrsqrt.f32 %v2145_v5 }
 0xf2d   : > { %v2919_v6 = vpop.eup %2918 }
 0xf2e   : > { %v2147_v8 = vmul.f32 %v2919_v6, %v2139_v59 }
 0xf30   : > { %v2154_v11 = vmul.f32 %v2549_v7, %v2147_v8 }
 0xf32   : > { %v2161_v12 = vadd.f32 %v2550_v9, %v2154_v11 }
 0xf34   : > { %v2162_v13 = vpack.c.bf16 %v2161_v12, %v2161_v12 }
 0xf36   : > { %2709 = vmatmul.mubr.msk.bf16.vlgmr.msra.gmra.mxu1 %vm1114_vm0, %v2162_v13 }
 0xff6   : > { %v2208_v28 = vpop.f32.mrf.mxu1 }
 0xff7   : > { %v2209_v29 = vadd.f32 %v2551_v27, %v2208_v28 }
 0xff8   : > { %v2710_v54 = vpop.f32.mrf.mxu1 }
 0xff9   : > { %v2553_v30 = vmul.f32 -1.442695, %v2209_v29 }
 0xffa   : > { %v2211_v19 = vpop.f32.mrf.mxu1 }
 0xffb   : > { %2920 = vpow2.f32 %v2553_v30 }
 0xffc   : > { %v2711_v31 = vpop.f32.mrf.mxu1 }
0x1008   : > { %v2921_v32 = vpop.eup %2920 }
0x1009   : > { %v2217_v34 = vadd.f32 1.0, %v2921_v32 }
0x100b   : > { %2922 = vrcp.f32 %v2217_v34 }
0x1018   : > { %v2923_v35 = vpop.eup %2922 }
0x1019   : > { %v2220_v36 = vmul.f32 %v2923_v35, %v2209_v29 }
0x101b   : > { %v2221_v37 = vpack.c.bf16 %v2220_v36, %v2220_v36 }
0x101d   : > { %2721 = vmatmul.mubr.msk.bf16.vlgmr.msra.gmra.mxu0 %vm1213_vm2, %v2221_v37 }
0x10dd   : > { %v2269_v38 = vpop.f32.mrf.mxu0 }
0x10de   : > { %v2270_v39 = vadd.f32 %v2554_v10, %v2269_v38 }
0x10df   : > { %v2722_v40 = vpop.f32.mrf.mxu0 }
0x10e0   : > { %v2275_v41 = vmul.f32 0.5, %v2270_v39 }
0x10e1   : > { %v2272_v42 = vpop.f32.mrf.mxu0 }
0x10e2   : > { %v2276_v43 = vadd.f32 %v2275_v41, %v3780_v52  ;;  %v2556_v52 = vld [vmem:[%s3451_s25] ss:$0 sm:$0xff] }
0x10e3   : > { %v2723_v44 = vpop.f32.mrf.mxu0 }
0x10e4   : > { %v2279_v45 = vsel %vm1114_vm0, %v2276_v43, 0.0 }
0x10e5   : > { %2280 = vadd.xlane.f32.xlu1 %v2279_v45 }
0x116e   : > { %v2281_v46 = vpop.xlane.xlu1 %2280 }
0x116f   : > { %v2282_v47 = vmul.f32 0.03125, %v2281_v46 }
0x1171   : > { %v2283_v48 = vsub.f32 %v2276_v43, %v2282_v47 }
0x1173   : > { %v2284_v49 = vmul.f32 %v2283_v48, %v2283_v48 }
0x1175   : > { %v2285_v50 = vsel %vm1114_vm0, %v2284_v49, 0.0 }
0x1176   : > { %2286 = vadd.xlane.f32.xlu1 %v2285_v50 }
0x11ff   : > { %v2287_v51 = vpop.xlane.xlu1 %2286 }
0x1200   : > { %v2288_v53 = vmul.f32 0.03125, %v2287_v51 }
0x1202   : > { %v2289_v55 = vadd.f32 1e-05, %v2288_v53 }
0x1204   : > { %2924 = vrsqrt.f32 %v2289_v55 }
0x1211   : > { %v2925_v56 = vpop.eup %2924 }
0x1212   : > { %v2291_v57 = vmul.f32 %v2925_v56, %v2283_v48 }
0x1214   : > { %v2298_v59 = vmul.f32 %v2556_v52, %v2291_v57 }
0x1216   : > { %v2305_v60 = vadd.f32 %v2557_v58, %v2298_v59 }
0x1218   : > { %2306 = vst.msk [vmem:[%s1095_s6] sm:$0xff] %vm1114_vm0, %v2305_v60 }
0x1219 PF: > { %s87_s0 = sadd.s32 1, %s3230_s0  }
0x121a   : > { %p84_p4 = scmp.ge.s32.totalorder %s87_s0, 4  }
0x121c   :  { %86 = sbr.rel (!%p84_p4) target bundleno = 62 (0x3e), region = 247 }
0x1221   :  { %2326 = vsyncpa [#allocation6], 1 }
0x1222   :  { %2328 = vsyncpa [#allocation6 + $0x1], 1 }
0x1223   :  { %2329 = vsyncpa [#allocation8], 1 }
0x1224   :  { %2330 = vsyncpa [#allocation11], 1 }
0x1225   :  { %2331 = vsyncpa [#allocation14], 1 }
0x1226   :  { %2332 = vsyncpa [#allocation17], 1 }
0x1227   :  { %2333 = vsyncpa [#allocation20], 1 }

</bundles_post_ra>
